<compile_context>
chip_gen: v6e
topology: v6e:2x2x1
jax: 0.10.0
libtpu: 0.0.40
codegen_flags: <defaults>
</compile_context>

<pallas_src>
import functools
from math import sqrt

import jax
import jax.numpy as jnp
from jax import lax
from jax.experimental import pallas as pl
from jax.experimental.pallas import tpu as pltpu

_C = 64      # uniform internal channel count (all layers zero-padded to 64)
_COL0 = 8    # interior left offset inside the padded W axis (sublane aligned)


def _round_up(x, m):
    return (x + m - 1) // m * m


# ----------------------------- Pallas kernel ------------------------------ #

def _vdsr_fused_kernel(x_ref, w_ref, b_ref, o_ref, buf_ref, *,
                       H, W, depth, row_chunk):
    """Fused depth-layer 3x3 'same' conv stack for one batch element.

    x_ref  : (1, H, W, C)  bf16   input, channels zero-padded to C
    w_ref  : (depth, 9*C, C) bf16 per-layer weights, rows ordered (dy, dx, cin)
    b_ref  : (depth, 1, C) f32    per-layer bias (zero-padded)
    o_ref  : (1, H, W, C)  f32    output (first Cout channels are valid)
    buf_ref: VMEM (2, H+2, Wp, C) bf16 ping-pong activations with zero halo;
             interior columns are [COL0, COL0+W).
    """
    C = buf_ref.shape[-1]
    Wp = buf_ref.shape[2]
    K = 9 * C
    col0 = _COL0
    n_chunks = H // row_chunk
    act_dt = buf_ref.dtype

    # ---- halo-only zeroing (cheap, every grid step; interiors are fully
    # overwritten each layer so only the frame must be zero).
    zero_row = jnp.zeros((Wp, C), act_dt)
    zero_lcol = jnp.zeros((H + 2, col0, C), act_dt)
    zero_rcol = jnp.zeros((H + 2, Wp - (col0 + W), C), act_dt)
    for slot in range(2):
        buf_ref[slot, 0, :, :] = zero_row
        buf_ref[slot, H + 1, :, :] = zero_row
        buf_ref[slot, :, 0:col0, :] = zero_lcol
        buf_ref[slot, :, col0 + W:Wp, :] = zero_rcol

    # ---- load input interior (bf16), sublane-aligned store at offset 8.
    buf_ref[0, 1:H + 1, col0:col0 + W, :] = x_ref[0]

    def conv_chunk(src_slot, w_l, b_l, r0, relu):
        # im2col over all 9 taps -> one (Rc*W, 9C) x (9C, C) MXU matmul.
        taps = []
        for dy in range(3):
            for dx in range(3):
                taps.append(
                    buf_ref[src_slot, pl.ds(r0 + dy, row_chunk),
                            col0 - 1 + dx: col0 - 1 + dx + W, :])
        patch = jnp.concatenate(taps, axis=-1).reshape(row_chunk * W, K)
        acc = jnp.dot(patch, w_l, preferred_element_type=jnp.float32)
        acc = acc + b_l                       # f32 (1, C) bias broadcast
        if relu:
            acc = jnp.maximum(acc, 0.0)
        return acc.reshape(row_chunk, W, C)

    # ---- hidden layers 0..depth-2 (conv + ReLU), ping-pong between slots.
    def layer_body(layer, carry):
        src_slot = lax.rem(layer, 2)
        dst_slot = 1 - src_slot
        w_l = w_ref[layer]                    # (9C, C) bf16, loaded once/layer
        b_l = b_ref[layer]                    # (1, C) f32

        def chunk_body(i, c):
            r0 = pl.multiple_of(i * row_chunk, row_chunk)
            y = conv_chunk(src_slot, w_l, b_l, r0, relu=True)
            buf_ref[dst_slot, pl.ds(r0 + 1, row_chunk),
                    col0:col0 + W, :] = y.astype(act_dt)
            return c

        return lax.fori_loop(0, n_chunks, chunk_body, carry, unroll=False)

    lax.fori_loop(0, depth - 1, layer_body, 0, unroll=False)

    # ---- final layer: no ReLU, f32 result straight to the HBM output block.
    final_src = (depth - 1) % 2
    w_f = w_ref[depth - 1]
    b_f = b_ref[depth - 1]

    def final_chunk(i, c):
        r0 = pl.multiple_of(i * row_chunk, row_chunk)
        y = conv_chunk(final_src, w_f, b_f, r0, relu=False)
        o_ref[0, pl.ds(r0, row_chunk), :, :] = y.astype(o_ref.dtype)
        return c

    lax.fori_loop(0, n_chunks, final_chunk, 0, unroll=False)


# ------------------------------- Wrapper ----------------------------------- #

def vdsr_forward(x_nchw, params):
    """VDSR_Net_v1 forward (NCHW in / NCHW out), fused single Pallas kernel."""
    N, Cin, H, W = x_nchw.shape
    depth = len(params)
    Cout = params[-1][1].shape[0]
    C = _C
    assert Cin <= C and Cout <= C

    # Row chunk bounds the per-layer patch/acc temps (and the MXU M dim).
    row_chunk = 8 if (H % 8 == 0) else H
    assert H % row_chunk == 0

    # NCHW -> NHWC, one-time channel pad to 64 lanes, bf16 activations.
    x = jnp.transpose(x_nchw, (0, 2, 3, 1)).astype(jnp.bfloat16)
    x = jnp.pad(x, ((0, 0), (0, 0), (0, 0), (0, C - Cin)))

    # Weights: (depth, 9*C, C) bf16 with row order (dy, dx, cin) matching the
    # in-kernel tap concat. Layer-0 Cin / last-layer Cout are zero-padded
    # (padded input channels are zero, padded output channels sliced off).
    w_list, b_list = [], []
    for (w, b) in params:
        cin, cout = w.shape[2], w.shape[3]
        wp = jnp.zeros((3, 3, C, C), jnp.float32).at[:, :, :cin, :cout].set(w)
        w_list.append(wp.reshape(9 * C, C))
        b_list.append(jnp.zeros((C,), jnp.float32).at[:cout].set(b).reshape(1, C))
    w_all = jnp.stack(w_list).astype(jnp.bfloat16)   # (depth, 9C, C) bf16
    b_all = jnp.stack(b_list)                        # (depth, 1, C)  f32

    # Padded activation width: 8-column left halo pad, total multiple of 8.
    Wp = _COL0 + _round_up(W + 1, 8)

    kernel = functools.partial(_vdsr_fused_kernel, H=H, W=W, depth=depth,
                               row_chunk=row_chunk)

    flops = 2.0 * N * depth * H * W * (9 * C) * C
    bytes_accessed = (2 * x.size + 2 * w_all.size + 4 * b_all.size
                      + 4 * N * H * W * C)

    # Resident VMEM estimate: ping-pong buffers + weights/bias + double-
    # buffered in/out blocks + patch/acc temps; generous headroom, capped.
    resident = (2 * (H + 2) * Wp * C * 2
                + depth * 9 * C * C * 2 + depth * C * 4
                + 2 * H * W * C * (2 + 4)
                + 3 * row_chunk * W * 9 * C * 2
                + 2 * row_chunk * W * C * 4)
    vmem_limit = int(min(64 * 2 ** 20, max(32 * 2 ** 20, 4 * resident)))

    out = pl.pallas_call(
        kernel,
        out_shape=jax.ShapeDtypeStruct((N, H, W, C), jnp.float32),
        grid=(N,),
        in_specs=[
            pl.BlockSpec((1, H, W, C), lambda n: (n, 0, 0, 0)),
            pl.BlockSpec((depth, 9 * C, C), lambda n: (0, 0, 0)),
            pl.BlockSpec((depth, 1, C), lambda n: (0, 0, 0)),
        ],
        out_specs=pl.BlockSpec((1, H, W, C), lambda n: (n, 0, 0, 0)),
        scratch_shapes=[pltpu.VMEM((2, H + 2, Wp, C), jnp.bfloat16)],
        compiler_params=pltpu.CompilerParams(
            dimension_semantics=("parallel",),
            vmem_limit_bytes=vmem_limit),
        cost_estimate=pl.CostEstimate(
            flops=int(flops), transcendentals=0,
            bytes_accessed=int(bytes_accessed)),
    )(x, w_all, b_all)

    out = out[..., :Cout]                     # drop padded output channels
    return jnp.transpose(out, (0, 3, 1, 2))   # NHWC -> NCHW


# ----------------------------- Model / params ----------------------------- #

def init_vdsr_params(key, in_channels=3, out_channels=3, depth=10):
    """Deterministic init matching the module's layer shapes.

    Conv weights: xavier_uniform with gain = calculate_gain('relu') = sqrt(2).
    Biases: PyTorch Conv2d default uniform(-1/sqrt(fan_in), 1/sqrt(fan_in)).
    Weights stored HWIO: (3, 3, Cin, Cout).
    """
    chans = [(in_channels, 64)] + [(64, 64)] * (depth - 2) + [(64, out_channels)]
    params = []
    for (cin, cout) in chans:
        key, kw, kb = jax.random.split(key, 3)
        fan_in = cin * 3 * 3
        fan_out = cout * 3 * 3
        gain = sqrt(2.0)
        bound_w = gain * sqrt(6.0 / (fan_in + fan_out))
        w = jax.random.uniform(kw, (3, 3, cin, cout), jnp.float32,
                               minval=-bound_w, maxval=bound_w)
        bound_b = 1.0 / sqrt(fan_in)
        b = jax.random.uniform(kb, (cout,), jnp.float32,
                               minval=-bound_b, maxval=bound_b)
        params.append((w, b))
    return params


# ----------------------------- References (JAX) ---------------------------- #

def _ref_forward(x_nchw, params):
    """Pure f32 reference (matches the PyTorch module)."""
    x = jnp.transpose(x_nchw, (0, 2, 3, 1))
    n_layers = len(params)
    for i, (w, b) in enumerate(params):
        y = lax.conv_general_dilated(
            x, w, window_strides=(1, 1), padding="SAME",
            dimension_numbers=("NHWC", "HWIO", "NHWC"))
        y = y + b[None, None, None, :]
        if i < n_layers - 1:
            y = jnp.maximum(y, 0.0)
        x = y
    return jnp.transpose(x, (0, 3, 1, 2))


def _ref_forward_bf16(x_nchw, params):
    """Reference mimicking the kernel's numerics: bf16 weights/activations,
    f32 accumulation/bias/ReLU, f32 final output."""
    f32 = jnp.float32
    q = lambda a: a.astype(jnp.bfloat16).astype(f32)
    x = q(jnp.transpose(x_nchw, (0, 2, 3, 1)))
    n_layers = len(params)
    for i, (w, b) in enumerate(params):
        y = lax.conv_general_dilated(
            x, q(w), window_strides=(1, 1), padding="SAME",
            dimension_numbers=("NHWC", "HWIO", "NHWC"),
            preferred_element_type=f32)
        y = y + b[None, None, None, :]
        if i < n_layers - 1:
            y = q(jnp.maximum(y, 0.0))
        x = y
    return jnp.transpose(x, (0, 3, 1, 2))


# ---------------------------------- Main ----------------------------------- #

if __name__ == "__main__":
    key = jax.random.PRNGKey(0)
    k_params, k_x = jax.random.split(key)

    in_channels, out_channels, depth = 3, 3, 10
    params = init_vdsr_params(k_params, in_channels, out_channels, depth)

    # NCHW input like the PyTorch module.
    x = jax.random.normal(k_x, (2, in_channels, 16, 16), jnp.float32)

    out = jax.jit(vdsr_forward)(x, params)
    out = jax.block_until_ready(out)

    assert out.shape == (2, out_channels, 16, 16), out.shape
    assert out.dtype == jnp.float32

    # Tight check vs. a reference with the same bf16 operand quantization.
    ref_q = jax.block_until_ready(_ref_forward_bf16(x, params))
    assert jnp.allclose(out, ref_q, rtol=1e-2, atol=1e-2), (
        float(jnp.max(jnp.abs(out - ref_q))))

    # Loose sanity check vs. the pure f32 module semantics.
    ref = jax.block_until_ready(_ref_forward(x, params))
    assert jnp.allclose(out, ref, rtol=1e-1, atol=1e-1), (
        float(jnp.max(jnp.abs(out - ref))))

    print("KERNEL_OK")
</pallas_src>

<mosaic_0001>
module attributes {stable_mosaic.version = 11 : i64} {
  func.func @_vdsr_fused_kernel(%arg0: i32, %arg1: memref<1x16x16x64xbf16, #tpu.memory_space<vmem>>, %arg2: memref<10x576x64xbf16, #tpu.memory_space<vmem>>, %arg3: memref<10x1x64xf32, #tpu.memory_space<vmem>>, %arg4: memref<1x16x16x64xf32, #tpu.memory_space<vmem>>, %arg5: memref<2x18x32x64xbf16, #tpu.memory_space<vmem>>) attributes {dimension_semantics = [#tpu.dimension_semantics<parallel>], iteration_bounds = array<i64: 2>, scalar_prefetch = 0 : i64, scratch_operands = 1 : i64, tpu.core_type = #tpu.core_type<tc>, window_params = [{transform_indices = @transform_0, window_bounds = array<i64: 1, 16, 16, 64>}, {pipeline_mode = #tpu.pipeline_mode<synchronous>, transform_indices = @transform_1, window_bounds = array<i64: 10, 576, 64>}, {pipeline_mode = #tpu.pipeline_mode<synchronous>, transform_indices = @transform_2, window_bounds = array<i64: 10, 1, 64>}, {transform_indices = @transform_3, window_bounds = array<i64: 1, 16, 16, 64>}]} {
    %cst = arith.constant 0.000000e+00 : bf16
    %0 = vector.broadcast %cst : bf16 to vector<32x64xbf16>
    %cst_0 = arith.constant 0.000000e+00 : bf16
    %1 = vector.broadcast %cst_0 : bf16 to vector<18x8x64xbf16>
    %cst_1 = arith.constant 0.000000e+00 : bf16
    %2 = vector.broadcast %cst_1 : bf16 to vector<18x8x64xbf16>
    %c0 = arith.constant 0 : index
    %c0_2 = arith.constant 0 : index
    %c0_3 = arith.constant 0 : index
    %c0_4 = arith.constant 0 : index
    %3 = vector.load %arg5[%c0, %c0_2, %c0_3, %c0_4] : memref<2x18x32x64xbf16, #tpu.memory_space<vmem>>, vector<1x1x32x64xbf16>
    %4 = vector.shape_cast %3 : vector<1x1x32x64xbf16> to vector<32x64xbf16>
    %5 = vector.shape_cast %0 : vector<32x64xbf16> to vector<1x1x32x64xbf16>
    tpu.vector_store %arg5[%c0, %c0_2, %c0_3, %c0_4], %5 {strides = array<i32>} : memref<2x18x32x64xbf16, #tpu.memory_space<vmem>>, vector<1x1x32x64xbf16>,
    %c0_5 = arith.constant 0 : index
    %c17 = arith.constant 17 : index
    %c0_6 = arith.constant 0 : index
    %c0_7 = arith.constant 0 : index
    %6 = vector.load %arg5[%c0_5, %c17, %c0_6, %c0_7] : memref<2x18x32x64xbf16, #tpu.memory_space<vmem>>, vector<1x1x32x64xbf16>
    %7 = vector.shape_cast %6 : vector<1x1x32x64xbf16> to vector<32x64xbf16>
    %8 = vector.shape_cast %0 : vector<32x64xbf16> to vector<1x1x32x64xbf16>
    tpu.vector_store %arg5[%c0_5, %c17, %c0_6, %c0_7], %8 {strides = array<i32>} : memref<2x18x32x64xbf16, #tpu.memory_space<vmem>>, vector<1x1x32x64xbf16>,
    %c0_8 = arith.constant 0 : index
    %c0_9 = arith.constant 0 : index
    %c0_10 = arith.constant 0 : index
    %c0_11 = arith.constant 0 : index
    %9 = vector.load %arg5[%c0_8, %c0_9, %c0_10, %c0_11] : memref<2x18x32x64xbf16, #tpu.memory_space<vmem>>, vector<1x18x8x64xbf16>
    %10 = vector.shape_cast %9 : vector<1x18x8x64xbf16> to vector<18x8x64xbf16>
    %11 = vector.shape_cast %1 : vector<18x8x64xbf16> to vector<1x18x8x64xbf16>
    tpu.vector_store %arg5[%c0_8, %c0_9, %c0_10, %c0_11], %11 {strides = array<i32>} : memref<2x18x32x64xbf16, #tpu.memory_space<vmem>>, vector<1x18x8x64xbf16>,
    %c0_12 = arith.constant 0 : index
    %c0_13 = arith.constant 0 : index
    %c24 = arith.constant 24 : index
    %c0_14 = arith.constant 0 : index
    %12 = vector.load %arg5[%c0_12, %c0_13, %c24, %c0_14] : memref<2x18x32x64xbf16, #tpu.memory_space<vmem>>, vector<1x18x8x64xbf16>
    %13 = vector.shape_cast %12 : vector<1x18x8x64xbf16> to vector<18x8x64xbf16>
    %14 = vector.shape_cast %2 : vector<18x8x64xbf16> to vector<1x18x8x64xbf16>
    tpu.vector_store %arg5[%c0_12, %c0_13, %c24, %c0_14], %14 {strides = array<i32>} : memref<2x18x32x64xbf16, #tpu.memory_space<vmem>>, vector<1x18x8x64xbf16>,
    %c1 = arith.constant 1 : index
    %c0_15 = arith.constant 0 : index
    %c0_16 = arith.constant 0 : index
    %c0_17 = arith.constant 0 : index
    %15 = vector.load %arg5[%c1, %c0_15, %c0_16, %c0_17] : memref<2x18x32x64xbf16, #tpu.memory_space<vmem>>, vector<1x1x32x64xbf16>
    %16 = vector.shape_cast %15 : vector<1x1x32x64xbf16> to vector<32x64xbf16>
    %17 = vector.shape_cast %0 : vector<32x64xbf16> to vector<1x1x32x64xbf16>
    tpu.vector_store %arg5[%c1, %c0_15, %c0_16, %c0_17], %17 {strides = array<i32>} : memref<2x18x32x64xbf16, #tpu.memory_space<vmem>>, vector<1x1x32x64xbf16>,
    %c1_18 = arith.constant 1 : index
    %c17_19 = arith.constant 17 : index
    %c0_20 = arith.constant 0 : index
    %c0_21 = arith.constant 0 : index
    %18 = vector.load %arg5[%c1_18, %c17_19, %c0_20, %c0_21] : memref<2x18x32x64xbf16, #tpu.memory_space<vmem>>, vector<1x1x32x64xbf16>
    %19 = vector.shape_cast %18 : vector<1x1x32x64xbf16> to vector<32x64xbf16>
    %20 = vector.shape_cast %0 : vector<32x64xbf16> to vector<1x1x32x64xbf16>
    tpu.vector_store %arg5[%c1_18, %c17_19, %c0_20, %c0_21], %20 {strides = array<i32>} : memref<2x18x32x64xbf16, #tpu.memory_space<vmem>>, vector<1x1x32x64xbf16>,
    %c1_22 = arith.constant 1 : index
    %c0_23 = arith.constant 0 : index
    %c0_24 = arith.constant 0 : index
    %c0_25 = arith.constant 0 : index
    %21 = vector.load %arg5[%c1_22, %c0_23, %c0_24, %c0_25] : memref<2x18x32x64xbf16, #tpu.memory_space<vmem>>, vector<1x18x8x64xbf16>
    %22 = vector.shape_cast %21 : vector<1x18x8x64xbf16> to vector<18x8x64xbf16>
    %23 = vector.shape_cast %1 : vector<18x8x64xbf16> to vector<1x18x8x64xbf16>
    tpu.vector_store %arg5[%c1_22, %c0_23, %c0_24, %c0_25], %23 {strides = array<i32>} : memref<2x18x32x64xbf16, #tpu.memory_space<vmem>>, vector<1x18x8x64xbf16>,
    %c1_26 = arith.constant 1 : index
    %c0_27 = arith.constant 0 : index
    %c24_28 = arith.constant 24 : index
    %c0_29 = arith.constant 0 : index
    %24 = vector.load %arg5[%c1_26, %c0_27, %c24_28, %c0_29] : memref<2x18x32x64xbf16, #tpu.memory_space<vmem>>, vector<1x18x8x64xbf16>
    %25 = vector.shape_cast %24 : vector<1x18x8x64xbf16> to vector<18x8x64xbf16>
    %26 = vector.shape_cast %2 : vector<18x8x64xbf16> to vector<1x18x8x64xbf16>
    tpu.vector_store %arg5[%c1_26, %c0_27, %c24_28, %c0_29], %26 {strides = array<i32>} : memref<2x18x32x64xbf16, #tpu.memory_space<vmem>>, vector<1x18x8x64xbf16>,
    %c0_30 = arith.constant 0 : index
    %c0_31 = arith.constant 0 : index
    %c0_32 = arith.constant 0 : index
    %c0_33 = arith.constant 0 : index
    %27 = vector.load %arg1[%c0_30, %c0_31, %c0_32, %c0_33] : memref<1x16x16x64xbf16, #tpu.memory_space<vmem>>, vector<1x16x16x64xbf16>
    %28 = vector.shape_cast %27 : vector<1x16x16x64xbf16> to vector<16x16x64xbf16>
    %c0_34 = arith.constant 0 : index
    %c1_35 = arith.constant 1 : index
    %c8 = arith.constant 8 : index
    %c0_36 = arith.constant 0 : index
    %29 = vector.load %arg5[%c0_34, %c1_35, %c8, %c0_36] : memref<2x18x32x64xbf16, #tpu.memory_space<vmem>>, vector<1x16x16x64xbf16>
    %30 = vector.shape_cast %29 : vector<1x16x16x64xbf16> to vector<16x16x64xbf16>
    %31 = vector.shape_cast %28 : vector<16x16x64xbf16> to vector<1x16x16x64xbf16>
    tpu.vector_store %arg5[%c0_34, %c1_35, %c8, %c0_36], %31 {strides = array<i32>} : memref<2x18x32x64xbf16, #tpu.memory_space<vmem>>, vector<1x16x16x64xbf16>,
    %c0_i32 = arith.constant 0 : i32
    %c9_i32 = arith.constant 9 : i32
    %32 = arith.addi %c0_i32, %c9_i32 : i32
    %c1_i32 = arith.constant 1 : i32
    scf.for %arg6 = %c0_i32 to %32 step %c1_i32  : i32 {
      %c2_i32_46 = arith.constant 2 : i32
      %38 = arith.remsi %arg6, %c2_i32_46 : i32
      %c1_i32_47 = arith.constant 1 : i32
      %39 = arith.subi %c1_i32_47, %38 : i32
      %40 = arith.index_cast %arg6 : i32 to index
      %c0_48 = arith.constant 0 : index
      %c0_49 = arith.constant 0 : index
      %41 = vector.load %arg2[%40, %c0_48, %c0_49] : memref<10x576x64xbf16, #tpu.memory_space<vmem>>, vector<1x576x64xbf16>
      %42 = vector.shape_cast %41 : vector<1x576x64xbf16> to vector<576x64xbf16>
      %43 = arith.index_cast %arg6 : i32 to index
      %c0_50 = arith.constant 0 : index
      %c0_51 = arith.constant 0 : index
      %44 = vector.load %arg3[%43, %c0_50, %c0_51] : memref<10x1x64xf32, #tpu.memory_space<vmem>>, vector<1x1x64xf32>
      %45 = vector.shape_cast %44 : vector<1x1x64xf32> to vector<1x64xf32>
      %c0_i32_52 = arith.constant 0 : i32
      %c2_i32_53 = arith.constant 2 : i32
      %46 = arith.addi %c0_i32_52, %c2_i32_53 : i32
      %c1_i32_54 = arith.constant 1 : i32
      scf.for %arg7 = %c0_i32_52 to %46 step %c1_i32_54  : i32 {
        %c8_i32 = arith.constant 8 : i32
        %47 = arith.muli %arg7, %c8_i32 : i32
        %48 = tpu.assume_multiple %47, 8 : i32
        %c0_i32_56 = arith.constant 0 : i32
        %49 = arith.addi %48, %c0_i32_56 : i32
        %50 = arith.index_cast %38 : i32 to index
        %51 = arith.index_cast %49 : i32 to index
        %c7 = arith.constant 7 : index
        %c0_57 = arith.constant 0 : index
        %52 = vector.load %arg5[%50, %51, %c7, %c0_57] : memref<2x18x32x64xbf16, #tpu.memory_space<vmem>>, vector<1x8x16x64xbf16>
        %53 = vector.shape_cast %52 : vector<1x8x16x64xbf16> to vector<8x16x64xbf16>
        %c0_i32_58 = arith.constant 0 : i32
        %54 = arith.addi %48, %c0_i32_58 : i32
        %55 = arith.index_cast %38 : i32 to index
        %56 = arith.index_cast %54 : i32 to index
        %c8_59 = arith.constant 8 : index
        %c0_60 = arith.constant 0 : index
        %57 = vector.load %arg5[%55, %56, %c8_59, %c0_60] : memref<2x18x32x64xbf16, #tpu.memory_space<vmem>>, vector<1x8x16x64xbf16>
        %58 = vector.shape_cast %57 : vector<1x8x16x64xbf16> to vector<8x16x64xbf16>
        %c0_i32_61 = arith.constant 0 : i32
        %59 = arith.addi %48, %c0_i32_61 : i32
        %60 = arith.index_cast %38 : i32 to index
        %61 = arith.index_cast %59 : i32 to index
        %c9_62 = arith.constant 9 : index
        %c0_63 = arith.constant 0 : index
        %62 = vector.load %arg5[%60, %61, %c9_62, %c0_63] : memref<2x18x32x64xbf16, #tpu.memory_space<vmem>>, vector<1x8x16x64xbf16>
        %63 = vector.shape_cast %62 : vector<1x8x16x64xbf16> to vector<8x16x64xbf16>
        %c1_i32_64 = arith.constant 1 : i32
        %64 = arith.addi %48, %c1_i32_64 : i32
        %65 = arith.index_cast %38 : i32 to index
        %66 = arith.index_cast %64 : i32 to index
        %c7_65 = arith.constant 7 : index
        %c0_66 = arith.constant 0 : index
        %67 = vector.load %arg5[%65, %66, %c7_65, %c0_66] : memref<2x18x32x64xbf16, #tpu.memory_space<vmem>>, vector<1x8x16x64xbf16>
        %68 = vector.shape_cast %67 : vector<1x8x16x64xbf16> to vector<8x16x64xbf16>
        %c1_i32_67 = arith.constant 1 : i32
        %69 = arith.addi %48, %c1_i32_67 : i32
        %70 = arith.index_cast %38 : i32 to index
        %71 = arith.index_cast %69 : i32 to index
        %c8_68 = arith.constant 8 : index
        %c0_69 = arith.constant 0 : index
        %72 = vector.load %arg5[%70, %71, %c8_68, %c0_69] : memref<2x18x32x64xbf16, #tpu.memory_space<vmem>>, vector<1x8x16x64xbf16>
        %73 = vector.shape_cast %72 : vector<1x8x16x64xbf16> to vector<8x16x64xbf16>
        %c1_i32_70 = arith.constant 1 : i32
        %74 = arith.addi %48, %c1_i32_70 : i32
        %75 = arith.index_cast %38 : i32 to index
        %76 = arith.index_cast %74 : i32 to index
        %c9_71 = arith.constant 9 : index
        %c0_72 = arith.constant 0 : index
        %77 = vector.load %arg5[%75, %76, %c9_71, %c0_72] : memref<2x18x32x64xbf16, #tpu.memory_space<vmem>>, vector<1x8x16x64xbf16>
        %78 = vector.shape_cast %77 : vector<1x8x16x64xbf16> to vector<8x16x64xbf16>
        %c2_i32_73 = arith.constant 2 : i32
        %79 = arith.addi %48, %c2_i32_73 : i32
        %80 = arith.index_cast %38 : i32 to index
        %81 = arith.index_cast %79 : i32 to index
        %c7_74 = arith.constant 7 : index
        %c0_75 = arith.constant 0 : index
        %82 = vector.load %arg5[%80, %81, %c7_74, %c0_75] : memref<2x18x32x64xbf16, #tpu.memory_space<vmem>>, vector<1x8x16x64xbf16>
        %83 = vector.shape_cast %82 : vector<1x8x16x64xbf16> to vector<8x16x64xbf16>
        %c2_i32_76 = arith.constant 2 : i32
        %84 = arith.addi %48, %c2_i32_76 : i32
        %85 = arith.index_cast %38 : i32 to index
        %86 = arith.index_cast %84 : i32 to index
        %c8_77 = arith.constant 8 : index
        %c0_78 = arith.constant 0 : index
        %87 = vector.load %arg5[%85, %86, %c8_77, %c0_78] : memref<2x18x32x64xbf16, #tpu.memory_space<vmem>>, vector<1x8x16x64xbf16>
        %88 = vector.shape_cast %87 : vector<1x8x16x64xbf16> to vector<8x16x64xbf16>
        %c2_i32_79 = arith.constant 2 : i32
        %89 = arith.addi %48, %c2_i32_79 : i32
        %90 = arith.index_cast %38 : i32 to index
        %91 = arith.index_cast %89 : i32 to index
        %c9_80 = arith.constant 9 : index
        %c0_81 = arith.constant 0 : index
        %92 = vector.load %arg5[%90, %91, %c9_80, %c0_81] : memref<2x18x32x64xbf16, #tpu.memory_space<vmem>>, vector<1x8x16x64xbf16>
        %93 = vector.shape_cast %92 : vector<1x8x16x64xbf16> to vector<8x16x64xbf16>
        %94 = tpu.concatenate %53, %58, %63, %68, %73, %78, %83, %88, %93 in 2 : vector<8x16x64xbf16>, vector<8x16x64xbf16>, vector<8x16x64xbf16>, vector<8x16x64xbf16>, vector<8x16x64xbf16>, vector<8x16x64xbf16>, vector<8x16x64xbf16>, vector<8x16x64xbf16>, vector<8x16x64xbf16> -> vector<8x16x576xbf16>
        %95 = vector.shape_cast %94 : vector<8x16x576xbf16> to vector<128x576xbf16>
        %cst_82 = arith.constant dense<0.000000e+00> : vector<128x64xf32>
        %96 = tpu.matmul %95, %42, %cst_82 {dimension_numbers = #tpu.dot_dimension_numbers<[1], [0], [0], [1], [0, 0, 1, 1], [], []>} : vector<128x576xbf16>, vector<576x64xbf16>, vector<128x64xf32> -> vector<128x64xf32>
        %97 = vector.broadcast %45 : vector<1x64xf32> to vector<128x64xf32>
        %98 = arith.addf %96, %97 : vector<128x64xf32>
        %cst_83 = arith.constant 0.000000e+00 : f32
        %99 = vector.broadcast %cst_83 : f32 to vector<128x64xf32>
        %100 = arith.maximumf %98, %99 : vector<128x64xf32>
        %101 = vector.shape_cast %100 : vector<128x64xf32> to vector<8x16x64xf32>
        %102 = arith.truncf %101 : vector<8x16x64xf32> to vector<8x16x64xbf16>
        %c1_i32_84 = arith.constant 1 : i32
        %103 = arith.addi %48, %c1_i32_84 : i32
        %104 = arith.index_cast %39 : i32 to index
        %105 = arith.index_cast %103 : i32 to index
        %c8_85 = arith.constant 8 : index
        %c0_86 = arith.constant 0 : index
        %106 = vector.load %arg5[%104, %105, %c8_85, %c0_86] : memref<2x18x32x64xbf16, #tpu.memory_space<vmem>>, vector<1x8x16x64xbf16>
        %107 = vector.shape_cast %106 : vector<1x8x16x64xbf16> to vector<8x16x64xbf16>
        %108 = vector.shape_cast %102 : vector<8x16x64xbf16> to vector<1x8x16x64xbf16>
        tpu.vector_store %arg5[%104, %105, %c8_85, %c0_86], %108 {strides = array<i32>} : memref<2x18x32x64xbf16, #tpu.memory_space<vmem>>, vector<1x8x16x64xbf16>,
      }
      %c2_i32_55 = arith.constant 2 : i32
    }
    %c9_i32_37 = arith.constant 9 : i32
    %c9 = arith.constant 9 : index
    %c0_38 = arith.constant 0 : index
    %c0_39 = arith.constant 0 : index
    %33 = vector.load %arg2[%c9, %c0_38, %c0_39] : memref<10x576x64xbf16, #tpu.memory_space<vmem>>, vector<1x576x64xbf16>
    %34 = vector.shape_cast %33 : vector<1x576x64xbf16> to vector<576x64xbf16>
    %c9_40 = arith.constant 9 : index
    %c0_41 = arith.constant 0 : index
    %c0_42 = arith.constant 0 : index
    %35 = vector.load %arg3[%c9_40, %c0_41, %c0_42] : memref<10x1x64xf32, #tpu.memory_space<vmem>>, vector<1x1x64xf32>
    %36 = vector.shape_cast %35 : vector<1x1x64xf32> to vector<1x64xf32>
    %c0_i32_43 = arith.constant 0 : i32
    %c2_i32 = arith.constant 2 : i32
    %37 = arith.addi %c0_i32_43, %c2_i32 : i32
    %c1_i32_44 = arith.constant 1 : i32
    scf.for %arg6 = %c0_i32_43 to %37 step %c1_i32_44  : i32 {
      %c8_i32 = arith.constant 8 : i32
      %38 = arith.muli %arg6, %c8_i32 : i32
      %39 = tpu.assume_multiple %38, 8 : i32
      %c0_i32_46 = arith.constant 0 : i32
      %40 = arith.addi %39, %c0_i32_46 : i32
      %c1_47 = arith.constant 1 : index
      %41 = arith.index_cast %40 : i32 to index
      %c7 = arith.constant 7 : index
      %c0_48 = arith.constant 0 : index
      %42 = vector.load %arg5[%c1_47, %41, %c7, %c0_48] : memref<2x18x32x64xbf16, #tpu.memory_space<vmem>>, vector<1x8x16x64xbf16>
      %43 = vector.shape_cast %42 : vector<1x8x16x64xbf16> to vector<8x16x64xbf16>
      %c0_i32_49 = arith.constant 0 : i32
      %44 = arith.addi %39, %c0_i32_49 : i32
      %c1_50 = arith.constant 1 : index
      %45 = arith.index_cast %44 : i32 to index
      %c8_51 = arith.constant 8 : index
      %c0_52 = arith.constant 0 : index
      %46 = vector.load %arg5[%c1_50, %45, %c8_51, %c0_52] : memref<2x18x32x64xbf16, #tpu.memory_space<vmem>>, vector<1x8x16x64xbf16>
      %47 = vector.shape_cast %46 : vector<1x8x16x64xbf16> to vector<8x16x64xbf16>
      %c0_i32_53 = arith.constant 0 : i32
      %48 = arith.addi %39, %c0_i32_53 : i32
      %c1_54 = arith.constant 1 : index
      %49 = arith.index_cast %48 : i32 to index
      %c9_55 = arith.constant 9 : index
      %c0_56 = arith.constant 0 : index
      %50 = vector.load %arg5[%c1_54, %49, %c9_55, %c0_56] : memref<2x18x32x64xbf16, #tpu.memory_space<vmem>>, vector<1x8x16x64xbf16>
      %51 = vector.shape_cast %50 : vector<1x8x16x64xbf16> to vector<8x16x64xbf16>
      %c1_i32_57 = arith.constant 1 : i32
      %52 = arith.addi %39, %c1_i32_57 : i32
      %c1_58 = arith.constant 1 : index
      %53 = arith.index_cast %52 : i32 to index
      %c7_59 = arith.constant 7 : index
      %c0_60 = arith.constant 0 : index
      %54 = vector.load %arg5[%c1_58, %53, %c7_59, %c0_60] : memref<2x18x32x64xbf16, #tpu.memory_space<vmem>>, vector<1x8x16x64xbf16>
      %55 = vector.shape_cast %54 : vector<1x8x16x64xbf16> to vector<8x16x64xbf16>
      %c1_i32_61 = arith.constant 1 : i32
      %56 = arith.addi %39, %c1_i32_61 : i32
      %c1_62 = arith.constant 1 : index
      %57 = arith.index_cast %56 : i32 to index
      %c8_63 = arith.constant 8 : index
      %c0_64 = arith.constant 0 : index
      %58 = vector.load %arg5[%c1_62, %57, %c8_63, %c0_64] : memref<2x18x32x64xbf16, #tpu.memory_space<vmem>>, vector<1x8x16x64xbf16>
      %59 = vector.shape_cast %58 : vector<1x8x16x64xbf16> to vector<8x16x64xbf16>
      %c1_i32_65 = arith.constant 1 : i32
      %60 = arith.addi %39, %c1_i32_65 : i32
      %c1_66 = arith.constant 1 : index
      %61 = arith.index_cast %60 : i32 to index
      %c9_67 = arith.constant 9 : index
      %c0_68 = arith.constant 0 : index
      %62 = vector.load %arg5[%c1_66, %61, %c9_67, %c0_68] : memref<2x18x32x64xbf16, #tpu.memory_space<vmem>>, vector<1x8x16x64xbf16>
      %63 = vector.shape_cast %62 : vector<1x8x16x64xbf16> to vector<8x16x64xbf16>
      %c2_i32_69 = arith.constant 2 : i32
      %64 = arith.addi %39, %c2_i32_69 : i32
      %c1_70 = arith.constant 1 : index
      %65 = arith.index_cast %64 : i32 to index
      %c7_71 = arith.constant 7 : index
      %c0_72 = arith.constant 0 : index
      %66 = vector.load %arg5[%c1_70, %65, %c7_71, %c0_72] : memref<2x18x32x64xbf16, #tpu.memory_space<vmem>>, vector<1x8x16x64xbf16>
      %67 = vector.shape_cast %66 : vector<1x8x16x64xbf16> to vector<8x16x64xbf16>
      %c2_i32_73 = arith.constant 2 : i32
      %68 = arith.addi %39, %c2_i32_73 : i32
      %c1_74 = arith.constant 1 : index
      %69 = arith.index_cast %68 : i32 to index
      %c8_75 = arith.constant 8 : index
      %c0_76 = arith.constant 0 : index
      %70 = vector.load %arg5[%c1_74, %69, %c8_75, %c0_76] : memref<2x18x32x64xbf16, #tpu.memory_space<vmem>>, vector<1x8x16x64xbf16>
      %71 = vector.shape_cast %70 : vector<1x8x16x64xbf16> to vector<8x16x64xbf16>
      %c2_i32_77 = arith.constant 2 : i32
      %72 = arith.addi %39, %c2_i32_77 : i32
      %c1_78 = arith.constant 1 : index
      %73 = arith.index_cast %72 : i32 to index
      %c9_79 = arith.constant 9 : index
      %c0_80 = arith.constant 0 : index
      %74 = vector.load %arg5[%c1_78, %73, %c9_79, %c0_80] : memref<2x18x32x64xbf16, #tpu.memory_space<vmem>>, vector<1x8x16x64xbf16>
      %75 = vector.shape_cast %74 : vector<1x8x16x64xbf16> to vector<8x16x64xbf16>
      %76 = tpu.concatenate %43, %47, %51, %55, %59, %63, %67, %71, %75 in 2 : vector<8x16x64xbf16>, vector<8x16x64xbf16>, vector<8x16x64xbf16>, vector<8x16x64xbf16>, vector<8x16x64xbf16>, vector<8x16x64xbf16>, vector<8x16x64xbf16>, vector<8x16x64xbf16>, vector<8x16x64xbf16> -> vector<8x16x576xbf16>
      %77 = vector.shape_cast %76 : vector<8x16x576xbf16> to vector<128x576xbf16>
      %cst_81 = arith.constant dense<0.000000e+00> : vector<128x64xf32>
      %78 = tpu.matmul %77, %34, %cst_81 {dimension_numbers = #tpu.dot_dimension_numbers<[1], [0], [0], [1], [0, 0, 1, 1], [], []>} : vector<128x576xbf16>, vector<576x64xbf16>, vector<128x64xf32> -> vector<128x64xf32>
      %79 = vector.broadcast %36 : vector<1x64xf32> to vector<128x64xf32>
      %80 = arith.addf %78, %79 : vector<128x64xf32>
      %81 = vector.shape_cast %80 : vector<128x64xf32> to vector<8x16x64xf32>
      %c0_82 = arith.constant 0 : index
      %82 = arith.index_cast %39 : i32 to index
      %c0_83 = arith.constant 0 : index
      %c0_84 = arith.constant 0 : index
      %83 = vector.load %arg4[%c0_82, %82, %c0_83, %c0_84] : memref<1x16x16x64xf32, #tpu.memory_space<vmem>>, vector<1x8x16x64xf32>
      %84 = vector.shape_cast %83 : vector<1x8x16x64xf32> to vector<8x16x64xf32>
      %85 = vector.shape_cast %81 : vector<8x16x64xf32> to vector<1x8x16x64xf32>
      tpu.vector_store %arg4[%c0_82, %82, %c0_83, %c0_84], %85 {strides = array<i32>} : memref<1x16x16x64xf32, #tpu.memory_space<vmem>>, vector<1x8x16x64xf32>,
    }
    %c2_i32_45 = arith.constant 2 : i32
    return
  }
  func.func @transform_0(%arg0: i32) -> (i32, i32, i32, i32) {
    %c0_i32 = arith.constant 0 : i32
    %c0_i32_0 = arith.constant 0 : i32
    %c0_i32_1 = arith.constant 0 : i32
    %c0_i32_2 = arith.constant 0 : i32
    return %arg0, %c0_i32, %c0_i32_0, %c0_i32_1 : i32, i32, i32, i32
  }
  func.func @transform_1(%arg0: i32) -> (i32, i32, i32) {
    %c0_i32 = arith.constant 0 : i32
    %c0_i32_0 = arith.constant 0 : i32
    %c0_i32_1 = arith.constant 0 : i32
    %c0_i32_2 = arith.constant 0 : i32
    return %c0_i32, %c0_i32_0, %c0_i32_1 : i32, i32, i32
  }
  func.func @transform_2(%arg0: i32) -> (i32, i32, i32) {
    %c0_i32 = arith.constant 0 : i32
    %c0_i32_0 = arith.constant 0 : i32
    %c0_i32_1 = arith.constant 0 : i32
    %c0_i32_2 = arith.constant 0 : i32
    return %c0_i32, %c0_i32_0, %c0_i32_1 : i32, i32, i32
  }
  func.func @transform_3(%arg0: i32) -> (i32, i32, i32, i32) {
    %c0_i32 = arith.constant 0 : i32
    %c0_i32_0 = arith.constant 0 : i32
    %c0_i32_1 = arith.constant 0 : i32
    %c0_i32_2 = arith.constant 0 : i32
    return %arg0, %c0_i32, %c0_i32_0, %c0_i32_1 : i32, i32, i32, i32
  }
}

</mosaic_0001>

<bundles_post_ra>
// kernel: vdsr_forward.1
= control target key start
LH: loop header
LB: loop body
LE: loop exit
PB: predicated region body
PF: predicated region fallthrough
CT: control target
= control target key end

     0   :  { %s6207_s12 = smov 0   ;;  %s9384_s0 = inlined_call_operand.vmem [shape: bf16[2,16,16,64], index: 0, kind: input, shape index: {}]   ;;  %s9385_s1 = inlined_call_operand.vmem [shape: bf16[10,576,64], index: 1, kind: input, shape index: {}]   ;;  %s9386_s2 = inlined_call_operand.vmem [shape: f32[10,1,64], index: 2, kind: input, shape index: {}]   ;;  %s9387_s3 = inlined_call_operand.vmem [shape: f32[2,16,16,64], index: 3, kind: output, shape index: {}]  }
   0x1 LB: > { %s4970_s13 = sadd.s32 4294967295, %s6170_s12   ;;  %p4974_p0 = scmp.ge.s32.totalorder %s6170_s12, 1  ;;  %s6170_s12 = sphi %s6207_s12, %s13_s12  }
   0x2   : > { %p137_p1 = scmp.lt.s32.totalorder %s6170_s12, 3 }
   0x4   : > { %p138_p2 = pnand %p4974_p0, %p137_p1 }
   0x6   : > { %141 = sbr.rel (%p138_p2) target bundleno = 1086 (0x43e), region = 32 }
   0xb   : > { %vm172_vm0 = vcmask 519168   ;;  %p6217_p3 = scmp.lt.s32.totalorder %s4970_s13, 1  ;;  %v6184_v0 = vmov 0   ;;  %s6475_s23 = smov 0  }
   0xc   : > { %173 = vst.msk [vmem:[#allocation2] sm:$0xf] %vm172_vm0, %v6184_v0  ;;  %174 = vst.msk [vmem:[#allocation2 + $0x4] sm:$0xf] %vm172_vm0, %v6184_v0 }
   0xd   : > { %175 = vst.msk [vmem:[#allocation2 + $0x8] sm:$0xf] %vm172_vm0, %v6184_v0  ;;  %176 = vst.msk [vmem:[#allocation2 + $0xc] sm:$0xf] %vm172_vm0, %v6184_v0  ;;  %s10232_s13 = smov (!%p6217_p3, %s4970_s13), 1 }
   0xe   : > { %178 = vst.msk [vmem:[#allocation2 + $0x110] sm:$0xf] %vm172_vm0, %v6184_v0  ;;  %179 = vst.msk [vmem:[#allocation2 + $0x114] sm:$0xf] %vm172_vm0, %v6184_v0  ;;  %s5552_s15 = sshll.u32 %s10232_s13, 7  ;;  %s5553_s16 = sshll.u32 %s10232_s13, 8 }
   0xf   : > { %180 = vst.msk [vmem:[#allocation2 + $0x118] sm:$0xf] %vm172_vm0, %v6184_v0  ;;  %181 = vst.msk [vmem:[#allocation2 + $0x11c] sm:$0xf] %vm172_vm0, %v6184_v0  ;;  %s6404_s19 = scalar_lea.vmem %s9384_s0, %s5552_s15  ;;  %s6409_s22 = scalar_lea.vmem %s9387_s3, %s5553_s16 }
  0x10   : > { %183 = vst.msk [vmem:[#allocation2 + $0x10] sm:$0xf] %vm172_vm0, %v6184_v0  ;;  %184 = vst.msk [vmem:[#allocation2 + $0x20] sm:$0xf] %vm172_vm0, %v6184_v0  ;;  %v264_v1 = vld [vmem:[%s6404_s19] sm:$0xf] }
  0x11   : > { %185 = vst.msk [vmem:[#allocation2 + $0x30] sm:$0xf] %vm172_vm0, %v6184_v0  ;;  %186 = vst.msk [vmem:[#allocation2 + $0x40] sm:$0xf] %vm172_vm0, %v6184_v0  ;;  %v265_v2 = vld [vmem:[%s6404_s19 + $0x4] sm:$0xf] }
  0x12   : > { %187 = vst.msk [vmem:[#allocation2 + $0x50] sm:$0xf] %vm172_vm0, %v6184_v0  ;;  %188 = vst.msk [vmem:[#allocation2 + $0x60] sm:$0xf] %vm172_vm0, %v6184_v0  ;;  %v266_v3 = vld [vmem:[%s6404_s19 + $0x8] sm:$0xf] }
  0x13   : > { %189 = vst.msk [vmem:[#allocation2 + $0x70] sm:$0xf] %vm172_vm0, %v6184_v0  ;;  %190 = vst.msk [vmem:[#allocation2 + $0x80] sm:$0xf] %vm172_vm0, %v6184_v0  ;;  %v267_v4 = vld [vmem:[%s6404_s19 + $0xc] sm:$0xf] }
  0x14   : > { %191 = vst.msk [vmem:[#allocation2 + $0x90] sm:$0xf] %vm172_vm0, %v6184_v0  ;;  %192 = vst.msk [vmem:[#allocation2 + $0xa0] sm:$0xf] %vm172_vm0, %v6184_v0  ;;  %v268_v5 = vld [vmem:[%s6404_s19 + $0x10] sm:$0xf] }
  0x15   : > { %193 = vst.msk [vmem:[#allocation2 + $0xb0] sm:$0xf] %vm172_vm0, %v6184_v0  ;;  %194 = vst.msk [vmem:[#allocation2 + $0xc0] sm:$0xf] %vm172_vm0, %v6184_v0  ;;  %v269_v6 = vld [vmem:[%s6404_s19 + $0x14] sm:$0xf] }
  0x16   : > { %195 = vst.msk [vmem:[#allocation2 + $0xd0] sm:$0xf] %vm172_vm0, %v6184_v0  ;;  %196 = vst.msk [vmem:[#allocation2 + $0xe0] sm:$0xf] %vm172_vm0, %v6184_v0  ;;  %v270_v7 = vld [vmem:[%s6404_s19 + $0x18] sm:$0xf] }
  0x17   : > { %197 = vst.msk [vmem:[#allocation2 + $0xf0] sm:$0xf] %vm172_vm0, %v6184_v0  ;;  %198 = vst.msk [vmem:[#allocation2 + $0x100] sm:$0xf] %vm172_vm0, %v6184_v0  ;;  %v271_v8 = vld [vmem:[%s6404_s19 + $0x1c] sm:$0xf] }
  0x18   : > { %201 = vst.msk [vmem:[#allocation2 + $0x1c] sm:$0xf] %vm172_vm0, %v6184_v0  ;;  %202 = vst.msk [vmem:[#allocation2 + $0x2c] sm:$0xf] %vm172_vm0, %v6184_v0  ;;  %v272_v9 = vld [vmem:[%s6404_s19 + $0x20] sm:$0xf] }
  0x19   : > { %203 = vst.msk [vmem:[#allocation2 + $0x3c] sm:$0xf] %vm172_vm0, %v6184_v0  ;;  %204 = vst.msk [vmem:[#allocation2 + $0x4c] sm:$0xf] %vm172_vm0, %v6184_v0  ;;  %v273_v10 = vld [vmem:[%s6404_s19 + $0x24] sm:$0xf] }
  0x1a   : > { %205 = vst.msk [vmem:[#allocation2 + $0x5c] sm:$0xf] %vm172_vm0, %v6184_v0  ;;  %206 = vst.msk [vmem:[#allocation2 + $0x6c] sm:$0xf] %vm172_vm0, %v6184_v0  ;;  %v274_v11 = vld [vmem:[%s6404_s19 + $0x28] sm:$0xf] }
  0x1b   : > { %207 = vst.msk [vmem:[#allocation2 + $0x7c] sm:$0xf] %vm172_vm0, %v6184_v0  ;;  %208 = vst.msk [vmem:[#allocation2 + $0x8c] sm:$0xf] %vm172_vm0, %v6184_v0  ;;  %v275_v12 = vld [vmem:[%s6404_s19 + $0x2c] sm:$0xf] }
  0x1c   : > { %209 = vst.msk [vmem:[#allocation2 + $0x9c] sm:$0xf] %vm172_vm0, %v6184_v0  ;;  %210 = vst.msk [vmem:[#allocation2 + $0xac] sm:$0xf] %vm172_vm0, %v6184_v0  ;;  %v276_v13 = vld [vmem:[%s6404_s19 + $0x30] sm:$0xf] }
  0x1d   : > { %211 = vst.msk [vmem:[#allocation2 + $0xbc] sm:$0xf] %vm172_vm0, %v6184_v0  ;;  %212 = vst.msk [vmem:[#allocation2 + $0xcc] sm:$0xf] %vm172_vm0, %v6184_v0  ;;  %v277_v14 = vld [vmem:[%s6404_s19 + $0x34] sm:$0xf] }
  0x1e   : > { %213 = vst.msk [vmem:[#allocation2 + $0xdc] sm:$0xf] %vm172_vm0, %v6184_v0  ;;  %214 = vst.msk [vmem:[#allocation2 + $0xec] sm:$0xf] %vm172_vm0, %v6184_v0  ;;  %v278_v15 = vld [vmem:[%s6404_s19 + $0x38] sm:$0xf] }
  0x1f   : > { %215 = vst.msk [vmem:[#allocation2 + $0xfc] sm:$0xf] %vm172_vm0, %v6184_v0  ;;  %216 = vst.msk [vmem:[#allocation2 + $0x10c] sm:$0xf] %vm172_vm0, %v6184_v0  ;;  %v279_v16 = vld [vmem:[%s6404_s19 + $0x3c] sm:$0xf] }
  0x20   : > { %219 = vst.msk [vmem:[#allocation2 + $0x120] sm:$0xf] %vm172_vm0, %v6184_v0  ;;  %220 = vst.msk [vmem:[#allocation2 + $0x124] sm:$0xf] %vm172_vm0, %v6184_v0  ;;  %v280_v17 = vld [vmem:[%s6404_s19 + $0x40] sm:$0xf] }
  0x21   : > { %221 = vst.msk [vmem:[#allocation2 + $0x128] sm:$0xf] %vm172_vm0, %v6184_v0  ;;  %222 = vst.msk [vmem:[#allocation2 + $0x12c] sm:$0xf] %vm172_vm0, %v6184_v0  ;;  %v281_v18 = vld [vmem:[%s6404_s19 + $0x44] sm:$0xf] }
  0x22   : > { %224 = vst.msk [vmem:[#allocation2 + $0x230] sm:$0xf] %vm172_vm0, %v6184_v0  ;;  %225 = vst.msk [vmem:[#allocation2 + $0x234] sm:$0xf] %vm172_vm0, %v6184_v0  ;;  %v282_v19 = vld [vmem:[%s6404_s19 + $0x48] sm:$0xf] }
  0x23   : > { %226 = vst.msk [vmem:[#allocation2 + $0x238] sm:$0xf] %vm172_vm0, %v6184_v0  ;;  %227 = vst.msk [vmem:[#allocation2 + $0x23c] sm:$0xf] %vm172_vm0, %v6184_v0  ;;  %v283_v20 = vld [vmem:[%s6404_s19 + $0x4c] sm:$0xf] }
  0x24   : > { %229 = vst.msk [vmem:[#allocation2 + $0x130] sm:$0xf] %vm172_vm0, %v6184_v0  ;;  %230 = vst.msk [vmem:[#allocation2 + $0x140] sm:$0xf] %vm172_vm0, %v6184_v0  ;;  %v284_v21 = vld [vmem:[%s6404_s19 + $0x50] sm:$0xf] }
  0x25   : > { %231 = vst.msk [vmem:[#allocation2 + $0x150] sm:$0xf] %vm172_vm0, %v6184_v0  ;;  %232 = vst.msk [vmem:[#allocation2 + $0x160] sm:$0xf] %vm172_vm0, %v6184_v0  ;;  %v285_v22 = vld [vmem:[%s6404_s19 + $0x54] sm:$0xf] }
  0x26   : > { %233 = vst.msk [vmem:[#allocation2 + $0x170] sm:$0xf] %vm172_vm0, %v6184_v0  ;;  %234 = vst.msk [vmem:[#allocation2 + $0x180] sm:$0xf] %vm172_vm0, %v6184_v0  ;;  %v286_v23 = vld [vmem:[%s6404_s19 + $0x58] sm:$0xf] }
  0x27   : > { %235 = vst.msk [vmem:[#allocation2 + $0x190] sm:$0xf] %vm172_vm0, %v6184_v0  ;;  %236 = vst.msk [vmem:[#allocation2 + $0x1a0] sm:$0xf] %vm172_vm0, %v6184_v0  ;;  %v287_v24 = vld [vmem:[%s6404_s19 + $0x5c] sm:$0xf] }
  0x28   : > { %237 = vst.msk [vmem:[#allocation2 + $0x1b0] sm:$0xf] %vm172_vm0, %v6184_v0  ;;  %238 = vst.msk [vmem:[#allocation2 + $0x1c0] sm:$0xf] %vm172_vm0, %v6184_v0  ;;  %v288_v25 = vld [vmem:[%s6404_s19 + $0x60] sm:$0xf] }
  0x29   : > { %239 = vst.msk [vmem:[#allocation2 + $0x1d0] sm:$0xf] %vm172_vm0, %v6184_v0  ;;  %240 = vst.msk [vmem:[#allocation2 + $0x1e0] sm:$0xf] %vm172_vm0, %v6184_v0  ;;  %v289_v26 = vld [vmem:[%s6404_s19 + $0x64] sm:$0xf] }
  0x2a   : > { %241 = vst.msk [vmem:[#allocation2 + $0x1f0] sm:$0xf] %vm172_vm0, %v6184_v0  ;;  %242 = vst.msk [vmem:[#allocation2 + $0x200] sm:$0xf] %vm172_vm0, %v6184_v0  ;;  %v290_v27 = vld [vmem:[%s6404_s19 + $0x68] sm:$0xf] }
  0x2b   : > { %243 = vst.msk [vmem:[#allocation2 + $0x210] sm:$0xf] %vm172_vm0, %v6184_v0  ;;  %244 = vst.msk [vmem:[#allocation2 + $0x220] sm:$0xf] %vm172_vm0, %v6184_v0  ;;  %v291_v28 = vld [vmem:[%s6404_s19 + $0x6c] sm:$0xf] }
  0x2c   : > { %247 = vst.msk [vmem:[#allocation2 + $0x13c] sm:$0xf] %vm172_vm0, %v6184_v0  ;;  %248 = vst.msk [vmem:[#allocation2 + $0x14c] sm:$0xf] %vm172_vm0, %v6184_v0  ;;  %v292_v29 = vld [vmem:[%s6404_s19 + $0x70] sm:$0xf] }
  0x2d   : > { %249 = vst.msk [vmem:[#allocation2 + $0x15c] sm:$0xf] %vm172_vm0, %v6184_v0  ;;  %250 = vst.msk [vmem:[#allocation2 + $0x16c] sm:$0xf] %vm172_vm0, %v6184_v0  ;;  %v293_v30 = vld [vmem:[%s6404_s19 + $0x74] sm:$0xf] }
  0x2e   : > { %251 = vst.msk [vmem:[#allocation2 + $0x17c] sm:$0xf] %vm172_vm0, %v6184_v0  ;;  %252 = vst.msk [vmem:[#allocation2 + $0x18c] sm:$0xf] %vm172_vm0, %v6184_v0  ;;  %v294_v31 = vld [vmem:[%s6404_s19 + $0x78] sm:$0xf] }
  0x2f   : > { %253 = vst.msk [vmem:[#allocation2 + $0x19c] sm:$0xf] %vm172_vm0, %v6184_v0  ;;  %254 = vst.msk [vmem:[#allocation2 + $0x1ac] sm:$0xf] %vm172_vm0, %v6184_v0  ;;  %v295_v32 = vld [vmem:[%s6404_s19 + $0x7c] sm:$0xf] }
  0x30   : > { %255 = vst.msk [vmem:[#allocation2 + $0x1bc] sm:$0xf] %vm172_vm0, %v6184_v0  ;;  %256 = vst.msk [vmem:[#allocation2 + $0x1cc] sm:$0xf] %vm172_vm0, %v6184_v0 }
  0x31   : > { %257 = vst.msk [vmem:[#allocation2 + $0x1dc] sm:$0xf] %vm172_vm0, %v6184_v0  ;;  %258 = vst.msk [vmem:[#allocation2 + $0x1ec] sm:$0xf] %vm172_vm0, %v6184_v0 }
  0x32   : > { %259 = vst.msk [vmem:[#allocation2 + $0x1fc] sm:$0xf] %vm172_vm0, %v6184_v0  ;;  %260 = vst.msk [vmem:[#allocation2 + $0x20c] sm:$0xf] %vm172_vm0, %v6184_v0 }
  0x33   : > { %261 = vst.msk [vmem:[#allocation2 + $0x21c] sm:$0xf] %vm172_vm0, %v6184_v0  ;;  %262 = vst.msk [vmem:[#allocation2 + $0x22c] sm:$0xf] %vm172_vm0, %v6184_v0 }
  0x34   : > { %182 = vst.msk [vmem:[#allocation2] sm:$0xf] %vm172_vm0, %v6184_v0  ;;  %199 = vst.msk [vmem:[#allocation2 + $0x110] sm:$0xf] %vm172_vm0, %v6184_v0 }
  0x35   : > { %200 = vst.msk [vmem:[#allocation2 + $0xc] sm:$0xf] %vm172_vm0, %v6184_v0  ;;  %217 = vst.msk [vmem:[#allocation2 + $0x11c] sm:$0xf] %vm172_vm0, %v6184_v0 }
  0x36   : > { %228 = vst.msk [vmem:[#allocation2 + $0x120] sm:$0xf] %vm172_vm0, %v6184_v0  ;;  %245 = vst.msk [vmem:[#allocation2 + $0x230] sm:$0xf] %vm172_vm0, %v6184_v0 }
  0x37   : > { %246 = vst.msk [vmem:[#allocation2 + $0x12c] sm:$0xf] %vm172_vm0, %v6184_v0  ;;  %263 = vst.msk [vmem:[#allocation2 + $0x23c] sm:$0xf] %vm172_vm0, %v6184_v0 }
  0x38   : > { %297 = vst.msk [vmem:[#allocation2 + $0x14] sm:$0xf] %vm172_vm0, %v264_v1  ;;  %298 = vst.msk [vmem:[#allocation2 + $0x18] sm:$0xf] %vm172_vm0, %v265_v2 }
  0x39   : > { %299 = vst.msk [vmem:[#allocation2 + $0x24] sm:$0xf] %vm172_vm0, %v266_v3  ;;  %300 = vst.msk [vmem:[#allocation2 + $0x28] sm:$0xf] %vm172_vm0, %v267_v4 }
  0x3a   : > { %301 = vst.msk [vmem:[#allocation2 + $0x34] sm:$0xf] %vm172_vm0, %v268_v5  ;;  %302 = vst.msk [vmem:[#allocation2 + $0x38] sm:$0xf] %vm172_vm0, %v269_v6 }
  0x3b   : > { %303 = vst.msk [vmem:[#allocation2 + $0x44] sm:$0xf] %vm172_vm0, %v270_v7  ;;  %304 = vst.msk [vmem:[#allocation2 + $0x48] sm:$0xf] %vm172_vm0, %v271_v8 }
  0x3c   : > { %305 = vst.msk [vmem:[#allocation2 + $0x54] sm:$0xf] %vm172_vm0, %v272_v9  ;;  %306 = vst.msk [vmem:[#allocation2 + $0x58] sm:$0xf] %vm172_vm0, %v273_v10 }
  0x3d   : > { %307 = vst.msk [vmem:[#allocation2 + $0x64] sm:$0xf] %vm172_vm0, %v274_v11  ;;  %308 = vst.msk [vmem:[#allocation2 + $0x68] sm:$0xf] %vm172_vm0, %v275_v12 }
  0x3e   : > { %309 = vst.msk [vmem:[#allocation2 + $0x74] sm:$0xf] %vm172_vm0, %v276_v13  ;;  %310 = vst.msk [vmem:[#allocation2 + $0x78] sm:$0xf] %vm172_vm0, %v277_v14 }
  0x3f   : > { %311 = vst.msk [vmem:[#allocation2 + $0x84] sm:$0xf] %vm172_vm0, %v278_v15  ;;  %312 = vst.msk [vmem:[#allocation2 + $0x88] sm:$0xf] %vm172_vm0, %v279_v16 }
  0x40   : > { %313 = vst.msk [vmem:[#allocation2 + $0x94] sm:$0xf] %vm172_vm0, %v280_v17  ;;  %314 = vst.msk [vmem:[#allocation2 + $0x98] sm:$0xf] %vm172_vm0, %v281_v18 }
  0x41   : > { %315 = vst.msk [vmem:[#allocation2 + $0xa4] sm:$0xf] %vm172_vm0, %v282_v19  ;;  %316 = vst.msk [vmem:[#allocation2 + $0xa8] sm:$0xf] %vm172_vm0, %v283_v20 }
  0x42   : > { %317 = vst.msk [vmem:[#allocation2 + $0xb4] sm:$0xf] %vm172_vm0, %v284_v21  ;;  %318 = vst.msk [vmem:[#allocation2 + $0xb8] sm:$0xf] %vm172_vm0, %v285_v22 }
  0x43   : > { %319 = vst.msk [vmem:[#allocation2 + $0xc4] sm:$0xf] %vm172_vm0, %v286_v23  ;;  %320 = vst.msk [vmem:[#allocation2 + $0xc8] sm:$0xf] %vm172_vm0, %v287_v24 }
  0x44   : > { %321 = vst.msk [vmem:[#allocation2 + $0xd4] sm:$0xf] %vm172_vm0, %v288_v25  ;;  %322 = vst.msk [vmem:[#allocation2 + $0xd8] sm:$0xf] %vm172_vm0, %v289_v26 }
  0x45   : > { %323 = vst.msk [vmem:[#allocation2 + $0xe4] sm:$0xf] %vm172_vm0, %v290_v27  ;;  %324 = vst.msk [vmem:[#allocation2 + $0xe8] sm:$0xf] %vm172_vm0, %v291_v28 }
  0x46   : > { %325 = vst.msk [vmem:[#allocation2 + $0xf4] sm:$0xf] %vm172_vm0, %v292_v29  ;;  %326 = vst.msk [vmem:[#allocation2 + $0xf8] sm:$0xf] %vm172_vm0, %v293_v30 }
  0x47   : > { %327 = vst.msk [vmem:[#allocation2 + $0x104] sm:$0xf] %vm172_vm0, %v294_v31  ;;  %328 = vst.msk [vmem:[#allocation2 + $0x108] sm:$0xf] %vm172_vm0, %v295_v32 }
  0x48 LB: >> { %p335_p4 = scmp.lt.s32.totalorder %s6174_s23, 0  ;;  %s336_s24 = ssub.s32 0, %s6174_s23  ;;  %s6174_s23 = sphi %s6475_s23, %s334_s23  }
  0x49   : >> { %s4979_s25 = smin.u32 %s6174_s23, %s336_s24  ;;  %s5554_s26 = smul.u32 288, %s6174_s23 }
  0x4a   : >> { %s338_s27 = sand.u32 1, %s4979_s25   ;;  %s417_s30 = scalar_lea.vmem %s9386_s2, %s6174_s23 }
  0x4b   : >> { %s339_s4 = ssub.s32 0, %s338_s27  ;;  %s6491_s7 = scalar_lea.vmem %s9385_s1, %s5554_s26  ;;  %v6493_v33 = vld [vmem:[%s417_s30] ss:$0 sm:$0xff] }
  0x4c   : >> { %9543 = vst [vmem:[#allocation3_spill] sm:$0xff] %v6493_v33  ;;  %s10234_s4 = smov (!%p335_p4, %s339_s4), %s338_s27  ;;  %v6498_v34 = vld [vmem:[%s6491_s7] sm:$0xf]  ;;  %v6501_v35 = vld [vmem:[%s6491_s7 + $0x4] sm:$0xf]  ;;  %s6714_s9 = smov 0  }
  0x4d   : >> { %9544 = vst [vmem:[#allocation4_spill] sm:$0xff] %v6498_v34  ;;  %9545 = vst [vmem:[#allocation5_spill] sm:$0xff] %v6501_v35  ;;  %v6504_v36 = vld [vmem:[%s6491_s7 + $0x8] sm:$0xf]  ;;  %v6507_v37 = vld [vmem:[%s6491_s7 + $0xc] sm:$0xf] }
  0x4e   : >> { %9546 = vst [vmem:[#allocation6_spill] sm:$0xff] %v6504_v36  ;;  %9547 = vst [vmem:[#allocation7_spill] sm:$0xff] %v6507_v37  ;;  %v6510_v38 = vld [vmem:[%s6491_s7 + $0x10] sm:$0xf]  ;;  %v6513_v39 = vld [vmem:[%s6491_s7 + $0x14] sm:$0xf] }
  0x4f   : >> { %9548 = vst [vmem:[#allocation8_spill] sm:$0xff] %v6510_v38  ;;  %9549 = vst [vmem:[#allocation9_spill] sm:$0xff] %v6513_v39  ;;  %s341_s8 = ssub.s32 1, %s10234_s4  ;;  %v6517_v40 = vld [vmem:[%s6491_s7 + $0x18] sm:$0xf] }
  0x50   : >> { %9550 = vst [vmem:[#allocation10_spill] sm:$0xff] %v6517_v40  ;;  %v6520_v41 = vld [vmem:[%s6491_s7 + $0x1c] sm:$0xf]  ;;  %v6523_v42 = vld [vmem:[%s6491_s7 + $0x20] sm:$0xf] }
  0x51   : >> { %9551 = vst [vmem:[#allocation11_spill] sm:$0xff] %v6520_v41  ;;  %9552 = vst [vmem:[#allocation12_spill] sm:$0xff] %v6523_v42  ;;  %v6526_v43 = vld [vmem:[%s6491_s7 + $0x24] sm:$0xf]  ;;  %v6529_v44 = vld [vmem:[%s6491_s7 + $0x28] sm:$0xf] }
  0x52   : >> { %9553 = vst [vmem:[#allocation13_spill] sm:$0xff] %v6526_v43  ;;  %9554 = vst [vmem:[#allocation14_spill] sm:$0xff] %v6529_v44  ;;  %v6532_v45 = vld [vmem:[%s6491_s7 + $0x2c] sm:$0xf]  ;;  %v6535_v46 = vld [vmem:[%s6491_s7 + $0x30] sm:$0xf] }
  0x53   : >> { %9555 = vst [vmem:[#allocation15_spill] sm:$0xff] %v6532_v45  ;;  %9556 = vst [vmem:[#allocation16_spill] sm:$0xff] %v6535_v46  ;;  %v6538_v47 = vld [vmem:[%s6491_s7 + $0x34] sm:$0xf]  ;;  %v6541_v48 = vld [vmem:[%s6491_s7 + $0x38] sm:$0xf] }
  0x54   : >> { %9557 = vst [vmem:[#allocation17_spill] sm:$0xff] %v6538_v47  ;;  %9558 = vst [vmem:[#allocation18_spill] sm:$0xff] %v6541_v48  ;;  %v6544_v49 = vld [vmem:[%s6491_s7 + $0x3c] sm:$0xf]  ;;  %v6547_v50 = vld [vmem:[%s6491_s7 + $0x40] sm:$0xf] }
  0x55   : >> { %9559 = vst [vmem:[#allocation19_spill] sm:$0xff] %v6544_v49  ;;  %9560 = vst [vmem:[#allocation20_spill] sm:$0xff] %v6547_v50  ;;  %v6550_v51 = vld [vmem:[%s6491_s7 + $0x44] sm:$0xf]  ;;  %v6553_v52 = vld [vmem:[%s6491_s7 + $0x48] sm:$0xf] }
  0x56   : >> { %9561 = vst [vmem:[#allocation21_spill] sm:$0xff] %v6550_v51  ;;  %9562 = vst [vmem:[#allocation22_spill] sm:$0xff] %v6553_v52  ;;  %v6556_v53 = vld [vmem:[%s6491_s7 + $0x4c] sm:$0xf]  ;;  %v6559_v54 = vld [vmem:[%s6491_s7 + $0x50] sm:$0xf] }
  0x57   : >> { %9563 = vst [vmem:[#allocation23_spill] sm:$0xff] %v6556_v53  ;;  %9564 = vst [vmem:[#allocation24_spill] sm:$0xff] %v6559_v54  ;;  %v6562_v55 = vld [vmem:[%s6491_s7 + $0x54] sm:$0xf]  ;;  %v6565_v56 = vld [vmem:[%s6491_s7 + $0x58] sm:$0xf] }
  0x58   : >> { %9565 = vst [vmem:[#allocation25_spill] sm:$0xff] %v6562_v55  ;;  %9566 = vst [vmem:[#allocation26_spill] sm:$0xff] %v6565_v56  ;;  %v6568_v57 = vld [vmem:[%s6491_s7 + $0x5c] sm:$0xf]  ;;  %v6571_v58 = vld [vmem:[%s6491_s7 + $0x60] sm:$0xf] }
  0x59   : >> { %9567 = vst [vmem:[#allocation27_spill] sm:$0xff] %v6568_v57  ;;  %9568 = vst [vmem:[#allocation28_spill] sm:$0xff] %v6571_v58  ;;  %v6574_v59 = vld [vmem:[%s6491_s7 + $0x64] sm:$0xf]  ;;  %v6577_v60 = vld [vmem:[%s6491_s7 + $0x68] sm:$0xf] }
  0x5a   : >> { %9569 = vst [vmem:[#allocation29_spill] sm:$0xff] %v6574_v59  ;;  %9570 = vst [vmem:[#allocation30_spill] sm:$0xff] %v6577_v60  ;;  %v6580_v61 = vld [vmem:[%s6491_s7 + $0x6c] sm:$0xf]  ;;  %v6583_v62 = vld [vmem:[%s6491_s7 + $0x70] sm:$0xf] }
  0x5b   : >> { %9571 = vst [vmem:[#allocation31_spill] sm:$0xff] %v6580_v61  ;;  %9572 = vst [vmem:[#allocation32_spill] sm:$0xff] %v6583_v62  ;;  %v6586_v63 = vld [vmem:[%s6491_s7 + $0x74] sm:$0xf]  ;;  %v6589_v0 = vld [vmem:[%s6491_s7 + $0x78] sm:$0xf] }
  0x5c   : >> { %9573 = vst [vmem:[#allocation33_spill] sm:$0xff] %v6586_v63  ;;  %9574 = vst [vmem:[#allocation34_spill] sm:$0xff] %v6589_v0  ;;  %v6592_v1 = vld [vmem:[%s6491_s7 + $0x7c] sm:$0xf]  ;;  %v6595_v2 = vld [vmem:[%s6491_s7 + $0x80] sm:$0xf] }
  0x5d   : >> { %9575 = vst [vmem:[#allocation35_spill] sm:$0xff] %v6592_v1  ;;  %9576 = vst [vmem:[#allocation36_spill] sm:$0xff] %v6595_v2  ;;  %v6598_v3 = vld [vmem:[%s6491_s7 + $0x84] sm:$0xf]  ;;  %v6601_v4 = vld [vmem:[%s6491_s7 + $0x88] sm:$0xf] }
  0x5e   : >> { %9577 = vst [vmem:[#allocation37_spill] sm:$0xff] %v6598_v3  ;;  %9578 = vst [vmem:[#allocation38_spill] sm:$0xff] %v6601_v4  ;;  %v6604_v5 = vld [vmem:[%s6491_s7 + $0x8c] sm:$0xf]  ;;  %v6607_v6 = vld [vmem:[%s6491_s7 + $0x90] sm:$0xf] }
  0x5f   : >> { %9579 = vst [vmem:[#allocation39_spill] sm:$0xff] %v6604_v5  ;;  %9580 = vst [vmem:[#allocation40_spill] sm:$0xff] %v6607_v6  ;;  %v6610_v7 = vld [vmem:[%s6491_s7 + $0x94] sm:$0xf]  ;;  %v6613_v8 = vld [vmem:[%s6491_s7 + $0x98] sm:$0xf] }
  0x60   : >> { %9581 = vst [vmem:[#allocation41_spill] sm:$0xff] %v6610_v7  ;;  %9582 = vst [vmem:[#allocation42_spill] sm:$0xff] %v6613_v8  ;;  %v6616_v9 = vld [vmem:[%s6491_s7 + $0x9c] sm:$0xf]  ;;  %v6619_v10 = vld [vmem:[%s6491_s7 + $0xa0] sm:$0xf] }
  0x61   : >> { %9583 = vst [vmem:[#allocation43_spill] sm:$0xff] %v6616_v9  ;;  %9584 = vst [vmem:[#allocation44_spill] sm:$0xff] %v6619_v10  ;;  %v6622_v11 = vld [vmem:[%s6491_s7 + $0xa4] sm:$0xf]  ;;  %v6625_v12 = vld [vmem:[%s6491_s7 + $0xa8] sm:$0xf] }
  0x62   : >> { %9585 = vst [vmem:[#allocation45_spill] sm:$0xff] %v6622_v11  ;;  %9586 = vst [vmem:[#allocation46_spill] sm:$0xff] %v6625_v12  ;;  %v6628_v13 = vld [vmem:[%s6491_s7 + $0xac] sm:$0xf]  ;;  %v6631_v14 = vld [vmem:[%s6491_s7 + $0xb0] sm:$0xf] }
  0x63   : >> { %9587 = vst [vmem:[#allocation47_spill] sm:$0xff] %v6628_v13  ;;  %9588 = vst [vmem:[#allocation48_spill] sm:$0xff] %v6631_v14  ;;  %v6634_v15 = vld [vmem:[%s6491_s7 + $0xb4] sm:$0xf]  ;;  %v6637_v16 = vld [vmem:[%s6491_s7 + $0xb8] sm:$0xf] }
  0x64   : >> { %9589 = vst [vmem:[#allocation49_spill] sm:$0xff] %v6634_v15  ;;  %9590 = vst [vmem:[#allocation50_spill] sm:$0xff] %v6637_v16  ;;  %v6640_v17 = vld [vmem:[%s6491_s7 + $0xbc] sm:$0xf]  ;;  %v6643_v18 = vld [vmem:[%s6491_s7 + $0xc0] sm:$0xf] }
  0x65   : >> { %9591 = vst [vmem:[#allocation51_spill] sm:$0xff] %v6640_v17  ;;  %9592 = vst [vmem:[#allocation52_spill] sm:$0xff] %v6643_v18  ;;  %v6646_v19 = vld [vmem:[%s6491_s7 + $0xc4] sm:$0xf]  ;;  %v6649_v20 = vld [vmem:[%s6491_s7 + $0xc8] sm:$0xf] }
  0x66   : >> { %9593 = vst [vmem:[#allocation53_spill] sm:$0xff] %v6646_v19  ;;  %9594 = vst [vmem:[#allocation54_spill] sm:$0xff] %v6649_v20  ;;  %v6652_v21 = vld [vmem:[%s6491_s7 + $0xcc] sm:$0xf]  ;;  %v6655_v22 = vld [vmem:[%s6491_s7 + $0xd0] sm:$0xf] }
  0x67   : >> { %9595 = vst [vmem:[#allocation55_spill] sm:$0xff] %v6652_v21  ;;  %9596 = vst [vmem:[#allocation56_spill] sm:$0xff] %v6655_v22  ;;  %v6658_v23 = vld [vmem:[%s6491_s7 + $0xd4] sm:$0xf]  ;;  %v6661_v24 = vld [vmem:[%s6491_s7 + $0xd8] sm:$0xf] }
  0x68   : >> { %9597 = vst [vmem:[#allocation57_spill] sm:$0xff] %v6658_v23  ;;  %9598 = vst [vmem:[#allocation58_spill] sm:$0xff] %v6661_v24  ;;  %v6664_v25 = vld [vmem:[%s6491_s7 + $0xdc] sm:$0xf]  ;;  %v6667_v26 = vld [vmem:[%s6491_s7 + $0xe0] sm:$0xf] }
  0x69   : >> { %9599 = vst [vmem:[#allocation59_spill] sm:$0xff] %v6664_v25  ;;  %9600 = vst [vmem:[#allocation60_spill] sm:$0xff] %v6667_v26  ;;  %v6670_v27 = vld [vmem:[%s6491_s7 + $0xe4] sm:$0xf]  ;;  %v6673_v28 = vld [vmem:[%s6491_s7 + $0xe8] sm:$0xf] }
  0x6a   : >> { %9601 = vst [vmem:[#allocation61_spill] sm:$0xff] %v6670_v27  ;;  %9602 = vst [vmem:[#allocation62_spill] sm:$0xff] %v6673_v28  ;;  %v6676_v29 = vld [vmem:[%s6491_s7 + $0xec] sm:$0xf]  ;;  %v6679_v30 = vld [vmem:[%s6491_s7 + $0xf0] sm:$0xf] }
  0x6b   : >> { %9603 = vst [vmem:[#allocation63_spill] sm:$0xff] %v6676_v29  ;;  %9604 = vst [vmem:[#allocation64_spill] sm:$0xff] %v6679_v30  ;;  %v6682_v31 = vld [vmem:[%s6491_s7 + $0xf4] sm:$0xf]  ;;  %v6685_v32 = vld [vmem:[%s6491_s7 + $0xf8] sm:$0xf] }
  0x6c   : >> { %9605 = vst [vmem:[#allocation65_spill] sm:$0xff] %v6682_v31  ;;  %9606 = vst [vmem:[#allocation66_spill] sm:$0xff] %v6685_v32  ;;  %v6688_v33 = vld [vmem:[%s6491_s7 + $0xfc] sm:$0xf]  ;;  %v6691_v34 = vld [vmem:[%s6491_s7 + $0x100] sm:$0xf] }
  0x6d   : >> { %9607 = vst [vmem:[#allocation67_spill] sm:$0xff] %v6688_v33  ;;  %9608 = vst [vmem:[#allocation68_spill] sm:$0xff] %v6691_v34  ;;  %v6694_v35 = vld [vmem:[%s6491_s7 + $0x104] sm:$0xf]  ;;  %v6697_v50 = vld [vmem:[%s6491_s7 + $0x108] sm:$0xf] }
  0x6e   : >> { %9609 = vst [vmem:[#allocation69_spill] sm:$0xff] %v6694_v35  ;;  %9610 = vst [vmem:[#allocation70_spill] sm:$0xff] %v6697_v50  ;;  %v6700_v51 = vld [vmem:[%s6491_s7 + $0x10c] sm:$0xf]  ;;  %v6703_v2 = vld [vmem:[%s6491_s7 + $0x110] sm:$0xf] }
  0x6f   : >> { %9611 = vst [vmem:[#allocation71_spill] sm:$0xff] %v6700_v51  ;;  %9612 = vst [vmem:[#allocation72_spill] sm:$0xff] %v6703_v2  ;;  %v6706_v3 = vld [vmem:[%s6491_s7 + $0x114] sm:$0xf]  ;;  %v6709_v18 = vld [vmem:[%s6491_s7 + $0x118] sm:$0xf] }
  0x70   : >> { %9613 = vst [vmem:[#allocation73_spill] sm:$0xff] %v6706_v3  ;;  %9614 = vst [vmem:[#allocation74_spill] sm:$0xff] %v6709_v18  ;;  %v6712_v19 = vld [vmem:[%s6491_s7 + $0x11c] sm:$0xf] }
  0x71   : >> { %9615 = vst [vmem:[#allocation75_spill] sm:$0xff] %v6712_v19 }
  0x72 LB: >>> { %s427_s10 = smul.u32 72, %s10234_s4  ;;  %v9618_v17 = vld [vmem:[#allocation51_spill] sm:$0xff]  ;;  %v9619_v16 = vld [vmem:[#allocation50_spill] sm:$0xff]  ;;  %v9625_v30 = vld [vmem:[#allocation64_spill] sm:$0xff]  ;;  %s5555_s11 = sshll.u32 %s6178_s9, 5  ;;  %vm713_vm1 = vcmask 1042432   ;;  %s6178_s9 = sphi %s6714_s9, %s424_s9  }
  0x73   : >>> { %v9617_v32 = vld [vmem:[#allocation66_spill] sm:$0xff]  ;;  %v5174_v35 = vcombine.low %v9619_v16, %v9618_v17  ;;  %v9620_v1 = vld [vmem:[#allocation35_spill] sm:$0xff]  ;;  %v9624_v31 = vld [vmem:[#allocation65_spill] sm:$0xff]  ;;  %s6185_s16 = smov 64   ;;  %vm1186_vm2 = vcmask 523264   ;;  %s4910_s17 = smul.u32 72, %s341_s8 }
  0x74   : >>> { %v9616_v33 = vld [vmem:[#allocation67_spill] sm:$0xff]  ;;  %v9621_v0 = vld [vmem:[#allocation34_spill] sm:$0xff]  ;;  %v5181_v2 = vcombine.low %v9625_v30, %v9624_v31  ;;  %v9626_v63 = vld [vmem:[#allocation33_spill] sm:$0xff]  ;;  %s428_s13 = sadd.s32 %s5555_s11, %s427_s10  ;;  %vm1355_vm3 = vsmask.f32 4352  ;;  %s424_s9 = sadd.s32 1, %s6178_s9  }
  0x75   : >>> { %v5182_v34 = vcombine.low %v9617_v32, %v9616_v33  ;;  %v5166_v50 = vcombine.low %v9621_v0, %v9620_v1  ;;  %v9622_v49 = vld [vmem:[#allocation19_spill] sm:$0xff]  ;;  %v9623_v48 = vld [vmem:[#allocation18_spill] sm:$0xff]  ;;  %v9627_v62 = vld [vmem:[#allocation32_spill] sm:$0xff]  ;;  %s4983_s14 = sshll.u32 %s428_s13, 2  ;;  %s7780_s18 = sadd.s32 %s5555_s11, %s4910_s17 }
  0x76   : >>> { %v5158_v51 = vcombine.low %v9623_v48, %v9622_v49  ;;  %v5165_v3 = vcombine.low %v9627_v62, %v9626_v63  ;;  %v9628_v15 = vld [vmem:[#allocation49_spill] sm:$0xff]  ;;  %v9629_v14 = vld [vmem:[#allocation48_spill] sm:$0xff]  ;;  %v9632_v29 = vld [vmem:[#allocation63_spill] sm:$0xff]  ;;  %s6743_s15 = scalar_lea.vmem [#allocation2], %s4983_s14  ;;  %s5213_s19 = sshll.u32 %s7780_s18, 2 }
  0x77   : >>> { %5645 = vmatprep.subr.bf16.mxu1 %v5182_v34  ;;  %5581 = vmatprep.subr.bf16.mxu0 %v5166_v50  ;;  %v5173_v16 = vcombine.low %v9629_v14, %v9628_v15  ;;  %v9630_v47 = vld [vmem:[#allocation17_spill] sm:$0xff]  ;;  %v9631_v46 = vld [vmem:[#allocation16_spill] sm:$0xff]  ;;  %v9633_v28 = vld [vmem:[#allocation62_spill] sm:$0xff]  ;;  %s7801_s20 = scalar_lea.vmem [#allocation2], %s5213_s19  ;;  %p421_p5 = scmp.ge.s32.totalorder %s424_s9, 2  }
  0x78   : >>> { %5646 = vmatpush3.bf16.msra.mxu1 %v5174_v35  ;;  %5582 = vmatpush3.bf16.msra.mxu0 %v5158_v51  ;;  %v5157_v0 = vcombine.low %v9631_v46, %v9630_v47  ;;  %v5180_v1 = vcombine.low %v9633_v28, %v9632_v29  ;;  %v9634_v61 = vld [vmem:[#allocation31_spill] sm:$0xff]  ;;  %v9635_v60 = vld [vmem:[#allocation30_spill] sm:$0xff]  ;;  %v4987_v50 = vld [vmem:[%s6743_s15 + $0x10] sm:$0x8]  ;;  %s334_s23 = sadd.s32 (%p421_p5), 1, %s6174_s23  }
  0x79   : >>> { %5647 = vmatprep.subr.bf16.mxu1 %v5181_v2  ;;  %5583 = vmatprep.subr.bf16.mxu0 %v5165_v3  ;;  %v5164_v34 = vcombine.low %v9635_v60, %v9634_v61  ;;  %v6746_v35 = vld [vmem:[%s6743_s15 + $0x28] sm:$0xf]  ;;  %v9637_v12 = vld [vmem:[#allocation46_spill] sm:$0xff]  ;;  %v4988_v3 = vld [vmem:[%s6743_s15 + $0x14] sm:$0xf]  ;;  %p331_p6 = scmp.ge.s32.totalorder (%p421_p5), %s334_s23, 9  }
  0x7a   : >>> { %v9636_v13 = vld [vmem:[#allocation47_spill] sm:$0xff]  ;;  %v5089_v2 = vcombine.low %v6746_v35, %v6746_v35  ;;  %v4989_v14 = vld [vmem:[%s6743_s15 + $0x18] sm:$0xf]  ;;  %v9639_v44 = vld [vmem:[#allocation14_spill] sm:$0xff]  ;;  %v5086_v28 = vcombine.low %v4987_v50, %v4988_v3 }
  0x7b   : >>> { %v5172_v51 = vcombine.low %v9637_v12, %v9636_v13  ;;  %v9638_v45 = vld [vmem:[#allocation15_spill] sm:$0xff]  ;;  %v9640_v27 = vld [vmem:[#allocation61_spill] sm:$0xff]  ;;  %v9641_v26 = vld [vmem:[#allocation60_spill] sm:$0xff]  ;;  %v6759_v29 = vcombine.low %v4988_v3, %v4989_v14  ;;  %v5087_v13 = vcombine.low %v4989_v14, %v4989_v14 }
  0x7c   : >>> { %5648 = vmatpush3.bf16.msra.mxu1 %v5173_v16  ;;  %5584 = vmatpush3.bf16.msra.mxu0 %v5157_v0  ;;  %v5156_v15 = vcombine.low %v9639_v44, %v9638_v45  ;;  %v5179_v17 = vcombine.low %v9641_v26, %v9640_v27  ;;  %v5963_v30 = vld [vmem:[%s6743_s15 + $0x1c] ss:$0 sps:$4 sm:$0x11]   ;;  %v6763_v12 = vld [vmem:[%s6743_s15 + $0x24] sm:$0xf]  ;;  %v9643_v58 = vld [vmem:[#allocation28_spill] sm:$0xff] }
  0x7d   : >>> { %5649 = vmatprep.subr.bf16.mxu1 %v5180_v1  ;;  %5585 = vmatprep.subr.bf16.mxu0 %v5164_v34  ;;  %v9642_v59 = vld [vmem:[#allocation29_spill] sm:$0xff]  ;;  %v6769_v16 = vld [vmem:[%s6743_s15 + $0x28] sm:$0xf]  ;;  %v9645_v10 = vld [vmem:[#allocation44_spill] sm:$0xff]  ;;  %v930_v1 = vrot.slane %v6759_v29, 5  ;;  %v931_v34 = vrot.slane %v5963_v30, 5 }
  0x7e   : >>> { %v5163_v0 = vcombine.low %v9643_v58, %v9642_v59  ;;  %808 = vrot.lane.b32.xlu1 %v5089_v2, %s6185_s16  ;;  %v9644_v11 = vld [vmem:[#allocation45_spill] sm:$0xff]  ;;  %v9647_v42 = vld [vmem:[#allocation12_spill] sm:$0xff]  ;;  %802 = vrot.lane.b32.xlu0 %v5086_v28, %s6185_s16  ;;  %v6779_v26 = vcombine.low %v6763_v12, %v6769_v16  ;;  %v6782_v2 = vld [vmem:[%s6743_s15 + $0x4] sm:$0xf] }
  0x7f   : >>> { %v5171_v50 = vcombine.low %v9645_v10, %v9644_v11  ;;  %v9646_v43 = vld [vmem:[#allocation13_spill] sm:$0xff]  ;;  %v6785_v27 = vld [vmem:[%s6743_s15 + $0x8] sm:$0xf]  ;;  %v6792_v11 = vld [vmem:[%s6743_s15 + $0x34] sm:$0xf]  ;;  %v932_v32 = vsel %vm713_vm1, %v930_v1, %v931_v34 }
  0x80   : >>> { %v5155_v3 = vcombine.low %v9647_v42, %v9646_v43  ;;  %v6789_v10 = vcombine.low %v6782_v2, %v6785_v27  ;;  %v6795_v28 = vld [vmem:[%s6743_s15 + $0x38] sm:$0xf]  ;;  %v6798_v31 = vld [vmem:[%s6743_s15 + $0x14] sm:$0xf]  ;;  %5650 = vmatpush3.bf16.msra.mxu1 %v5172_v51  ;;  %5586 = vmatpush3.bf16.msra.mxu0 %v5156_v15  ;;  %v9649_v25 = vld [vmem:[#allocation59_spill] sm:$0xff]  ;;  %v1059_v33 = vshrl.u32 %v6779_v26, 16 }
  0x81   : >>> { %9648 = vst [vmem:[#allocation76_spill] sm:$0xff] %v6795_v28  ;;  %v9650_v24 = vld [vmem:[#allocation58_spill] sm:$0xff]  ;;  %v9651_v57 = vld [vmem:[#allocation27_spill] sm:$0xff]  ;;  %v1062_v42 = vshll.u32 %v6779_v26, 16  ;;  %v6809_v43 = vcombine.low %v6792_v11, %v6795_v28  ;;  %v6812_v51 = vld [vmem:[%s6743_s15 + $0x18] sm:$0xf]  ;;  %5651 = vmatprep.subr.bf16.mxu1 %v5179_v17  ;;  %5587 = vmatprep.subr.bf16.mxu0 %v5163_v0 }
  0x82   : >>> { %v5178_v14 = vcombine.low %v9650_v24, %v9649_v25  ;;  %v9652_v56 = vld [vmem:[#allocation26_spill] sm:$0xff]  ;;  %9653 = vst [vmem:[#allocation77_spill] sm:$0xff] %v6812_v51  ;;  %956 = vrot.lane.b32.xlu1 %v932_v32, %s6185_s16  ;;  %v610_v15 = vshrl.u32 %v6789_v10, 16  ;;  %v613_v24 = vshll.u32 %v6789_v10, 16  ;;  %v6819_v34 = vcombine.low %v6798_v31, %v6812_v51  ;;  %v9654_v9 = vld [vmem:[#allocation43_spill] sm:$0xff]  ;;  %804 = vrot.lane.b32.xlu0 %v5087_v13, %s6185_s16  ;;  %v9658_v23 = vld [vmem:[#allocation57_spill] sm:$0xff] }
  0x83   : >>> { %v5162_v30 = vcombine.low %v9652_v56, %v9651_v57  ;;  %v9655_v8 = vld [vmem:[#allocation42_spill] sm:$0xff]  ;;  %v1061_v44 = vrot.slane %v1059_v33, 4  ;;  %v1064_v45 = vrot.slane %v1062_v42, 5  ;;  %v1067_v17 = vshrl.u32 %v6809_v43, 16  ;;  %v9656_v41 = vld [vmem:[#allocation11_spill] sm:$0xff]  ;;  %v9659_v22 = vld [vmem:[#allocation56_spill] sm:$0xff] }
  0x84   : >>> { %v5170_v25 = vcombine.low %v9655_v8, %v9654_v9  ;;  %v4990_v46 = vld [vmem:[%s6743_s15 + $0x20] sm:$0x8]  ;;  %v1070_v32 = vshll.u32 %v6809_v43, 16  ;;  %v4991_v0 = vld [vmem:[%s6743_s15 + $0x24] sm:$0xf]  ;;  %v612_v47 = vrot.slane %v610_v15, 4  ;;  %5652 = vmatpush3.bf16.msra.mxu1 %v5171_v50  ;;  %5588 = vmatpush3.bf16.msra.mxu0 %v5155_v3  ;;  %v5177_v42 = vcombine.low %v9659_v22, %v9658_v23 }
  0x85   : >>> { %v615_v48 = vrot.slane %v613_v24, 5  ;;  %v618_v49 = vshrl.u32 %v6819_v34, 16  ;;  %v9657_v40 = vld [vmem:[#allocation10_spill] sm:$0xff]  ;;  %v1065_v13 = vor.u32 %v1064_v45, %v1061_v44  ;;  %v621_v33 = vshll.u32 %v6819_v34, 16  ;;  %5653 = vmatprep.subr.bf16.mxu1 %v5178_v14  ;;  %5589 = vmatprep.subr.bf16.mxu0 %v5162_v30  ;;  %v9660_v55 = vld [vmem:[#allocation25_spill] sm:$0xff]  ;;  %v9661_v54 = vld [vmem:[#allocation24_spill] sm:$0xff] }
  0x86   : >>> { %v5154_v8 = vcombine.low %v9657_v40, %v9656_v41  ;;  %v5161_v24 = vcombine.low %v9661_v54, %v9660_v55  ;;  %v1069_v50 = vrot.slane %v1067_v17, 4  ;;  %v1072_v3 = vrot.slane %v1070_v32, 5  ;;  %v5971_v15 = vld [vmem:[%s6743_s15 + $0x2c] ss:$0 sps:$4 sm:$0x11]   ;;  %954 = vrot.lane.b32.xlu0 %v930_v1, %s6185_s16  ;;  %v9664_v7 = vld [vmem:[#allocation41_spill] sm:$0xff] }
  0x87   : >>> { %1122 = vrot.lane.b32.xlu1 %v1065_v13, %s6185_s16  ;;  %v5088_v44 = vcombine.low %v4990_v46, %v4991_v0  ;;  %v616_v45 = vor.u32 %v615_v48, %v612_v47  ;;  %v620_v9 = vrot.slane %v618_v49, 4  ;;  %v623_v14 = vrot.slane %v621_v33, 5  ;;  %v6840_v40 = vld [vmem:[%s6743_s15 + $0x44] sm:$0xf]  ;;  %v6843_v30 = vld [vmem:[%s6743_s15 + $0x48] sm:$0xf] }
  0x88   : >>> { %9662 = vst [vmem:[#allocation78_spill] sm:$0xff] %v6843_v30  ;;  %v6846_v22 = vcombine.low %v4991_v0, %v6746_v35  ;;  %v6849_v23 = vld [vmem:[%s6743_s15 + $0x24] sm:$0xf]  ;;  %v6852_v17 = vld [vmem:[%s6743_s15 + $0x28] sm:$0xf]  ;;  %5654 = vmatpush3.bf16.msra.mxu1 %v5170_v25  ;;  %5590 = vmatpush3.bf16.msra.mxu0 %v5154_v8  ;;  %v9665_v6 = vld [vmem:[#allocation40_spill] sm:$0xff]  ;;  %v6864_v49 = vcombine.low %v6840_v40, %v6843_v30 }
  0x89   : >>> { %9663 = vst [vmem:[#allocation79_spill] sm:$0xff] %v6852_v17  ;;  %v5169_v1 = vcombine.low %v9665_v6, %v9664_v7  ;;  %v9666_v39 = vld [vmem:[#allocation9_spill] sm:$0xff]  ;;  %v9667_v38 = vld [vmem:[#allocation8_spill] sm:$0xff]  ;;  %5655 = vmatprep.subr.bf16.mxu1 %v5177_v42  ;;  %5591 = vmatprep.subr.bf16.mxu0 %v5161_v24  ;;  %v9668_v21 = vld [vmem:[#allocation55_spill] sm:$0xff]  ;;  %v1073_v8 = vor.u32 %v1072_v3, %v1069_v50  ;;  %v934_v0 = vrot.slane %v5971_v15, 5 }
  0x8a   : >>> { %v5153_v46 = vcombine.low %v9667_v38, %v9666_v39  ;;  %v9669_v20 = vld [vmem:[#allocation54_spill] sm:$0xff]  ;;  %v9670_v53 = vld [vmem:[#allocation23_spill] sm:$0xff]  ;;  %9672 = vst [vmem:[#allocation80_spill] sm:$0xff] %v6864_v49  ;;  %806 = vrot.lane.b32.xlu0 %v5088_v44, %s6185_s16  ;;  %v624_v25 = vor.u32 %v623_v14, %v620_v9  ;;  %v6870_v35 = vcombine.low %v6849_v23, %v6852_v17  ;;  %v933_v32 = vrot.slane %v6846_v22, 5  ;;  %v4993_v24 = vld [vmem:[%s6743_s15 + $0x30] sm:$0x8] }
  0x8b   : >>> { %v5176_v47 = vcombine.low %v9669_v20, %v9668_v21  ;;  %v9671_v52 = vld [vmem:[#allocation22_spill] sm:$0xff]  ;;  %673 = vrot.lane.b32.xlu1 %v616_v45, %s6185_s16  ;;  %v9673_v5 = vld [vmem:[#allocation39_spill] sm:$0xff]  ;;  %v1075_v33 = vshrl.u32 %v6864_v49, 16  ;;  %v1078_v9 = vshll.u32 %v6864_v49, 16  ;;  %v4994_v50 = vld [vmem:[%s6743_s15 + $0x34] sm:$0xf] }
  0x8c   : >>> { %v5160_v48 = vcombine.low %v9671_v52, %v9670_v53  ;;  %5656 = vmatpush3.bf16.msra.mxu1 %v5169_v1  ;;  %5592 = vmatpush3.bf16.msra.mxu0 %v5153_v46  ;;  %v9674_v4 = vld [vmem:[#allocation38_spill] sm:$0xff]  ;;  %v9675_v37 = vld [vmem:[#allocation7_spill] sm:$0xff]  ;;  %v626_v3 = vshrl.u32 %v6870_v35, 16  ;;  %v629_v15 = vshll.u32 %v6870_v35, 16  ;;  %v935_v44 = vsel %vm713_vm1, %v933_v32, %v934_v0  ;;  %v4995_v45 = vld [vmem:[%s6743_s15 + $0x38] sm:$0xf] }
  0x8d   : >>> { %v5168_v13 = vcombine.low %v9674_v4, %v9673_v5  ;;  %5657 = vmatprep.subr.bf16.mxu1 %v5176_v47  ;;  %v9676_v36 = vld [vmem:[#allocation6_spill] sm:$0xff]  ;;  %v5090_v14 = vcombine.low %v4993_v24, %v4994_v50  ;;  %v1077_v1 = vrot.slane %v1075_v33, 4  ;;  %v1080_v46 = vrot.slane %v1078_v9, 5  ;;  %v5977_v47 = vld [vmem:[%s6743_s15 + $0x3c] ss:$0 sps:$4 sm:$0x11]  }
  0x8e   : >>> { %5593 = vmatprep.subr.bf16.mxu0 %v5160_v48  ;;  %v5152_v42 = vcombine.low %v9676_v36, %v9675_v37  ;;  %1124 = vrot.lane.b32.xlu0 %v1073_v8, %s6185_s16  ;;  %v5091_v48 = vcombine.low %v4995_v45, %v4995_v45  ;;  %v628_v8 = vrot.slane %v626_v3, 4  ;;  %v6891_v4 = vld [vmem:[%s6743_s15 + $0x54] sm:$0xf]  ;;  %v6894_v5 = vld [vmem:[%s6743_s15 + $0x58] sm:$0xf]  ;;  %v6898_v7 = vcombine.low %v4994_v50, %v4995_v45  ;;  %v9698_v19 = vld [vmem:[#allocation75_spill] sm:$0xff] }
  0x8f   : >>> { %675 = vrot.lane.b32.xlu1 %v624_v25, %s6185_s16  ;;  %v631_v25 = vrot.slane %v629_v15, 5  ;;  %9677 = vst [vmem:[#allocation81_spill] sm:$0xff] %v6894_v5  ;;  %v9678_v0 = vld [vmem:[#allocation53_spill] sm:$0xff]  ;;  %v9679_v6 = vld [vmem:[#allocation52_spill] sm:$0xff]  ;;  %v1081_v9 = vor.u32 %v1080_v46, %v1077_v1  ;;  %v937_v3 = vrot.slane %v5977_v47, 5  ;;  %v9699_v18 = vld [vmem:[#allocation74_spill] sm:$0xff] }
  0x90   : >>> { %5658 = vmatpush3.bf16.msra.mxu1 %v5168_v13  ;;  %5594 = vmatpush3.bf16.msra.mxu0 %v5152_v42  ;;  %v5175_v13 = vcombine.low %v9679_v6, %v9678_v0  ;;  %v6901_v42 = vld [vmem:[%s6743_s15 + $0x34] sm:$0xf]  ;;  %v6904_v33 = vld [vmem:[%s6743_s15 + $0x38] sm:$0xf]  ;;  %v936_v50 = vrot.slane %v6898_v7, 5 }
  0x91   : >>> { %9680 = vst [vmem:[#allocation82_spill] sm:$0xff] %v6901_v42  ;;  %9681 = vst [vmem:[#allocation83_spill] sm:$0xff] %v6904_v33  ;;  %v632_v6 = vor.u32 %v631_v25, %v628_v8  ;;  %v6914_v24 = vcombine.low %v6901_v42, %v6904_v33  ;;  %v9683_v45 = vld [vmem:[#allocation37_spill] sm:$0xff]  ;;  %v4996_v1 = vld [vmem:[%s6743_s15 + $0x40] sm:$0x8] }
  0x92   : >>> { %958 = vrot.lane.b32.xlu0 %v933_v32, %s6185_s16  ;;  %5659 = vmatprep.subr.bf16.mxu1 %v5175_v13  ;;  %v6908_v32 = vcombine.low %v6891_v4, %v6894_v5  ;;  %v938_v47 = vsel %vm713_vm1, %v936_v50, %v937_v3  ;;  %v4997_v8 = vld [vmem:[%s6743_s15 + $0x44] sm:$0xf]  ;;  %v4998_v25 = vld [vmem:[%s6743_s15 + $0x48] sm:$0xf]  ;;  %v6975_v53 = vld [vmem:[%s6743_s15 + $0x74] sm:$0xf] }
  0x93   : >>> { %960 = vrot.lane.b32.xlu1 %v935_v44, %s6185_s16  ;;  %v634_v46 = vshrl.u32 %v6914_v24, 16  ;;  %v6933_v36 = vld [vmem:[%s6743_s15 + $0x64] sm:$0xf]  ;;  %v6936_v37 = vld [vmem:[%s6743_s15 + $0x68] sm:$0xf]  ;;  %v6938_v3 = vcombine.low %v4997_v8, %v4998_v25  ;;  %9694 = vst [vmem:[#allocation90_spill] sm:$0xff] %v6975_v53 }
  0x94   : >>> { %9682 = vst [vmem:[#allocation84_spill] sm:$0xff] %v6908_v32  ;;  %v1083_v15 = vshrl.u32 %v6908_v32, 16  ;;  %v1086_v44 = vshll.u32 %v6908_v32, 16  ;;  %9685 = vst [vmem:[#allocation85_spill] sm:$0xff] %v6933_v36  ;;  %v6941_v38 = vld [vmem:[%s6743_s15 + $0x44] sm:$0xf] }
  0x95   : >>> { %v636_v20 = vrot.slane %v634_v46, 4  ;;  %9686 = vst [vmem:[#allocation86_spill] sm:$0xff] %v6936_v37  ;;  %9687 = vst [vmem:[#allocation87_spill] sm:$0xff] %v6941_v38  ;;  %v9693_v46 = vld [vmem:[#allocation4_spill] sm:$0xff]  ;;  %v6978_v54 = vld [vmem:[%s6743_s15 + $0x78] sm:$0xf] }
  0x96   : >>> { %810 = vrot.lane.b32.xlu0 %v5090_v14, %s6185_s16  ;;  %v9684_v14 = vld [vmem:[#allocation36_spill] sm:$0xff]  ;;  %v1085_v13 = vrot.slane %v1083_v15, 4  ;;  %v9689_v15 = vld [vmem:[#allocation21_spill] sm:$0xff]  ;;  %9695 = vst [vmem:[#allocation91_spill] sm:$0xff] %v6978_v54  ;;  %v7019_v59 = vld [vmem:[%s6743_s15 + $0x84] sm:$0xf] }
  0x97   : >>> { %812 = vrot.lane.b32.xlu1 %v5091_v48, %s6185_s16  ;;  %v5167_v0 = vcombine.low %v9684_v14, %v9683_v45  ;;  %v637_v48 = vshll.u32 %v6914_v24, 16  ;;  %v1088_v45 = vrot.slane %v1086_v44, 5  ;;  %v5983_v14 = vld [vmem:[%s6743_s15 + $0x4c] ss:$0 sps:$4 sm:$0x11]   ;;  %v9690_v44 = vld [vmem:[#allocation20_spill] sm:$0xff] }
  0x98   : >>> { %v5159_v39 = vcombine.low %v9690_v44, %v9689_v15  ;;  %v939_v15 = vrot.slane %v6938_v3, 5  ;;  %v940_v44 = vrot.slane %v5983_v14, 5  ;;  %v5000_v14 = vld [vmem:[%s6743_s15 + $0x54] sm:$0xf]  ;;  %9702 = vst [vmem:[#allocation96_spill] sm:$0xff] %v7019_v59 }
  0x99   : >>> { %5660 = vmatpush3.bf16.msra.mxu1 %v5167_v0  ;;  %v639_v21 = vrot.slane %v637_v48, 5  ;;  %v6944_v0 = vld [vmem:[%s6743_s15 + $0x48] sm:$0xf]  ;;  %v6983_v55 = vld [vmem:[%s6743_s15 + $0x54] sm:$0xf] }
  0x9a   : >>> { %1126 = vrot.lane.b32.xlu0 %v1081_v9, %s6185_s16  ;;  %v5092_v9 = vcombine.low %v4996_v1, %v4997_v8  ;;  %9688 = vst [vmem:[#allocation88_spill] sm:$0xff] %v6944_v0  ;;  %5595 = vmatprep.subr.bf16.mxu0 %v5159_v39  ;;  %v9692_v1 = vld [vmem:[#allocation5_spill] sm:$0xff]  ;;  %9696 = vst [vmem:[#allocation92_spill] sm:$0xff] %v6983_v55  ;;  %v5995_v56 = vld [vmem:[%s6743_s15 + $0x6c] ss:$0 sps:$4 sm:$0x11]  }
  0x9b   : >>> { %677 = vrot.lane.b32.xlu1 %v632_v6, %s6185_s16  ;;  %v5093_v6 = vcombine.low %v4998_v25, %v4998_v25  ;;  %v5151_v48 = vcombine.low %v9693_v46, %v9692_v1  ;;  %v640_v8 = vor.u32 %v639_v21, %v636_v20  ;;  %v6958_v25 = vcombine.low %v6941_v38, %v6944_v0  ;;  %v5006_v61 = vld [vmem:[%s6743_s15 + $0x74] sm:$0xf]  ;;  %v5007_v62 = vld [vmem:[%s6743_s15 + $0x78] sm:$0xf]  ;;  %v7195_v28 = vld [vmem:[%s6743_s15 + $0x50] sm:$0x8] }
  0x9c   : >>> { %v6023_v51 = vld [vmem:[%s6743_s15 + $0x3c] ss:$0 sps:$4 sm:$0x11]   ;;  %v9728_v0 = vld [vmem:[#allocation72_spill] sm:$0xff] }
  0x9d   : >>> { %5596 = vmatpush3.bf16.msra.mxu0 %v5151_v48  ;;  %v642_v20 = vshrl.u32 %v6958_v25, 16  ;;  %v645_v21 = vshll.u32 %v6958_v25, 16  ;;  %v5989_v48 = vld [vmem:[%s6743_s15 + $0x5c] ss:$0 sps:$4 sm:$0x11]   ;;  %v724_v17 = vrot.slane %v6023_v51, 5 }
  0x9e   : >>> { %962 = vrot.lane.b32.xlu0 %v936_v50, %s6185_s16  ;;  %v6950_v50 = vcombine.low %v6933_v36, %v6936_v37  ;;  %v9725_v38 = vrot.slane %v6958_v25, 5  ;;  %v6043_v37 = vld [vmem:[%s6743_s15 + $0x7c] ss:$0 sps:$4 sm:$0x11]  }
  0x9f   : >>> { %964 = vrot.lane.b32.xlu1 %v938_v47, %s6185_s16  ;;  %v1089_v47 = vor.u32 %v1088_v45, %v1085_v13  ;;  %v4999_v13 = vld [vmem:[%s6743_s15 + $0x50] sm:$0x8]  ;;  %v941_v45 = vsel %vm713_vm1, %v939_v15, %v940_v44  ;;  %v644_v41 = vrot.slane %v642_v20, 4  ;;  %v647_v52 = vrot.slane %v645_v21, 5 }
  0xa0   : >>> { %9691 = vst [vmem:[#allocation89_spill] sm:$0xff] %v6950_v50  ;;  %v1091_v39 = vshrl.u32 %v6950_v50, 16  ;;  %v1094_v1 = vshll.u32 %v6950_v50, 16 }
  0xa1   : >>> { %v648_v20 = vor.u32 %v647_v52, %v644_v41 }
  0xa2   : >>> { %814 = vrot.lane.b32.xlu0 %v5092_v9, %s6185_s16  ;;  %v5001_v9 = vld [vmem:[%s6743_s15 + $0x58] sm:$0xf]  ;;  %v1096_v46 = vrot.slane %v1094_v1, 5  ;;  %v6994_v1 = vcombine.low %v9699_v18, %v9698_v19 }
  0xa3   : >>> { %816 = vrot.lane.b32.xlu1 %v5093_v6, %s6185_s16  ;;  %v1093_v6 = vrot.slane %v1091_v39, 4  ;;  %v6980_v44 = vcombine.low %v5000_v14, %v5001_v9  ;;  %v6986_v39 = vld [vmem:[%s6743_s15 + $0x58] sm:$0xf] }
  0xa4   : >>> { %9697 = vst [vmem:[#allocation93_spill] sm:$0xff] %v6986_v39  ;;  %9700 = vst [vmem:[#allocation94_spill] sm:$0xff] %v6994_v1  ;;  %v7000_v21 = vcombine.low %v6983_v55, %v6986_v39  ;;  %5861 = vmatprep.subr.bf16.mxu0 %v6994_v1  ;;  %5909 = vmatprep.subr.bf16.mxu1 %v6994_v1  ;;  %v7063_v1 = vld [vmem:[%s6743_s15 + $0x78] sm:$0xf] }
  0xa5   : >>> { %9711 = vst [vmem:[#allocation105_spill] sm:$0xff] %v7063_v1 }
  0xa6   : >>> { %1128 = vrot.lane.b32.xlu0 %v1089_v47, %s6185_s16  ;;  %v5094_v47 = vcombine.low %v4999_v13, %v5000_v14  ;;  %v1097_v13 = vor.u32 %v1096_v46, %v1093_v6  ;;  %9701 = vst [vmem:[#allocation95_spill] sm:$0xff] %v7000_v21  ;;  %v943_v14 = vrot.slane %v5989_v48, 5  ;;  %v650_v41 = vshrl.u32 %v7000_v21, 16  ;;  %v5003_v46 = vld [vmem:[%s6743_s15 + $0x64] sm:$0xf] }
  0xa7   : >>> { %679 = vrot.lane.b32.xlu1 %v640_v8, %s6185_s16  ;;  %v5095_v8 = vcombine.low %v5001_v9, %v5001_v9  ;;  %v5002_v9 = vld [vmem:[%s6743_s15 + $0x60] sm:$0x8]  ;;  %v653_v52 = vshll.u32 %v7000_v21, 16  ;;  %v5004_v48 = vld [vmem:[%s6743_s15 + $0x68] sm:$0xf] }
  0xa8   : >>> { %v652_v57 = vrot.slane %v650_v41, 4  ;;  %v7024_v60 = vcombine.low %v5003_v46, %v5004_v48 }
  0xa9   : >>> { %v655_v58 = vrot.slane %v653_v52, 5 }
  0xaa   : >>> { %966 = vrot.lane.b32.xlu0 %v939_v15, %s6185_s16  ;;  %v6990_v15 = vcombine.low %v6975_v53, %v6978_v54  ;;  %v886_v5 = vshll.u32 %v7024_v60, 16 }
  0xab   : >>> { %968 = vrot.lane.b32.xlu1 %v941_v45, %s6185_s16  ;;  %v942_v45 = vrot.slane %v6980_v44, 5  ;;  %v656_v41 = vor.u32 %v655_v58, %v652_v57 }
  0xad   : >>> { %v944_v6 = vsel %vm713_vm1, %v942_v45, %v943_v14  ;;  %v7022_v14 = vld [vmem:[%s6743_s15 + $0x88] sm:$0xf] }
  0xae   : >>> { %818 = vrot.lane.b32.xlu0 %v5094_v47, %s6185_s16  ;;  %v1099_v47 = vshrl.u32 %v6990_v15, 16  ;;  %9703 = vst [vmem:[#allocation97_spill] sm:$0xff] %v7022_v14 }
  0xaf   : >>> { %820 = vrot.lane.b32.xlu1 %v5095_v8, %s6185_s16  ;;  %v1102_v8 = vshll.u32 %v6990_v15, 16 }
  0xb0   : >>> { %v1101_v18 = vrot.slane %v1099_v47, 4  ;;  %v7027_v47 = vld [vmem:[%s6743_s15 + $0x64] sm:$0xf] }
  0xb1   : >>> { %v1104_v19 = vrot.slane %v1102_v8, 5  ;;  %9704 = vst [vmem:[#allocation98_spill] sm:$0xff] %v7027_v47  ;;  %v7030_v8 = vld [vmem:[%s6743_s15 + $0x68] sm:$0xf] }
  0xb2   : >>> { %1130 = vrot.lane.b32.xlu0 %v1097_v13, %s6185_s16  ;;  %v5096_v13 = vcombine.low %v5002_v9, %v5003_v46  ;;  %9705 = vst [vmem:[#allocation99_spill] sm:$0xff] %v7030_v8  ;;  %v7040_v52 = vcombine.low %v7027_v47, %v7030_v8  ;;  %v946_v46 = vrot.slane %v5995_v56, 5 }
  0xb3   : >>> { %681 = vrot.lane.b32.xlu1 %v648_v20, %s6185_s16  ;;  %v5097_v20 = vcombine.low %v5004_v48, %v5004_v48  ;;  %v1105_v9 = vor.u32 %v1104_v19, %v1101_v18  ;;  %v5005_v48 = vld [vmem:[%s6743_s15 + $0x70] sm:$0x8]  ;;  %v7053_v18 = vld [vmem:[%s6743_s15 + $0x94] sm:$0xf]  ;;  %v7056_v19 = vld [vmem:[%s6743_s15 + $0x98] sm:$0xf] }
  0xb4   : >>> { %9707 = vst [vmem:[#allocation101_spill] sm:$0xff] %v7040_v52  ;;  %v658_v57 = vshrl.u32 %v7040_v52, 16  ;;  %v661_v58 = vshll.u32 %v7040_v52, 16  ;;  %9708 = vst [vmem:[#allocation102_spill] sm:$0xff] %v7053_v18  ;;  %v7067_v32 = vcombine.low %v7053_v18, %v7056_v19  ;;  %v7082_v18 = vld [vmem:[%s6743_s15 + $0x88] sm:$0xf] }
  0xb5   : >>> { %9709 = vst [vmem:[#allocation103_spill] sm:$0xff] %v7056_v19  ;;  %v846_v19 = vshll.u32 %v6759_v29, 16  ;;  %v9735_v54 = vrot.slane %v7040_v52, 5 }
  0xb6   : >>> { %970 = vrot.lane.b32.xlu0 %v942_v45, %s6185_s16  ;;  %v7034_v45 = vcombine.low %v7019_v59, %v7022_v14  ;;  %9712 = vst [vmem:[#allocation106_spill] sm:$0xff] %v7067_v32  ;;  %v660_v8 = vrot.slane %v658_v57, 4  ;;  %v7075_v59 = vcombine.low %v5006_v61, %v5007_v62  ;;  %v1115_v57 = vshrl.u32 %v7067_v32, 16  ;;  %v6009_v14 = vld [vmem:[%s6743_s15 + $0xc] ss:$0 sps:$4 sm:$0x11]  }
  0xb7   : >>> { %972 = vrot.lane.b32.xlu1 %v944_v6, %s6185_s16  ;;  %v945_v6 = vrot.slane %v7024_v60, 5 }
  0xb8   : >>> { %9706 = vst [vmem:[#allocation100_spill] sm:$0xff] %v7034_v45  ;;  %v1110_v63 = vshll.u32 %v7034_v45, 16 }
  0xb9   : >>> { %v947_v56 = vsel %vm713_vm1, %v945_v6, %v946_v46  ;;  %v663_v46 = vrot.slane %v661_v58, 5  ;;  %v1118_v58 = vshll.u32 %v7067_v32, 16 }
  0xba   : >>> { %822 = vrot.lane.b32.xlu0 %v5096_v13, %s6185_s16  ;;  %v1107_v13 = vshrl.u32 %v7034_v45, 16  ;;  %v5099_v45 = vcombine.low %v5007_v62, %v5007_v62  ;;  %v1112_v49 = vrot.slane %v1110_v63, 5  ;;  %v7087_v63 = vrot.slane %v6809_v43, 5  ;;  %v6007_v62 = vld [vmem:[%s6743_s15 + $0x8c] ss:$0 sps:$4 sm:$0x11]  }
  0xbb   : >>> { %824 = vrot.lane.b32.xlu1 %v5097_v20, %s6185_s16  ;;  %v7060_v20 = vld [vmem:[%s6743_s15 + $0x74] sm:$0xf]  ;;  %v952_v50 = vrot.slane %v6007_v62, 5  ;;  %v7128_v62 = vld [vmem:[%s6743_s15] sm:$0x8] }
  0xbc   : >>> { %9710 = vst [vmem:[#allocation104_spill] sm:$0xff] %v7060_v20  ;;  %v7073_v47 = vcombine.low %v7060_v20, %v7063_v1  ;;  %9714 = vst [vmem:[#allocation108_spill] sm:$0xff] %v7087_v63  ;;  %v6008_v20 = vld [vmem:[%s6743_s15 + $0x1c] ss:$0 sps:$4 sm:$0x11]   ;;  %v948_v63 = vrot.slane %v7075_v59, 5 }
  0xbd   : >>> { %v718_v39 = vrot.slane %v6008_v20, 5  ;;  %v5101_v20 = vcombine.low %v7082_v18, %v7082_v18 }
  0xbe   : >>> { %1132 = vrot.lane.b32.xlu0 %v1105_v9, %s6185_s16  ;;  %v5098_v9 = vcombine.low %v5005_v48, %v5006_v61  ;;  %9713 = vst [vmem:[#allocation107_spill] sm:$0xff] %v7073_v47  ;;  %v6001_v48 = vld [vmem:[%s6743_s15 + $0x7c] ss:$0 sps:$4 sm:$0x11]   ;;  %v666_v1 = vshrl.u32 %v7073_v47, 16  ;;  %v669_v43 = vshll.u32 %v7073_v47, 16 }
  0xbf   : >>> { %683 = vrot.lane.b32.xlu1 %v656_v41, %s6185_s16  ;;  %v1109_v41 = vrot.slane %v1107_v13, 4  ;;  %v7079_v13 = vld [vmem:[%s6743_s15 + $0x84] sm:$0xf]  ;;  %v949_v32 = vrot.slane %v6001_v48, 5 }
  0xc0   : >>> { %v7093_v61 = vcombine.low %v7079_v13, %v7082_v18 }
  0xc2   : >>> { %974 = vrot.lane.b32.xlu0 %v945_v6, %s6185_s16  ;;  %v843_v6 = vshrl.u32 %v6759_v29, 16  ;;  %v664_v29 = vor.u32 %v663_v46, %v660_v8  ;;  %v7112_v46 = vrot.slane %v1118_v58, 5  ;;  %v9417_v48 = vrot.slane %v7093_v61, 5 }
  0xc3   : >>> { %976 = vrot.lane.b32.xlu1 %v947_v56, %s6185_s16  ;;  %v1113_v56 = vor.u32 %v1112_v49, %v1109_v41  ;;  %v848_v49 = vrot.slane %v846_v19, 5  ;;  %v7110_v41 = vrot.slane %v1115_v57, 4  ;;  %v7119_v19 = vrot.slane %v669_v43, 5  ;;  %v6018_v57 = vld [vmem:[%s6743_s15 + $0x2c] ss:$0 sps:$4 sm:$0x11]  }
  0xc4   : >>> { %v845_v55 = vrot.slane %v843_v6, 4  ;;  %v7117_v6 = vrot.slane %v666_v1, 4  ;;  %v950_v58 = vsel %vm713_vm1, %v948_v63, %v949_v32  ;;  %v715_v8 = vrot.slane %v6009_v14, 5  ;;  %v7139_v32 = vld [vmem:[%s6743_s15 + $0x30] sm:$0x8] }
  0xc5   : >>> { %v854_v14 = vshll.u32 %v6846_v22, 16  ;;  %v721_v30 = vrot.slane %v6018_v57, 5  ;;  %v9718_v57 = vrot.slane %v6870_v35, 5 }
  0xc6   : >>> { %826 = vrot.lane.b32.xlu0 %v5098_v9, %s6185_s16  ;;  %v7125_v9 = vld [vmem:[%s6743_s15 + $0x20] sm:$0x8]  ;;  %v7136_v43 = vor.u32 %v848_v49, %v845_v55  ;;  %v859_v55 = vshrl.u32 %v6898_v7, 16  ;;  %v7154_v49 = vrot.slane %v6990_v15, 5 }
  0xc7   : >>> { %828 = vrot.lane.b32.xlu1 %v5099_v45, %s6185_s16  ;;  %v5008_v45 = vld [vmem:[%s6743_s15 + $0x80] sm:$0x8] }
  0xc8   : >>> { %v5100_v1 = vcombine.low %v5008_v45, %v7079_v13  ;;  %v7148_v13 = vsel %vm713_vm1, %v9417_v48, %v952_v50  ;;  %v9715_v45 = vrot.slane %v6819_v34, 5  ;;  %v7171_v15 = vld [vmem:[%s6743_s15 + $0x40] sm:$0x8]  ;;  %v875_v48 = vshrl.u32 %v6980_v44, 16 }
  0xca   : >>> { %1134 = vrot.lane.b32.xlu0 %v1113_v56, %s6185_s16  ;;  %v1121_v56 = vor.u32 %v7112_v46, %v7110_v41  ;;  %v7163_v50 = vsel %vm713_vm1, %v9715_v45, %v718_v39  ;;  %v7168_v46 = vld [vmem:[%s6743_s15 + $0x10] sm:$0x8]  ;;  %v862_v39 = vshll.u32 %v6898_v7, 16  ;;  %v9716_v45 = vrot.slane %v6789_v10, 5 }
  0xcb   : >>> { %685 = vrot.lane.b32.xlu1 %v664_v29, %s6185_s16  ;;  %v851_v29 = vshrl.u32 %v6846_v22, 16  ;;  %v672_v22 = vor.u32 %v7119_v19, %v7117_v6  ;;  %v856_v41 = vrot.slane %v854_v14, 5  ;;  %v861_v6 = vrot.slane %v859_v55, 4  ;;  %v6028_v55 = vld [vmem:[%s6743_s15 + $0x4c] ss:$0 sps:$4 sm:$0x11]  }
  0xcc   : >>> { %v7184_v18 = vsel %vm713_vm1, %v9716_v45, %v715_v8  ;;  %v7198_v8 = vld [vmem:[%s6743_s15 + $0x30] sm:$0x8]  ;;  %v867_v45 = vshrl.u32 %v6938_v3, 16  ;;  %v870_v7 = vshll.u32 %v6938_v3, 16  ;;  %v7217_v14 = vsel %vm713_vm1, %v9718_v57, %v721_v30 }
  0xcd   : >>> { %v853_v19 = vrot.slane %v851_v29, 4  ;;  %9717 = vst [vmem:[#allocation109_spill] sm:$0xff] %v7198_v8  ;;  %v864_v29 = vrot.slane %v862_v39, 5  ;;  %v6033_v39 = vld [vmem:[%s6743_s15 + $0x5c] ss:$0 sps:$4 sm:$0x11]  }
  0xce   : >>> { %978 = vrot.lane.b32.xlu0 %v948_v63, %s6185_s16  ;;  %v869_v51 = vrot.slane %v867_v45, 4  ;;  %v872_v30 = vrot.slane %v870_v7, 5  ;;  %v727_v3 = vrot.slane %v6028_v55, 5  ;;  %v7235_v63 = vld [vmem:[%s6743_s15 + $0x40] sm:$0x8]  ;;  %v877_v33 = vrot.slane %v875_v48, 4 }
  0xcf   : >>> { %980 = vrot.lane.b32.xlu1 %v950_v58, %s6185_s16  ;;  %v7178_v58 = vld [vmem:[%s6743_s15 + $0x20] sm:$0x8]  ;;  %9720 = vst [vmem:[#allocation111_spill] sm:$0xff] %v7235_v63  ;;  %v6038_v8 = vld [vmem:[%s6743_s15 + $0x6c] ss:$0 sps:$4 sm:$0x11]  }
  0xd0   : >>> { %v730_v55 = vrot.slane %v6033_v39, 5  ;;  %v6048_v48 = vld [vmem:[%s6743_s15 + $0x2c] ss:$0 sps:$4 sm:$0x11]   ;;  %v9724_v7 = vrot.slane %v7093_v61, 5  ;;  %v894_v45 = vshll.u32 %v7075_v59, 16 }
  0xd1   : >>> { %v1163_v57 = vrot.slane %v6048_v48, 5  ;;  %v733_v63 = vrot.slane %v6038_v8, 5  ;;  %v9729_v48 = vrot.slane %v7000_v21, 5  ;;  %v9738_v8 = vld [vmem:[#allocation70_spill] sm:$0xff] }
  0xd2   : >>> { %830 = vrot.lane.b32.xlu0 %v5100_v1, %s6185_s16  ;;  %v878_v1 = vshll.u32 %v6980_v44, 16  ;;  %v7237_v44 = vor.u32 %v864_v29, %v861_v6  ;;  %v7251_v6 = vld [vmem:[%s6743_s15 + $0x70] sm:$0x8]  ;;  %v1162_v29 = vrot.slane %v6779_v26, 5 }
  0xd3   : >>> { %832 = vrot.lane.b32.xlu1 %v5101_v20, %s6185_s16  ;;  %v7212_v20 = vor.u32 %v856_v41, %v853_v19  ;;  %v7227_v41 = vld [vmem:[%s6743_s15 + $0x60] sm:$0x8]  ;;  %v883_v19 = vshrl.u32 %v7024_v60, 16  ;;  %9722 = vst [vmem:[#allocation112_spill] sm:$0xff] %v7251_v6  ;;  %v7341_v6 = vld [vmem:[%s6743_s15 + $0x90] sm:$0x8] }
  0xd4   : >>> { %9719 = vst [vmem:[#allocation110_spill] sm:$0xff] %v7227_v41  ;;  %v880_v42 = vrot.slane %v878_v1, 5  ;;  %v7257_v1 = vld [vmem:[%s6743_s15 + $0x50] sm:$0x8] }
  0xd5   : >>> { %9723 = vst [vmem:[#allocation113_spill] sm:$0xff] %v7257_v1  ;;  %v885_v60 = vrot.slane %v883_v19, 4  ;;  %v7270_v19 = vor.u32 %v872_v30, %v869_v51  ;;  %v7288_v51 = vsel %vm713_vm1, %v9729_v48, %v730_v55  ;;  %v896_v55 = vrot.slane %v894_v45, 5  ;;  %v9746_v45 = vld [vmem:[#allocation108_spill] sm:$0xff] }
  0xd6   : >>> { %1136 = vrot.lane.b32.xlu0 %v1121_v56, %s6185_s16  ;;  %v9721_v56 = vrot.slane %v6914_v24, 5  ;;  %v7279_v39 = vor.u32 %v880_v42, %v877_v33  ;;  %9730 = vst [vmem:[#allocation115_spill] sm:$0xff] %v7288_v51  ;;  %v1164_v48 = vsel %vm713_vm1, %v1162_v29, %v1163_v57  ;;  %v9737_v42 = vld [vmem:[#allocation71_spill] sm:$0xff]  ;;  %v736_v30 = vrot.slane %v6043_v37, 5 }
  0xd7   : >>> { %687 = vrot.lane.b32.xlu1 %v672_v22, %s6185_s16  ;;  %v7312_v1 = vcombine.low %v9738_v8, %v9737_v42  ;;  %v1420_v57 = vshll.u32 %v1162_v29, 16  ;;  %v6051_v42 = vld [vmem:[%s6743_s15 + $0x7c] ss:$0 sps:$4 sm:$0x11]  }
  0xd8   : >>> { %v7244_v22 = vsel %vm713_vm1, %v9721_v56, %v724_v17  ;;  %v888_v17 = vrot.slane %v886_v5, 5  ;;  %v891_v56 = vshrl.u32 %v7075_v59, 16  ;;  %v6049_v5 = vld [vmem:[%s6743_s15 + $0x3c] ss:$0 sps:$4 sm:$0x11]   ;;  %9726 = vst [vmem:[#allocation114_spill] sm:$0xff] %v7279_v39 }
  0xd9   : >>> { %v9727_v59 = vld [vmem:[#allocation73_spill] sm:$0xff]  ;;  %v1422_v37 = vrot.slane %v1420_v57, 4 }
  0xda   : >>> { %982 = vrot.lane.b32.xlu0 %v9724_v7, %s6185_s16  ;;  %v7275_v7 = vsel %vm713_vm1, %v9725_v38, %v727_v3  ;;  %v7283_v26 = vcombine.low %v9728_v0, %v9727_v59  ;;  %v6050_v0 = vld [vmem:[%s6743_s15 + $0x6c] ss:$0 sps:$4 sm:$0x11]   ;;  %v7302_v59 = vld [vmem:[%s6743_s15 + $0x80] sm:$0x8]  ;;  %v893_v21 = vrot.slane %v891_v56, 4  ;;  %v7308_v3 = vsel %vm713_vm1, %v9735_v54, %v733_v63 }
  0xdb   : >>> { %984 = vrot.lane.b32.xlu1 %v7148_v13, %s6185_s16  ;;  %v7298_v13 = vor.u32 %v888_v17, %v885_v60  ;;  %9734 = vst [vmem:[#allocation117_spill] sm:$0xff] %v7302_v59  ;;  %v1166_v38 = vrot.slane %v6049_v5, 5  ;;  %9736 = vst [vmem:[#allocation118_spill] sm:$0xff] %v7308_v3  ;;  %v7315_v60 = vld [vmem:[%s6743_s15 + $0x60] sm:$0x8]  ;;  %v9741_v5 = vld [vmem:[#allocation89_spill] sm:$0xff] }
  0xdc   : >>> { %9739 = vst [vmem:[#allocation119_spill] sm:$0xff] %v7315_v60  ;;  %v1174_v52 = vrot.slane %v9741_v5, 5  ;;  %v1425_v63 = vshrl.u32 %v1164_v48, 16  ;;  %v1428_v3 = vshll.u32 %v1164_v48, 16  ;;  %v1175_v8 = vrot.slane %v6050_v0, 5 }
  0xdd   : >>> { %9733 = vst [vmem:[#allocation116_spill] sm:$0xff] %v7298_v13  ;;  %v1417_v13 = vshrl.u32 %v1162_v29, 16  ;;  %v7328_v51 = vor.u32 %v896_v55, %v893_v21  ;;  %v1167_v29 = vsel %vm713_vm1, %v9746_v45, %v1166_v38  ;;  %v9747_v5 = vrot.slane %v7073_v47, 5  ;;  %v9763_v47 = vld [vmem:[#allocation68_spill] sm:$0xff] }
  0xde   : >>> { %v899_v48 = vshrl.u32 %v7093_v61, 16  ;;  %v902_v0 = vshll.u32 %v7093_v61, 16  ;;  %v1494_v54 = vshrl.u32 %v9746_v45, 16  ;;  %v1497_v21 = vshll.u32 %v9746_v45, 16 }
  0xdf   : >>> { %9745 = vst [vmem:[#allocation89_spill] sm:$0xff] %v7328_v51  ;;  %v7335_v56 = vsel %vm713_vm1, %v9747_v5, %v736_v30  ;;  %v1419_v53 = vrot.slane %v1417_v13, 3  ;;  %v1176_v38 = vsel %vm713_vm1, %v1174_v52, %v1175_v8  ;;  %v1427_v55 = vrot.slane %v1425_v63, 3  ;;  %v6052_v8 = vld [vmem:[%s6743_s15 + $0x4c] ss:$0 sps:$4 sm:$0x11]  }
  0xe0   : >>> { %9748 = vst [vmem:[#allocation108_spill] sm:$0xff] %v7335_v56  ;;  %v1430_v30 = vrot.slane %v1428_v3, 4  ;;  %v1502_v5 = vshrl.u32 %v1167_v29, 16  ;;  %v1178_v56 = vrot.slane %v6051_v42, 5  ;;  %v1505_v51 = vshll.u32 %v1167_v29, 16  ;;  %v9754_v29 = vld [vmem:[#allocation80_spill] sm:$0xff] }
  0xe1   : >>> { %v1725_v17 = vshrl.u32 %v1174_v52, 16  ;;  %v1728_v60 = vshll.u32 %v1174_v52, 16  ;;  %v901_v45 = vrot.slane %v899_v48, 4  ;;  %v1733_v33 = vshrl.u32 %v1176_v38, 16  ;;  %v7355_v42 = vld [vmem:[%s6743_s15 + $0x70] sm:$0x8] }
  0xe2   : >>> { %v1736_v59 = vshll.u32 %v1176_v38, 16  ;;  %v904_v39 = vrot.slane %v902_v0, 5  ;;  %v1423_v36 = vor.u32 %v1422_v37, %v1419_v53  ;;  %v7350_v63 = vrot.slane %v1494_v54, 3 }
  0xe3   : >>> { %v7352_v3 = vrot.slane %v1497_v21, 4  ;;  %v1431_v41 = vor.u32 %v1430_v30, %v1427_v55  ;;  %v7357_v61 = vrot.slane %v1502_v5, 3  ;;  %v1179_v52 = vsel %vm713_vm1, %v7154_v49, %v1178_v56  ;;  %v9760_v30 = vld [vmem:[#allocation104_spill] sm:$0xff]  ;;  %v6053_v5 = vld [vmem:[%s6743_s15 + $0x5c] ss:$0 sps:$4 sm:$0x11]  }
  0xe4   : >>> { %9751 = vst [vmem:[#allocation120_spill] sm:$0xff] %v7350_v63  ;;  %v1168_v57 = vrot.slane %v9754_v29, 5  ;;  %v7362_v48 = vrot.slane %v1505_v51, 4  ;;  %v7364_v38 = vrot.slane %v1725_v17, 3  ;;  %v7366_v0 = vrot.slane %v1728_v60, 4  ;;  %v9762_v29 = vld [vmem:[#allocation69_spill] sm:$0xff] }
  0xe5   : >>> { %9752 = vst [vmem:[#allocation121_spill] sm:$0xff] %v7352_v3  ;;  %9753 = vst [vmem:[#allocation122_spill] sm:$0xff] %v7357_v61  ;;  %v1802_v53 = vshrl.u32 %v7154_v49, 16  ;;  %v7369_v54 = vrot.slane %v1733_v33, 3  ;;  %v7371_v37 = vrot.slane %v1736_v59, 4  ;;  %v1805_v21 = vshll.u32 %v7154_v49, 16 }
  0xe6   : >>> { %9755 = vst [vmem:[#allocation80_spill] sm:$0xff] %v7362_v48  ;;  %9756 = vst [vmem:[#allocation123_spill] sm:$0xff] %v7364_v38  ;;  %v1169_v55 = vrot.slane %v6052_v8, 5  ;;  %v1810_v17 = vshrl.u32 %v1179_v52, 16  ;;  %v1813_v60 = vshll.u32 %v1179_v52, 16  ;;  %v7380_v13 = vcombine.low %v9763_v47, %v9762_v29 }
  0xe7   : >>> { %9757 = vst [vmem:[#allocation124_spill] sm:$0xff] %v7366_v0  ;;  %9758 = vst [vmem:[#allocation125_spill] sm:$0xff] %v7369_v54  ;;  %v7382_v33 = vor.u32 %v904_v39, %v901_v45  ;;  %v1571_v49 = vshrl.u32 %v1168_v57, 16  ;;  %v7387_v8 = vsel %vm1355_vm3, %v1423_v36, %v1431_v41  ;;  %v7393_v52 = vrot.slane %v1802_v53, 3  ;;  %v9768_v53 = vld [vmem:[#allocation84_spill] sm:$0xff] }
  0xe8   : >>> { %9759 = vst [vmem:[#allocation126_spill] sm:$0xff] %v7371_v37  ;;  %v7398_v45 = vrot.slane %v1805_v21, 4  ;;  %v1170_v29 = vsel %vm713_vm1, %v1168_v57, %v1169_v55  ;;  %v1574_v59 = vshll.u32 %v1168_v57, 16  ;;  %v6054_v36 = vld [vmem:[%s6743_s15 + $0x8c] ss:$0 sps:$4 sm:$0x11]  }
  0xe9   : >>> { %9764 = vst [vmem:[#allocation104_spill] sm:$0xff] %v7393_v52  ;;  %v7404_v63 = vrot.slane %v1810_v17, 3  ;;  %v7406_v51 = vrot.slane %v1813_v60, 4  ;;  %v7409_v52 = vrot.slane %v9768_v53, 5  ;;  %v9769_v21 = vrot.slane %v6789_v10, 5 }
  0xea   : >>> { %9765 = vst [vmem:[#allocation127_spill] sm:$0xff] %v7398_v45  ;;  %v7414_v55 = vrot.slane %v1571_v49, 3  ;;  %v1579_v54 = vshrl.u32 %v1170_v29, 16  ;;  %v7416_v17 = vrot.slane %v1574_v59, 4  ;;  %v1172_v60 = vrot.slane %v6053_v5, 5 }
  0xeb   : >>> { %9766 = vst [vmem:[#allocation128_spill] sm:$0xff] %v7404_v63  ;;  %9767 = vst [vmem:[#allocation129_spill] sm:$0xff] %v7406_v51  ;;  %v9770_v51 = vld [vmem:[#allocation100_spill] sm:$0xff]  ;;  %v1181_v53 = vrot.slane %v6054_v36, 5 }
  0xec   : >>> { %v7419_v63 = vrot.slane %v9770_v51, 5  ;;  %v7429_v51 = vrot.slane %v1579_v54, 3 }
  0xee   : >>> { %9771 = vst [vmem:[#allocation84_spill] sm:$0xff] %v7429_v51 }
  0xf0   : >>> { %v809_v47 = vpop.permute.xlu1 %808  ;;  %v803_v56 = vpop.permute.xlu0 %802 }
  0xf1   : >>> { %v1238_v41 = vsel %vm1186_vm2, %v7163_v50, %v809_v47  ;;  %v1229_v39 = vsel %vm1186_vm2, %v9769_v21, %v803_v56  ;;  %v1582_v50 = vshll.u32 %v1170_v29, 16 }
  0xf2   : >>> { %v1455_v38 = vshrl.u32 %v1238_v41, 16  ;;  %v1458_v0 = vshll.u32 %v1238_v41, 16  ;;  %v1371_v57 = vshrl.u32 %v1229_v39, 16  ;;  %v1374_v45 = vshll.u32 %v1229_v39, 16 }
  0xf3   : >>> { %v7431_v36 = vrot.slane %v1582_v50, 4  ;;  %v7446_v50 = vsel %vm713_vm1, %v7419_v63, %v1181_v53 }
  0xf4   : >>> { %v957_v47 = vpop.permute.xlu1 %956  ;;  %v7421_v37 = vrot.slane %v1455_v38, 3  ;;  %v7423_v41 = vrot.slane %v1458_v0, 4  ;;  %v1373_v10 = vrot.slane %v1371_v57, 3  ;;  %v805_v49 = vpop.permute.xlu0 %804  ;;  %v1376_v39 = vrot.slane %v1374_v45, 4 }
  0xf5   : >>> { %v1279_v56 = vsel %vm1186_vm2, %v7136_v43, %v957_v47  ;;  %v1232_v59 = vsel %vm1186_vm2, %v7184_v18, %v805_v49  ;;  %9772 = vst [vmem:[#allocation100_spill] sm:$0xff] %v7431_v36  ;;  %v7439_v57 = vsel %vm713_vm1, %v7409_v52, %v1172_v60  ;;  %v9775_v60 = vcombine.low %v6769_v16, %v6769_v16 }
  0xf6   : >>> { %v1393_v21 = vshrl.u32 %v1279_v56, 16  ;;  %v1396_v29 = vshll.u32 %v1279_v56, 16  ;;  %v1378_v5 = vshrl.u32 %v1232_v59, 16  ;;  %v1381_v3 = vshll.u32 %v1232_v59, 16  ;;  %9773 = vst [vmem:[#allocation130_spill] sm:$0xff] %v7439_v57 }
  0xf8   : >>> { %v7433_v38 = vrot.slane %v1393_v21, 3  ;;  %v7435_v0 = vrot.slane %v1396_v29, 4  ;;  %v1380_v18 = vrot.slane %v1378_v5, 3  ;;  %v1383_v56 = vrot.slane %v1381_v3, 4  ;;  %v955_v54 = vpop.permute.xlu0 %954 }
  0xf9   : >>> { %v1123_v49 = vpop.permute.xlu1 %1122  ;;  %v9774_v21 = vcombine.low %v7125_v9, %v6763_v12  ;;  %v1277_v5 = vsel %vm1186_vm2, %v7136_v43, %v955_v54  ;;  %v1377_v3 = vor.u32 %v1376_v39, %v1373_v10  ;;  %v9776_v39 = vrot.slane %v6819_v34, 5 }
  0xfa   : >>> { %v1319_v59 = vsel %vm1186_vm2, %v9775_v60, %v1123_v49  ;;  %v1399_v53 = vor.u32 %v7435_v0, %v7433_v38  ;;  %v1386_v57 = vshrl.u32 %v1277_v5, 16  ;;  %v1389_v12 = vshll.u32 %v1277_v5, 16 }
  0xfb   : >>> { %v1317_v29 = vsel %vm1186_vm2, %v9774_v21, %v1123_v49  ;;  %v1408_v61 = vshrl.u32 %v1319_v59, 16  ;;  %v1411_v48 = vshll.u32 %v1319_v59, 16  ;;  %v1384_v9 = vor.u32 %v1383_v56, %v1380_v18 }
  0xfc   : >>> { %v1401_v45 = vshrl.u32 %v1317_v29, 16  ;;  %v1404_v47 = vshll.u32 %v1317_v29, 16  ;;  %v807_v60 = vpop.permute.xlu0 %806  ;;  %v1388_v43 = vrot.slane %v1386_v57, 3  ;;  %v1391_v10 = vrot.slane %v1389_v12, 4 }
  0xfd   : >>> { %v1410_v16 = vrot.slane %v1408_v61, 3  ;;  %v1413_v49 = vrot.slane %v1411_v48, 4  ;;  %v674_v51 = vpop.permute.xlu1 %673  ;;  %v1235_v54 = vsel %vm1186_vm2, %v9776_v39, %v807_v60  ;;  %v9777_v38 = vcombine.low %v7128_v62, %v6782_v2 }
  0xfe   : >>> { %v7460_v21 = vrot.slane %v1401_v45, 3  ;;  %v7462_v36 = vrot.slane %v1404_v47, 4  ;;  %v1448_v18 = vshrl.u32 %v1235_v54, 16  ;;  %v1451_v45 = vshll.u32 %v1235_v54, 16 }
  0xff   : >>> { %v1189_v0 = vsel %vm1186_vm2, %v9777_v38, %v674_v51  ;;  %v9778_v47 = vcombine.low %v6785_v27, %v6785_v27  ;;  %v1392_v56 = vor.u32 %v1391_v10, %v1388_v43  ;;  %v1385_v60 = vsel %vm1355_vm3, %v1377_v3, %v1384_v9  ;;  %v9780_v10 = vld [vmem:[#allocation76_spill] sm:$0xff] }
 0x100   : >>> { %v1356_v48 = vshrl.u32 %v1189_v0, 16  ;;  %v1359_v57 = vshll.u32 %v1189_v0, 16  ;;  %v1450_v34 = vrot.slane %v1448_v18, 3  ;;  %v1453_v5 = vrot.slane %v1451_v45, 4  ;;  %v1125_v2 = vpop.permute.xlu0 %1124  ;;  %2282 = vmatprep.mubr.bf16.mxu0 %v1385_v60 }
 0x101   : >>> { %v1191_v61 = vsel %vm1186_vm2, %v9778_v47, %v674_v51  ;;  %v676_v62 = vpop.permute.xlu1 %675  ;;  %v9779_v27 = vcombine.low %v7139_v32, %v6792_v11  ;;  %v9781_v0 = vcombine.low %v9780_v10, %v9780_v10  ;;  %v9783_v32 = vld [vmem:[#allocation77_spill] sm:$0xff] }
 0x102   : >>> { %v1363_v29 = vshrl.u32 %v1191_v61, 16  ;;  %v1366_v59 = vshll.u32 %v1191_v61, 16  ;;  %v1358_v12 = vrot.slane %v1356_v48, 3  ;;  %v1361_v39 = vrot.slane %v1359_v57, 4 }
 0x103   : >>> { %v1322_v51 = vsel %vm1186_vm2, %v9779_v27, %v1125_v2  ;;  %v1454_v43 = vor.u32 %v1453_v5, %v1450_v34  ;;  %v1324_v18 = vsel %vm1186_vm2, %v9781_v0, %v1125_v2  ;;  %v9784_v34 = vcombine.low %v9783_v32, %v9783_v32 }
 0x104   : >>> { %v1365_v38 = vrot.slane %v1363_v29, 3  ;;  %v1368_v54 = vrot.slane %v1366_v59, 4  ;;  %v1478_v45 = vshrl.u32 %v1322_v51, 16  ;;  %v1481_v47 = vshll.u32 %v1322_v51, 16  ;;  %v959_v60 = vpop.permute.xlu0 %958 }
 0x105   : >>> { %v1362_v3 = vor.u32 %v1361_v39, %v1358_v12  ;;  %v1485_v61 = vshrl.u32 %v1324_v18, 16  ;;  %v1488_v48 = vshll.u32 %v1324_v18, 16  ;;  %v9782_v59 = vcombine.low %v7168_v46, %v6798_v31  ;;  %v961_v2 = vpop.permute.xlu1 %960 }
 0x106   : >>> { %v1369_v9 = vor.u32 %v1368_v54, %v1365_v38  ;;  %v1480_v57 = vrot.slane %v1478_v45, 3  ;;  %v1483_v29 = vrot.slane %v1481_v47, 4  ;;  %v1196_v5 = vsel %vm1186_vm2, %v9784_v34, %v676_v62 }
 0x107   : >>> { %v1194_v11 = vsel %vm1186_vm2, %v9782_v59, %v676_v62  ;;  %v1487_v27 = vrot.slane %v1485_v61, 3  ;;  %v1490_v51 = vrot.slane %v1488_v48, 4  ;;  %v1440_v54 = vshrl.u32 %v1196_v5, 16 }
 0x108   : >>> { %v1433_v12 = vshrl.u32 %v1194_v11, 16  ;;  %v1436_v39 = vshll.u32 %v1194_v11, 16  ;;  %v1484_v38 = vor.u32 %v1483_v29, %v1480_v57  ;;  %v1443_v10 = vshll.u32 %v1196_v5, 16  ;;  %v811_v48 = vpop.permute.xlu0 %810 }
 0x109   : >>> { %v1407_v0 = vor.u32 %v7462_v36, %v7460_v21  ;;  %v1491_v31 = vor.u32 %v1490_v51, %v1487_v27  ;;  %v1414_v45 = vor.u32 %v1413_v49, %v1410_v16  ;;  %v1442_v47 = vrot.slane %v1440_v54, 3  ;;  %v813_v32 = vpop.permute.xlu1 %812 }
 0x10a   : >>> { %v1435_v46 = vrot.slane %v1433_v12, 3  ;;  %v1438_v18 = vrot.slane %v1436_v39, 4  ;;  %v1445_v59 = vrot.slane %v1443_v10, 4  ;;  %v1400_v62 = vsel %vm1355_vm3, %v1392_v56, %v1399_v53  ;;  %v9787_v10 = vld [vmem:[#allocation94_spill] sm:$0xff] }
 0x10b   : >>> { %v1282_v61 = vsel %vm1186_vm2, %v7212_v20, %v959_v60  ;;  %v1415_v57 = vsel %vm1355_vm3, %v1407_v0, %v1414_v45  ;;  %v1284_v36 = vsel %vm1186_vm2, %v7212_v20, %v961_v2  ;;  %v1370_v21 = vsel %vm1355_vm3, %v1362_v3, %v1369_v9  ;;  %v9789_v45 = vld [vmem:[#allocation78_spill] sm:$0xff] }
 0x10c   : >>> { %v1439_v11 = vor.u32 %v1438_v18, %v1435_v46  ;;  %v1463_v29 = vshrl.u32 %v1282_v61, 16  ;;  %v1466_v34 = vshll.u32 %v1282_v61, 16  ;;  %v1446_v5 = vor.u32 %v1445_v59, %v1442_v47  ;;  %2379 = vmatprep.mubr.bf16.mxu1 %v1415_v57  ;;  %2283 = vmatmul.mubr.bf16.vlgmr.msra.gmra.mxu0 %v1370_v21  ;;  %v1127_v9 = vpop.permute.xlu0 %1126 }
 0x10d   : >>> { %v9785_v53 = vor.u32 %v7423_v41, %v7421_v37  ;;  %2380 = vmatmul.mubr.bf16.vlgmr.msra.gmra.mxu1 %v1400_v62  ;;  %v1470_v60 = vshrl.u32 %v1284_v36, 16  ;;  %v1473_v27 = vshll.u32 %v1284_v36, 16  ;;  %v9786_v51 = vrot.slane %v6870_v35, 5  ;;  %v678_v37 = vpop.permute.xlu1 %677  ;;  %5862 = vmatpush3.bf16.msra.mxu0 %v9787_v10 }
 0x10e   : >>> { %v1465_v49 = vrot.slane %v1463_v29, 3  ;;  %v1468_v56 = vrot.slane %v1466_v34, 4  ;;  %v1244_v20 = vsel %vm1186_vm2, %v7217_v14, %v813_v32  ;;  %v1492_v3 = vsel %vm1355_vm3, %v1484_v38, %v1491_v31  ;;  %5913 = vmatpush3.bf16.msra.mxu1 %v9787_v10  ;;  %5863 = vmatprep.subr.bf16.mxu0 %v7283_v26 }
 0x10f   : >>> { %v1462_v16 = vsel %vm1355_vm3, %v1454_v43, %v9785_v53  ;;  %v1241_v12 = vsel %vm1186_vm2, %v9786_v51, %v811_v48  ;;  %v1447_v41 = vsel %vm1355_vm3, %v1439_v11, %v1446_v5  ;;  %v1472_v2 = vrot.slane %v1470_v60, 3  ;;  %2387 = vmatprep.mubr.bf16.mxu1 %v1492_v3  ;;  %5910 = vmatprep.subr.bf16.mxu1 %v7283_v26 }
 0x110   : >>> { %2290 = vmatprep.mubr.bf16.mxu0 %v1462_v16  ;;  %v1469_v43 = vor.u32 %v1468_v56, %v1465_v49  ;;  %v1475_v39 = vrot.slane %v1473_v27, 4  ;;  %v1525_v54 = vshrl.u32 %v1241_v12, 16  ;;  %v1528_v0 = vshll.u32 %v1241_v12, 16  ;;  %v9792_v49 = vld [vmem:[#allocation79_spill] sm:$0xff] }
 0x111   : >>> { %v1532_v35 = vshrl.u32 %v1244_v20, 16  ;;  %v1535_v46 = vshll.u32 %v1244_v20, 16  ;;  %v9788_v18 = vcombine.low %v7171_v15, %v6840_v40  ;;  %v9790_v47 = vcombine.low %v9789_v45, %v9789_v45  ;;  %v963_v15 = vpop.permute.xlu0 %962  ;;  %v965_v11 = vpop.permute.xlu1 %964  ;;  %5864 = vmatpush3.bf16.msra.mxu0 %v7283_v26 }
 0x112   : >>> { %v1476_v38 = vor.u32 %v1475_v39, %v1472_v2  ;;  %v1527_v31 = vrot.slane %v1525_v54, 3  ;;  %v1530_v61 = vrot.slane %v1528_v0, 4  ;;  %v9791_v5 = vcombine.low %v7178_v58, %v6849_v23  ;;  %5914 = vmatpush3.bf16.msra.mxu1 %v7283_v26  ;;  %5865 = vmatprep.subr.bf16.mxu0 %v7312_v1 }
 0x113   : >>> { %v1327_v14 = vsel %vm1186_vm2, %v9788_v18, %v1127_v9  ;;  %v1329_v59 = vsel %vm1186_vm2, %v9790_v47, %v1127_v9  ;;  %v1534_v48 = vrot.slane %v1532_v35, 3  ;;  %v1537_v32 = vrot.slane %v1535_v46, 4  ;;  %5911 = vmatprep.subr.bf16.mxu1 %v7312_v1 }
 0x114   : >>> { %v1555_v62 = vshrl.u32 %v1327_v14, 16  ;;  %v1558_v40 = vshll.u32 %v1327_v14, 16  ;;  %v1562_v29 = vshrl.u32 %v1329_v59, 16  ;;  %v1565_v34 = vshll.u32 %v1329_v59, 16  ;;  %2291 = vmatmul.mubr.bf16.gmra.mxu0 %v1447_v41 }
 0x115   : >>> { %v1199_v36 = vsel %vm1186_vm2, %v9791_v5, %v678_v37  ;;  %v1531_v21 = vor.u32 %v1530_v61, %v1527_v31  ;;  %v1538_v53 = vor.u32 %v1537_v32, %v1534_v48  ;;  %v9793_v56 = vcombine.low %v9792_v49, %v9792_v49  ;;  %v815_v2 = vpop.permute.xlu0 %814  ;;  %v817_v39 = vpop.permute.xlu1 %816  ;;  %5866 = vmatpush3.bf16.msra.mxu0 %v7312_v1 }
 0x116   : >>> { %v7524_v57 = vrot.slane %v1555_v62, 3  ;;  %v1560_v16 = vrot.slane %v1558_v40, 4  ;;  %v1564_v27 = vrot.slane %v1562_v29, 3  ;;  %v1567_v51 = vrot.slane %v1565_v34, 4  ;;  %5915 = vmatpush3.bf16.msra.mxu1 %v7312_v1  ;;  %5867 = vmatprep.subr.bf16.mxu0 %v7380_v13 }
 0x117   : >>> { %v1201_v60 = vsel %vm1186_vm2, %v9793_v56, %v678_v37  ;;  %v1510_v12 = vshrl.u32 %v1199_v36, 16  ;;  %v1513_v23 = vshll.u32 %v1199_v36, 16  ;;  %v1477_v9 = vsel %vm1355_vm3, %v1469_v43, %v1476_v38  ;;  %5912 = vmatprep.subr.bf16.mxu1 %v7380_v13 }
 0x118   : >>> { %v1561_v58 = vor.u32 %v1560_v16, %v7524_v57  ;;  %v1517_v20 = vshrl.u32 %v1201_v60, 16  ;;  %v1520_v3 = vshll.u32 %v1201_v60, 16  ;;  %v1568_v37 = vor.u32 %v1567_v51, %v1564_v27  ;;  %2388 = vmatmul.mubr.bf16.gmra.mxu1 %v1477_v9 }
 0x119   : >>> { %v1512_v54 = vrot.slane %v1510_v12, 3  ;;  %v1515_v26 = vrot.slane %v1513_v23, 4  ;;  %v1287_v10 = vsel %vm1186_vm2, %v7237_v44, %v963_v15  ;;  %v1289_v18 = vsel %vm1186_vm2, %v7237_v44, %v965_v11  ;;  %v1129_v1 = vpop.permute.xlu0 %1128  ;;  %v680_v61 = vpop.permute.xlu1 %679  ;;  %5868 = vmatpush3.bf16.msra.mxu0 %v7380_v13 }
 0x11a   : >>> { %v1519_v41 = vrot.slane %v1517_v20, 3  ;;  %v1522_v0 = vrot.slane %v1520_v3, 4  ;;  %v1540_v35 = vshrl.u32 %v1287_v10, 16  ;;  %v1543_v46 = vshll.u32 %v1287_v10, 16  ;;  %5916 = vmatpush3.bf16.msra.mxu1 %v7380_v13  ;;  %v9796_v13 = vld [vmem:[#allocation81_spill] sm:$0xff] }
 0x11b   : >>> { %v1516_v43 = vor.u32 %v1515_v26, %v1512_v54  ;;  %v1539_v14 = vsel %vm1355_vm3, %v1531_v21, %v1538_v53  ;;  %v9794_v38 = vrot.slane %v6914_v24, 5  ;;  %v1547_v62 = vshrl.u32 %v1289_v18, 16  ;;  %v9801_v26 = vld [vmem:[#allocation83_spill] sm:$0xff] }
 0x11c   : >>> { %v1523_v45 = vor.u32 %v1522_v0, %v1519_v41  ;;  %v1542_v47 = vrot.slane %v1540_v35, 3  ;;  %v1545_v59 = vrot.slane %v1543_v46, 4  ;;  %2298 = vmatprep.mubr.bf16.mxu0 %v1539_v14  ;;  %v1550_v48 = vshll.u32 %v1289_v18, 16 }
 0x11d   : >>> { %v1247_v31 = vsel %vm1186_vm2, %v9794_v38, %v815_v2  ;;  %v1250_v44 = vsel %vm1186_vm2, %v7244_v22, %v817_v39  ;;  %v1549_v15 = vrot.slane %v1547_v62, 3  ;;  %v1569_v16 = vsel %vm1355_vm3, %v1561_v58, %v1568_v37  ;;  %v967_v56 = vpop.permute.xlu0 %966  ;;  %v969_v60 = vpop.permute.xlu1 %968  ;;  %v9798_v37 = vld [vmem:[#allocation109_spill] sm:$0xff] }
 0x11e   : >>> { %v1602_v32 = vshrl.u32 %v1247_v31, 16  ;;  %v1605_v40 = vshll.u32 %v1247_v31, 16  ;;  %v1546_v24 = vor.u32 %v1545_v59, %v1542_v47  ;;  %v1609_v11 = vshrl.u32 %v1250_v44, 16  ;;  %2395 = vmatprep.mubr.bf16.mxu1 %v1569_v16 }
 0x11f   : >>> { %v1612_v57 = vshll.u32 %v1250_v44, 16  ;;  %v1552_v29 = vrot.slane %v1550_v48, 4  ;;  %v1524_v36 = vsel %vm1355_vm3, %v1516_v43, %v1523_v45  ;;  %v9795_v22 = vcombine.low %v7195_v28, %v6891_v4  ;;  %v9799_v4 = vld [vmem:[#allocation82_spill] sm:$0xff] }
 0x120   : >>> { %v1604_v34 = vrot.slane %v1602_v32, 3  ;;  %v1607_v5 = vrot.slane %v1605_v40, 4  ;;  %v1611_v21 = vrot.slane %v1609_v11, 3  ;;  %2299 = vmatmul.mubr.bf16.gmra.mxu0 %v1524_v36  ;;  %v9797_v12 = vcombine.low %v9796_v13, %v9796_v13 }
 0x121   : >>> { %v1614_v53 = vrot.slane %v1612_v57, 4  ;;  %v1332_v49 = vsel %vm1186_vm2, %v9795_v22, %v1129_v1  ;;  %v1553_v27 = vor.u32 %v1552_v29, %v1549_v15  ;;  %v9800_v28 = vcombine.low %v9798_v37, %v9799_v4  ;;  %v819_v14 = vpop.permute.xlu0 %818  ;;  %v821_v38 = vpop.permute.xlu1 %820  ;;  %v9804_v4 = vld [vmem:[#allocation110_spill] sm:$0xff] }
 0x122   : >>> { %v1608_v51 = vor.u32 %v1607_v5, %v1604_v34  ;;  %v1334_v23 = vsel %vm1186_vm2, %v9797_v12, %v1129_v1  ;;  %v1632_v20 = vshrl.u32 %v1332_v49, 16  ;;  %v1635_v9 = vshll.u32 %v1332_v49, 16 }
 0x123   : >>> { %v1615_v3 = vor.u32 %v1614_v53, %v1611_v21  ;;  %v1639_v2 = vshrl.u32 %v1334_v23, 16  ;;  %v1642_v58 = vshll.u32 %v1334_v23, 16  ;;  %v1204_v54 = vsel %vm1186_vm2, %v9800_v28, %v680_v61  ;;  %v9805_v28 = vld [vmem:[#allocation85_spill] sm:$0xff] }
 0x124   : >>> { %v1634_v39 = vrot.slane %v1632_v20, 3  ;;  %v9802_v10 = vcombine.low %v9801_v26, %v9801_v26  ;;  %v1554_v0 = vsel %vm1355_vm3, %v1546_v24, %v1553_v27  ;;  %v1637_v35 = vrot.slane %v1635_v9, 4 }
 0x125   : >>> { %v1641_v46 = vrot.slane %v1639_v2, 3  ;;  %v1644_v43 = vrot.slane %v1642_v58, 4  ;;  %v1587_v18 = vshrl.u32 %v1204_v54, 16  ;;  %2396 = vmatmul.mubr.bf16.gmra.mxu1 %v1554_v0  ;;  %v1590_v31 = vshll.u32 %v1204_v54, 16  ;;  %v1131_v5 = vpop.permute.xlu0 %1130  ;;  %v682_v36 = vpop.permute.xlu1 %681 }
 0x126   : >>> { %v1206_v41 = vsel %vm1186_vm2, %v9802_v10, %v680_v61  ;;  %v1292_v59 = vsel %vm1186_vm2, %v7270_v19, %v967_v56  ;;  %v1638_v62 = vor.u32 %v1637_v35, %v1634_v39  ;;  %v1294_v11 = vsel %vm1186_vm2, %v7270_v19, %v969_v60 }
 0x127   : >>> { %v1594_v45 = vshrl.u32 %v1206_v41, 16  ;;  %v1597_v47 = vshll.u32 %v1206_v41, 16  ;;  %v1645_v1 = vor.u32 %v1644_v43, %v1641_v46  ;;  %v1589_v48 = vrot.slane %v1587_v18, 3  ;;  %v9807_v41 = vld [vmem:[#allocation86_spill] sm:$0xff] }
 0x128   : >>> { %v1617_v32 = vshrl.u32 %v1292_v59, 16  ;;  %v1592_v61 = vrot.slane %v1590_v31, 4  ;;  %v1620_v24 = vshll.u32 %v1292_v59, 16  ;;  %v1616_v57 = vsel %vm1355_vm3, %v1608_v51, %v1615_v3 }
 0x129   : >>> { %v1596_v40 = vrot.slane %v1594_v45, 3  ;;  %v1599_v44 = vrot.slane %v1597_v47, 4  ;;  %v9803_v29 = vrot.slane %v6958_v25, 5  ;;  %v1624_v22 = vshrl.u32 %v1294_v11, 16  ;;  %2306 = vmatprep.mubr.bf16.mxu0 %v1616_v57  ;;  %v971_v9 = vpop.permute.xlu0 %970  ;;  %v973_v2 = vpop.permute.xlu1 %972  ;;  %v9809_v45 = vld [vmem:[#allocation111_spill] sm:$0xff] }
 0x12a   : >>> { %v1619_v15 = vrot.slane %v1617_v32, 3  ;;  %v1593_v21 = vor.u32 %v1592_v61, %v1589_v48  ;;  %v1622_v16 = vrot.slane %v1620_v24, 4  ;;  %v1627_v49 = vshll.u32 %v1294_v11, 16  ;;  %v9810_v47 = vld [vmem:[#allocation87_spill] sm:$0xff] }
 0x12b   : >>> { %v1253_v34 = vsel %vm1186_vm2, %v9803_v29, %v819_v14  ;;  %v1600_v53 = vor.u32 %v1599_v44, %v1596_v40  ;;  %v1256_v13 = vsel %vm1186_vm2, %v7275_v7, %v821_v38  ;;  %v1626_v60 = vrot.slane %v1624_v22, 3 }
 0x12c   : >>> { %v1679_v56 = vshrl.u32 %v1253_v34, 16  ;;  %v1682_v27 = vshll.u32 %v1253_v34, 16  ;;  %v1623_v19 = vor.u32 %v1622_v16, %v1619_v15  ;;  %v1686_v51 = vshrl.u32 %v1256_v13, 16 }
 0x12d   : >>> { %v1689_v12 = vshll.u32 %v1256_v13, 16  ;;  %v1629_v25 = vrot.slane %v1627_v49, 4  ;;  %v1601_v3 = vsel %vm1355_vm3, %v1593_v21, %v1600_v53  ;;  %v1646_v37 = vsel %vm1355_vm3, %v1638_v62, %v1645_v1  ;;  %v9812_v1 = vld [vmem:[#allocation88_spill] sm:$0xff]  ;;  %v823_v40 = vpop.permute.xlu0 %822  ;;  %v825_v44 = vpop.permute.xlu1 %824  ;;  %v9814_v21 = vld [vmem:[#allocation114_spill] sm:$0xff] }
 0x12e   : >>> { %v1681_v23 = vrot.slane %v1679_v56, 3  ;;  %v1684_v20 = vrot.slane %v1682_v27, 4  ;;  %v1688_v58 = vrot.slane %v1686_v51, 3  ;;  %2307 = vmatmul.mubr.bf16.gmra.mxu0 %v1601_v3  ;;  %v9806_v54 = vcombine.low %v9804_v4, %v9805_v28  ;;  %2403 = vmatprep.mubr.bf16.mxu1 %v1646_v37 }
 0x12f   : >>> { %v1691_v39 = vrot.slane %v1689_v12, 4  ;;  %v1630_v26 = vor.u32 %v1629_v25, %v1626_v60  ;;  %v9808_v0 = vcombine.low %v9807_v41, %v9807_v41  ;;  %v9811_v59 = vcombine.low %v9809_v45, %v9810_v47 }
 0x130   : >>> { %v1337_v7 = vsel %vm1186_vm2, %v9806_v54, %v1131_v5  ;;  %v1685_v10 = vor.u32 %v1684_v20, %v1681_v23  ;;  %v9813_v48 = vcombine.low %v9812_v1, %v9812_v1  ;;  %v1297_v53 = vsel %vm1186_vm2, %v9814_v21, %v971_v9  ;;  %v9815_v20 = vld [vmem:[#allocation95_spill] sm:$0xff]  ;;  %v9819_v1 = vld [vmem:[#allocation90_spill] sm:$0xff] }
 0x131   : >>> { %v1339_v35 = vsel %vm1186_vm2, %v9808_v0, %v1131_v5  ;;  %v1709_v46 = vshrl.u32 %v1337_v7, 16  ;;  %v1692_v43 = vor.u32 %v1691_v39, %v1688_v58  ;;  %v1712_v18 = vshll.u32 %v1337_v7, 16  ;;  %v1133_v60 = vpop.permute.xlu0 %1132  ;;  %v684_v51 = vpop.permute.xlu1 %683 }
 0x132   : >>> { %v1716_v14 = vshrl.u32 %v1339_v35, 16  ;;  %v1719_v38 = vshll.u32 %v1339_v35, 16  ;;  %v1209_v62 = vsel %vm1186_vm2, %v9811_v59, %v682_v36  ;;  %v1211_v32 = vsel %vm1186_vm2, %v9813_v48, %v682_v36 }
 0x133   : >>> { %v1711_v31 = vrot.slane %v1709_v46, 3  ;;  %v1631_v61 = vsel %vm1355_vm3, %v1623_v19, %v1630_v26  ;;  %v1714_v24 = vrot.slane %v1712_v18, 4  ;;  %v1664_v57 = vshrl.u32 %v1209_v62, 16  ;;  %v9817_v26 = vld [vmem:[#allocation115_spill] sm:$0xff] }
 0x134   : >>> { %v1718_v15 = vrot.slane %v1716_v14, 3  ;;  %v1721_v11 = vrot.slane %v1719_v38, 4  ;;  %2404 = vmatmul.mubr.bf16.gmra.mxu1 %v1631_v61  ;;  %v1667_v29 = vshll.u32 %v1209_v62, 16  ;;  %v1671_v34 = vshrl.u32 %v1211_v32, 16  ;;  %v9818_v62 = vld [vmem:[#allocation112_spill] sm:$0xff] }
 0x135   : >>> { %v1674_v5 = vshll.u32 %v1211_v32, 16  ;;  %v1715_v16 = vor.u32 %v1714_v24, %v1711_v31  ;;  %v1666_v49 = vrot.slane %v1664_v57, 3  ;;  %v1694_v56 = vshrl.u32 %v1297_v53, 16 }
 0x136   : >>> { %v1722_v22 = vor.u32 %v1721_v11, %v1718_v15  ;;  %v1669_v36 = vrot.slane %v1667_v29, 4  ;;  %v1673_v27 = vrot.slane %v1671_v34, 3  ;;  %v1697_v19 = vshll.u32 %v1297_v53, 16 }
 0x137   : >>> { %v1676_v13 = vrot.slane %v1674_v5, 4  ;;  %v1696_v12 = vrot.slane %v1694_v56, 3  ;;  %v1299_v25 = vsel %vm1186_vm2, %v9814_v21, %v973_v2  ;;  %v1693_v23 = vsel %vm1355_vm3, %v1685_v10, %v1692_v43  ;;  %v975_v10 = vpop.permute.xlu0 %974  ;;  %v977_v43 = vpop.permute.xlu1 %976 }
 0x138   : >>> { %v9816_v3 = vrot.slane %v9815_v20, 5  ;;  %v1670_v58 = vor.u32 %v1669_v36, %v1666_v49  ;;  %v1699_v37 = vrot.slane %v1697_v19, 4  ;;  %v1701_v4 = vshrl.u32 %v1299_v25, 16  ;;  %2314 = vmatprep.mubr.bf16.mxu0 %v1693_v23  ;;  %v9824_v49 = vld [vmem:[#allocation92_spill] sm:$0xff] }
 0x139   : >>> { %v1677_v39 = vor.u32 %v1676_v13, %v1673_v27  ;;  %v1704_v28 = vshll.u32 %v1299_v25, 16  ;;  %v1262_v41 = vsel %vm1186_vm2, %v9817_v26, %v825_v44  ;;  %v1723_v59 = vsel %vm1355_vm3, %v1715_v16, %v1722_v22  ;;  %v9821_v44 = vld [vmem:[#allocation91_spill] sm:$0xff]  ;;  %v9823_v22 = vld [vmem:[#allocation113_spill] sm:$0xff] }
 0x13a   : >>> { %v1259_v9 = vsel %vm1186_vm2, %v9816_v3, %v823_v40  ;;  %v1700_v0 = vor.u32 %v1699_v37, %v1696_v12  ;;  %v1703_v35 = vrot.slane %v1701_v4, 3  ;;  %v1763_v2 = vshrl.u32 %v1262_v41, 16  ;;  %2411 = vmatprep.mubr.bf16.mxu1 %v1723_v59  ;;  %v9826_v27 = vld [vmem:[#allocation93_spill] sm:$0xff] }
 0x13b   : >>> { %v1756_v54 = vshrl.u32 %v1259_v9, 16  ;;  %v1759_v7 = vshll.u32 %v1259_v9, 16  ;;  %v1766_v46 = vshll.u32 %v1262_v41, 16  ;;  %v1706_v18 = vrot.slane %v1704_v28, 4  ;;  %v827_v21 = vpop.permute.xlu0 %826  ;;  %v829_v53 = vpop.permute.xlu1 %828 }
 0x13c   : >>> { %v1678_v31 = vsel %vm1355_vm3, %v1670_v58, %v1677_v39  ;;  %v1765_v45 = vrot.slane %v1763_v2, 3  ;;  %v9820_v48 = vcombine.low %v9818_v62, %v9819_v1  ;;  %v9822_v24 = vcombine.low %v9821_v44, %v9821_v44  ;;  %v9828_v39 = vld [vmem:[#allocation116_spill] sm:$0xff] }
 0x13d   : >>> { %v1758_v14 = vrot.slane %v1756_v54, 3  ;;  %v1761_v38 = vrot.slane %v1759_v7, 4  ;;  %v1768_v47 = vrot.slane %v1766_v46, 4  ;;  %2315 = vmatmul.mubr.bf16.gmra.mxu0 %v1678_v31  ;;  %v1707_v61 = vor.u32 %v1706_v18, %v1703_v35 }
 0x13e   : >>> { %v1342_v32 = vsel %vm1186_vm2, %v9820_v48, %v1133_v60  ;;  %v1344_v15 = vsel %vm1186_vm2, %v9822_v24, %v1133_v60  ;;  %v9825_v56 = vcombine.low %v9823_v22, %v9824_v49  ;;  %v9827_v13 = vcombine.low %v9826_v27, %v9826_v27  ;;  %v9832_v49 = vld [vmem:[#allocation117_spill] sm:$0xff] }
 0x13f   : >>> { %v1762_v40 = vor.u32 %v1761_v38, %v1758_v14  ;;  %v1786_v11 = vshrl.u32 %v1342_v32, 16  ;;  %v1769_v57 = vor.u32 %v1768_v47, %v1765_v45  ;;  %v1789_v29 = vshll.u32 %v1342_v32, 16  ;;  %v1135_v26 = vpop.permute.xlu0 %1134  ;;  %v686_v2 = vpop.permute.xlu1 %685  ;;  %v9829_v38 = vld [vmem:[#allocation101_spill] sm:$0xff] }
 0x140   : >>> { %v1793_v34 = vshrl.u32 %v1344_v15, 16  ;;  %v1796_v5 = vshll.u32 %v1344_v15, 16  ;;  %v1214_v36 = vsel %vm1186_vm2, %v9825_v56, %v684_v51  ;;  %v1216_v19 = vsel %vm1186_vm2, %v9827_v13, %v684_v51  ;;  %v9833_v56 = vld [vmem:[#allocation96_spill] sm:$0xff] }
 0x141   : >>> { %v1788_v16 = vrot.slane %v1786_v11, 3  ;;  %v1708_v60 = vsel %vm1355_vm3, %v1700_v0, %v1707_v61  ;;  %v1791_v12 = vrot.slane %v1789_v29, 4  ;;  %v1741_v20 = vshrl.u32 %v1214_v36, 16  ;;  %v9831_v61 = vld [vmem:[#allocation118_spill] sm:$0xff] }
 0x142   : >>> { %v1795_v25 = vrot.slane %v1793_v34, 3  ;;  %v1798_v23 = vrot.slane %v1796_v5, 4  ;;  %2412 = vmatmul.mubr.bf16.gmra.mxu1 %v1708_v60  ;;  %v1744_v3 = vshll.u32 %v1214_v36, 16  ;;  %v1748_v9 = vshrl.u32 %v1216_v19, 16  ;;  %v9835_v60 = vld [vmem:[#allocation97_spill] sm:$0xff] }
 0x143   : >>> { %v1751_v58 = vshll.u32 %v1216_v19, 16  ;;  %v1302_v37 = vsel %vm1186_vm2, %v9828_v39, %v975_v10  ;;  %v1792_v4 = vor.u32 %v1791_v12, %v1788_v16  ;;  %v1743_v54 = vrot.slane %v1741_v20, 3  ;;  %v979_v24 = vpop.permute.xlu0 %978  ;;  %v981_v27 = vpop.permute.xlu1 %980 }
 0x144   : >>> { %v1799_v28 = vor.u32 %v1798_v23, %v1795_v25  ;;  %v1771_v7 = vshrl.u32 %v1302_v37, 16  ;;  %v1746_v41 = vrot.slane %v1744_v3, 4  ;;  %v1750_v51 = vrot.slane %v1748_v9, 3 }
 0x145   : >>> { %v1753_v35 = vrot.slane %v1751_v58, 4  ;;  %v1774_v0 = vshll.u32 %v1302_v37, 16  ;;  %v1304_v18 = vsel %vm1186_vm2, %v9828_v39, %v977_v43  ;;  %v1770_v14 = vsel %vm1355_vm3, %v1762_v40, %v1769_v57  ;;  %v9837_v37 = vld [vmem:[#allocation119_spill] sm:$0xff] }
 0x146   : >>> { %v1773_v46 = vrot.slane %v1771_v7, 3  ;;  %v9830_v31 = vrot.slane %v9829_v38, 5  ;;  %v1747_v45 = vor.u32 %v1746_v41, %v1743_v54  ;;  %v1778_v62 = vshrl.u32 %v1304_v18, 16  ;;  %2322 = vmatprep.mubr.bf16.mxu0 %v1770_v14  ;;  %v9840_v7 = vld [vmem:[#allocation99_spill] sm:$0xff] }
 0x147   : >>> { %v1754_v47 = vor.u32 %v1753_v35, %v1750_v51  ;;  %v1776_v59 = vrot.slane %v1774_v0, 4  ;;  %v1781_v1 = vshll.u32 %v1304_v18, 16  ;;  %v1268_v44 = vsel %vm1186_vm2, %v9831_v61, %v829_v53  ;;  %v831_v0 = vpop.permute.xlu0 %830 }
 0x148   : >>> { %v1265_v10 = vsel %vm1186_vm2, %v9830_v31, %v827_v21  ;;  %v1780_v43 = vrot.slane %v1778_v62, 3  ;;  %v1840_v11 = vshrl.u32 %v1268_v44, 16  ;;  %v1843_v40 = vshll.u32 %v1268_v44, 16 }
 0x149   : >>> { %v1833_v48 = vshrl.u32 %v1265_v10, 16  ;;  %v1836_v32 = vshll.u32 %v1265_v10, 16  ;;  %v1777_v15 = vor.u32 %v1776_v59, %v1773_v46  ;;  %v1783_v57 = vrot.slane %v1781_v1, 4 }
 0x14a   : >>> { %v1755_v5 = vsel %vm1355_vm3, %v1747_v45, %v1754_v47  ;;  %v1842_v21 = vrot.slane %v1840_v11, 3  ;;  %v1845_v16 = vrot.slane %v1843_v40, 4  ;;  %v1800_v22 = vsel %vm1355_vm3, %v1792_v4, %v1799_v28  ;;  %v9838_v4 = vld [vmem:[#allocation98_spill] sm:$0xff]  ;;  %v9842_v45 = vld [vmem:[#allocation89_spill] sm:$0xff] }
 0x14b   : >>> { %v1835_v29 = vrot.slane %v1833_v48, 3  ;;  %v1838_v34 = vrot.slane %v1836_v32, 4  ;;  %2323 = vmatmul.mubr.bf16.gmra.mxu0 %v1755_v5  ;;  %v9834_v36 = vcombine.low %v9832_v49, %v9833_v56  ;;  %v1784_v13 = vor.u32 %v1783_v57, %v1780_v43  ;;  %2419 = vmatprep.mubr.bf16.mxu1 %v1800_v22  ;;  %v833_v32 = vpop.permute.xlu1 %832  ;;  %v9843_v57 = vld [vmem:[#allocation107_spill] sm:$0xff]  ;;  %v1137_v22 = vpop.permute.xlu0 %1136 }
 0x14c   : >>> { %v9836_v12 = vcombine.low %v9835_v60, %v9835_v60  ;;  %v1846_v20 = vor.u32 %v1845_v16, %v1842_v21  ;;  %v9839_v28 = vcombine.low %v9837_v37, %v9838_v4  ;;  %v9841_v41 = vcombine.low %v9840_v7, %v9840_v7  ;;  %v9846_v4 = vld [vmem:[#allocation102_spill] sm:$0xff] }
 0x14d   : >>> { %v1347_v53 = vsel %vm1186_vm2, %v9834_v36, %v1135_v26  ;;  %v1839_v19 = vor.u32 %v1838_v34, %v1835_v29  ;;  %v1785_v35 = vsel %vm1355_vm3, %v1777_v15, %v1784_v13  ;;  %v1307_v47 = vsel %vm1186_vm2, %v9842_v45, %v979_v24 }
 0x14e   : >>> { %v1349_v25 = vsel %vm1186_vm2, %v9836_v12, %v1135_v26  ;;  %v1863_v23 = vshrl.u32 %v1347_v53, 16  ;;  %v1866_v3 = vshll.u32 %v1347_v53, 16  ;;  %v1219_v54 = vsel %vm1186_vm2, %v9839_v28, %v686_v2  ;;  %2420 = vmatmul.mubr.bf16.gmra.mxu1 %v1785_v35  ;;  %v9845_v53 = vld [vmem:[#allocation108_spill] sm:$0xff] }
 0x14f   : >>> { %v1870_v9 = vshrl.u32 %v1349_v25, 16  ;;  %v1873_v58 = vshll.u32 %v1349_v25, 16  ;;  %v1221_v51 = vsel %vm1186_vm2, %v9841_v41, %v686_v2  ;;  %v1818_v14 = vshrl.u32 %v1219_v54, 16 }
 0x150   : >>> { %v1865_v39 = vrot.slane %v1863_v23, 3  ;;  %v1868_v26 = vrot.slane %v1866_v3, 4  ;;  %v1821_v38 = vshll.u32 %v1219_v54, 16  ;;  %v1825_v31 = vshrl.u32 %v1221_v51, 16 }
 0x151   : >>> { %v1872_v46 = vrot.slane %v1870_v9, 3  ;;  %v1875_v18 = vrot.slane %v1873_v58, 4  ;;  %v1828_v10 = vshll.u32 %v1221_v51, 16  ;;  %v1820_v1 = vrot.slane %v1818_v14, 3  ;;  %v688_v9 = vpop.permute.xlu1 %687  ;;  %v9848_v51 = vld [vmem:[#allocation103_spill] sm:$0xff] }
 0x152   : >>> { %v1869_v59 = vor.u32 %v1868_v26, %v1865_v39  ;;  %v1848_v48 = vshrl.u32 %v1307_v47, 16  ;;  %v1823_v2 = vrot.slane %v1821_v38, 4  ;;  %v1827_v61 = vrot.slane %v1825_v31, 3  ;;  %v983_v31 = vpop.permute.xlu0 %982 }
 0x153   : >>> { %v1876_v62 = vor.u32 %v1875_v18, %v1872_v46  ;;  %v1830_v44 = vrot.slane %v1828_v10, 4  ;;  %v1851_v15 = vshll.u32 %v1307_v47, 16  ;;  %v1309_v11 = vsel %vm1186_vm2, %v9842_v45, %v981_v27  ;;  %v9851_v47 = vld [vmem:[#allocation105_spill] sm:$0xff] }
 0x154   : >>> { %v1850_v43 = vrot.slane %v1848_v48, 3  ;;  %v1847_v40 = vsel %vm1355_vm3, %v1839_v19, %v1846_v20  ;;  %v9844_v29 = vrot.slane %v9843_v57, 5  ;;  %v1824_v24 = vor.u32 %v1823_v2, %v1820_v1 }
 0x155   : >>> { %v1831_v5 = vor.u32 %v1830_v44, %v1827_v61  ;;  %v1853_v21 = vrot.slane %v1851_v15, 4  ;;  %v1855_v16 = vshrl.u32 %v1309_v11, 16  ;;  %2330 = vmatprep.mubr.bf16.mxu0 %v1847_v40  ;;  %v1858_v49 = vshll.u32 %v1309_v11, 16 }
 0x156   : >>> { %v1271_v34 = vsel %vm1186_vm2, %v9844_v29, %v831_v0  ;;  %v1274_v13 = vsel %vm1186_vm2, %v9845_v53, %v833_v32  ;;  %v1877_v37 = vsel %vm1355_vm3, %v1869_v59, %v1876_v62  ;;  %v9847_v28 = vcombine.low %v7341_v6, %v9846_v4 }
 0x157   : >>> { %v1910_v56 = vshrl.u32 %v1271_v34, 16  ;;  %v1913_v36 = vshll.u32 %v1271_v34, 16  ;;  %v1854_v60 = vor.u32 %v1853_v21, %v1850_v43  ;;  %v1857_v27 = vrot.slane %v1855_v16, 3  ;;  %2427 = vmatprep.mubr.bf16.mxu1 %v1877_v37  ;;  %v6055_v34 = vld [vmem:[%s6743_s15 + $0x9c] ss:$0 sps:$4 sm:$0x11]  }
 0x158   : >>> { %v1917_v12 = vshrl.u32 %v1274_v13, 16  ;;  %v1920_v19 = vshll.u32 %v1274_v13, 16  ;;  %v1860_v25 = vrot.slane %v1858_v49, 4  ;;  %v1832_v3 = vsel %vm1355_vm3, %v1824_v24, %v1831_v5 }
 0x159   : >>> { %v1912_v23 = vrot.slane %v1910_v56, 3  ;;  %v1915_v20 = vrot.slane %v1913_v36, 4  ;;  %2331 = vmatmul.mubr.bf16.gmra.mxu0 %v1832_v3  ;;  %v1352_v54 = vsel %vm1186_vm2, %v9847_v28, %v1137_v22  ;;  %v9849_v35 = vcombine.low %v9848_v51, %v9848_v51  ;;  %v9853_v3 = vld [vmem:[#allocation106_spill] sm:$0xff] }
 0x15a   : >>> { %v1919_v58 = vrot.slane %v1917_v12, 3  ;;  %v1922_v39 = vrot.slane %v1920_v19, 4  ;;  %v1861_v7 = vor.u32 %v1860_v25, %v1857_v27  ;;  %v1940_v26 = vshrl.u32 %v1352_v54, 16  ;;  %v9856_v51 = vld [vmem:[#allocation130_spill] sm:$0xff] }
 0x15b   : >>> { %v1916_v41 = vor.u32 %v1915_v20, %v1912_v23  ;;  %v1354_v0 = vsel %vm1186_vm2, %v9849_v35, %v1137_v22  ;;  %v1943_v18 = vshll.u32 %v1352_v54, 16  ;;  %v9850_v6 = vcombine.low %v7355_v42, %v9760_v30  ;;  %v985_v30 = vpop.permute.xlu1 %984  ;;  %v9854_v54 = vld [vmem:[#allocation84_spill] sm:$0xff] }
 0x15c   : >>> { %v1923_v46 = vor.u32 %v1922_v39, %v1919_v58  ;;  %v1947_v14 = vshrl.u32 %v1354_v0, 16  ;;  %v1950_v38 = vshll.u32 %v1354_v0, 16  ;;  %v1942_v10 = vrot.slane %v1940_v26, 3 }
 0x15d   : >>> { %v1224_v45 = vsel %vm1186_vm2, %v9850_v6, %v688_v9  ;;  %v9852_v59 = vcombine.low %v9851_v47, %v9851_v47  ;;  %v1862_v1 = vsel %vm1355_vm3, %v1854_v60, %v1861_v7  ;;  %v1945_v48 = vrot.slane %v1943_v18, 4  ;;  %v9855_v7 = vld [vmem:[#allocation100_spill] sm:$0xff]  ;;  %v9858_v18 = vld [vmem:[#allocation122_spill] sm:$0xff]  ;;  %v9867_v47 = vld [vmem:[#allocation123_spill] sm:$0xff] }
 0x15e   : >>> { %v1949_v32 = vrot.slane %v1947_v14, 3  ;;  %v1952_v2 = vrot.slane %v1950_v38, 4  ;;  %v1895_v61 = vshrl.u32 %v1224_v45, 16  ;;  %2428 = vmatmul.mubr.bf16.gmra.mxu1 %v1862_v1  ;;  %v1898_v44 = vshll.u32 %v1224_v45, 16  ;;  %v9860_v38 = vld [vmem:[#allocation121_spill] sm:$0xff]  ;;  %v9866_v45 = vld [vmem:[#allocation124_spill] sm:$0xff] }
 0x15f   : >>> { %v1226_v62 = vsel %vm1186_vm2, %v9852_v59, %v688_v9  ;;  %v1312_v42 = vsel %vm1186_vm2, %v7382_v33, %v983_v31  ;;  %v1946_v11 = vor.u32 %v1945_v48, %v1942_v10  ;;  %v1314_v49 = vsel %vm1186_vm2, %v7382_v33, %v985_v30  ;;  %v9863_v10 = vld [vmem:[#allocation126_spill] sm:$0xff]  ;;  %v9872_v30 = vld [vmem:[#allocation128_spill] sm:$0xff] }
 0x160   : >>> { %v1902_v15 = vshrl.u32 %v1226_v62, 16  ;;  %v1905_v43 = vshll.u32 %v1226_v62, 16  ;;  %v1953_v40 = vor.u32 %v1952_v2, %v1949_v32  ;;  %v1897_v57 = vrot.slane %v1895_v61, 3 }
 0x161   : >>> { %v1925_v29 = vshrl.u32 %v1312_v42, 16  ;;  %v1900_v24 = vrot.slane %v1898_v44, 4  ;;  %v1928_v16 = vshll.u32 %v1312_v42, 16  ;;  %v1924_v56 = vsel %vm1355_vm3, %v1916_v41, %v1923_v46  ;;  %v9857_v46 = vld [vmem:[#allocation80_spill] sm:$0xff] }
 0x162   : >>> { %v1904_v5 = vrot.slane %v1902_v15, 3  ;;  %v1907_v21 = vrot.slane %v1905_v43, 4  ;;  %v1954_v36 = vsel %vm1355_vm3, %v1946_v11, %v1953_v40  ;;  %v1932_v27 = vshrl.u32 %v1314_v49, 16  ;;  %2338 = vmatprep.mubr.bf16.mxu0 %v1924_v56  ;;  %v9870_v15 = vld [vmem:[#allocation104_spill] sm:$0xff]  ;;  %v9871_v43 = vld [vmem:[#allocation127_spill] sm:$0xff]  ;;  %v9873_v11 = vld [vmem:[#allocation129_spill] sm:$0xff] }
 0x163   : >>> { %v1927_v22 = vrot.slane %v1925_v29, 3  ;;  %v1901_v53 = vor.u32 %v1900_v24, %v1897_v57  ;;  %v1930_v60 = vrot.slane %v1928_v16, 4  ;;  %2435 = vmatprep.mubr.bf16.mxu1 %v1954_v36  ;;  %v1935_v12 = vshll.u32 %v1314_v49, 16 }
 0x164   : >>> { %v1908_v13 = vor.u32 %v1907_v21, %v1904_v5  ;;  %v1882_v19 = vshll.u32 %v7419_v63, 16  ;;  %v1887_v25 = vshrl.u32 %v7446_v50, 16  ;;  %v1890_v23 = vshll.u32 %v7446_v50, 16 }
 0x165   : >>> { %v1934_v20 = vrot.slane %v1932_v27, 3  ;;  %v1183_v9 = vrot.slane %v9853_v3, 5  ;;  %v1184_v58 = vrot.slane %v6055_v34, 5  ;;  %v1931_v39 = vor.u32 %v1930_v60, %v1927_v22 }
 0x166   : >>> { %v1909_v33 = vsel %vm1355_vm3, %v1901_v53, %v1908_v13  ;;  %v1937_v37 = vrot.slane %v1935_v12, 4  ;;  %v1577_v4 = vor.u32 %v7416_v17, %v7414_v55  ;;  %v1648_v28 = vshrl.u32 %v7409_v52, 16  ;;  %v9861_v55 = vld [vmem:[#allocation120_spill] sm:$0xff] }
 0x167   : >>> { %2339 = vmatmul.mubr.bf16.gmra.mxu0 %v1909_v33  ;;  %v1585_v50 = vor.u32 %v9855_v7, %v9854_v54  ;;  %v1651_v41 = vshll.u32 %v7409_v52, 16  ;;  %v1656_v35 = vshrl.u32 %v9856_v51, 16  ;;  %v1659_v0 = vshll.u32 %v9856_v51, 16 }
 0x168   : >>> { %5869 = vmatprep.mubr.msk.bf16.mxu0 %vm1186_vm2, %v7387_v8  ;;  %v1938_v26 = vor.u32 %v1937_v37, %v1934_v20  ;;  %v9859_v14 = vor.u32 %v9857_v46, %v9858_v18  ;;  %v9862_v17 = vor.u32 %v9860_v38, %v9861_v55  ;;  %v9864_v8 = vld [vmem:[#allocation125_spill] sm:$0xff]  ;;  %v9868_v59 = vor.u32 %v9866_v45, %v9867_v47 }
 0x169   : >>> { %v9865_v6 = vor.u32 %v9863_v10, %v9864_v8  ;;  %v9869_v62 = vshrl.u32 %v7419_v63, 16  ;;  %v1884_v48 = vrot.slane %v1882_v19, 4  ;;  %v1889_v32 = vrot.slane %v1887_v25, 3 }
 0x16a   : >>> { %v1509_v31 = vsel %vm1355_vm3, %v9862_v17, %v9859_v14  ;;  %v1892_v2 = vrot.slane %v1890_v23, 4  ;;  %v1185_v61 = vsel %vm713_vm1, %v1183_v9, %v1184_v58  ;;  %v1939_v44 = vsel %vm1355_vm3, %v1931_v39, %v1938_v26 }
 0x16b   : >>> { %v1740_v52 = vsel %vm1355_vm3, %v9868_v59, %v9865_v6  ;;  %v1881_v1 = vrot.slane %v9869_v62, 3  ;;  %v1808_v42 = vor.u32 %v9871_v43, %v9870_v15  ;;  %v1816_v40 = vor.u32 %v9873_v11, %v9872_v30  ;;  %2436 = vmatmul.mubr.bf16.gmra.mxu1 %v1939_v44 }
 0x16c   : >>> { %v1650_v57 = vrot.slane %v1648_v28, 3  ;;  %v1586_v29 = vsel %vm1355_vm3, %v1577_v4, %v1585_v50  ;;  %v1653_v34 = vrot.slane %v1651_v41, 4  ;;  %v1658_v63 = vrot.slane %v1656_v35, 3  ;;  %5877 = vmatprep.mubr.msk.bf16.mxu1 %vm1186_vm2, %v1740_v52 }
 0x16d   : >>> { %v1661_v24 = vrot.slane %v1659_v0, 4  ;;  %v1956_v5 = vshrl.u32 %v1183_v9, 16  ;;  %v1959_v21 = vshll.u32 %v1183_v9, 16  ;;  %v1964_v16 = vshrl.u32 %v1185_v61, 16 }
 0x16e   : >>> { %v1967_v22 = vshll.u32 %v1185_v61, 16  ;;  %v1885_v49 = vor.u32 %v1884_v48, %v1881_v1  ;;  %v1893_v56 = vor.u32 %v1892_v2, %v1889_v32  ;;  %v1817_v36 = vsel %vm1355_vm3, %v1808_v42, %v1816_v40 }
 0x16f   : >>> { %5870 = vmatmul.mubr.msk.bf16.vlgmr.msra.gmra.mxu0 %vm1186_vm2, %v1509_v31  ;;  %v1654_v53 = vor.u32 %v1653_v34, %v1650_v57  ;;  %v1662_v13 = vor.u32 %v1661_v24, %v1658_v63  ;;  %v1958_v60 = vrot.slane %v1956_v5, 3  ;;  %v1961_v27 = vrot.slane %v1959_v21, 4 }
 0x170   : >>> { %5873 = vmatprep.mubr.msk.bf16.mxu0 %vm1186_vm2, %v1586_v29  ;;  %v1966_v12 = vrot.slane %v1964_v16, 3  ;;  %v1969_v19 = vrot.slane %v1967_v22, 4  ;;  %v1894_v25 = vsel %vm1355_vm3, %v1885_v49, %v1893_v56 }
 0x171   : >>> { %v1663_v23 = vsel %vm1355_vm3, %v1654_v53, %v1662_v13  ;;  %v1962_v20 = vor.u32 %v1961_v27, %v1958_v60 }
 0x172   : >>> { %v1970_v33 = vor.u32 %v1969_v19, %v1966_v12  ;;  %v9876_v19 = vld [vmem:[#allocation3_spill] sm:$0xff] }
 0x173   : >>> { %5878 = vmatmul.mubr.msk.bf16.vlgmr.msra.gmra.mxu1 %vm1186_vm2, %v1817_v36 }
 0x174   : >>> { %5881 = vmatprep.mubr.msk.bf16.mxu1 %vm1186_vm2, %v1894_v25  ;;  %v1971_v3 = vsel %vm1355_vm3, %v1962_v20, %v1970_v33 }
 0x177   : >>> { %5874 = vmatmul.mubr.msk.bf16.gmra.mxu0 %vm1186_vm2, %v1663_v23 }
 0x17b   : >>> { %5882 = vmatmul.mubr.msk.bf16.gmra.mxu1 %vm1186_vm2, %v1971_v3 }
 0x1cc   : >>> { %v5597_v58 = vpop.f32.mrf.mxu0 }
 0x1cd   : >>> { %v5661_v9 = vpop.f32.mrf.mxu1 }
 0x1ce   : >>> { %v5598_v37 = vpop.f32.mrf.mxu0 }
 0x1cf   : >>> { %v5662_v39 = vpop.f32.mrf.mxu1  ;;  %v5599_v36 = vadd.f32 %v5598_v37, %v5597_v58 }
 0x1d0   : >>> { %v5600_v28 = vpop.f32.mrf.mxu0  ;;  %v5663_v3 = vadd.f32 %v5662_v39, %v5661_v9 }
 0x1d1   : >>> { %v5664_v4 = vpop.f32.mrf.mxu1  ;;  %v2285_v25 = vadd.f32 %v5599_v36, %v9876_v19 }
 0x1d2   : >>> { %v5601_v54 = vpop.f32.mrf.mxu0 }
 0x1d3   : >>> { %v5665_v7 = vpop.f32.mrf.mxu1  ;;  %v5602_v13 = vadd.f32 %v5601_v54, %v5600_v28 }
 0x1d4   : >>> { %v5603_v50 = vpop.f32.mrf.mxu0 }
 0x1d5   : >>> { %v2288_v20 = vadd.f32 %v5602_v13, %v9876_v19 }
 0x1d6   : >>> { %v5604_v51 = vpop.f32.mrf.mxu0 }
 0x1d7   : >>> { %v5605_v60 = vadd.f32 %v5604_v51, %v5603_v50 }
 0x1d8   : >>> { %v7747_v41 = vpop.f32.mrf.mxu1  ;;  %v5606_v0 = vpop.f32.mrf.mxu0 }
 0x1d9   : >>> { %v2293_v58 = vadd.f32 %v5605_v60, %v9876_v19 }
 0x1da   : >>> { %v7749_v35 = vpop.f32.mrf.mxu1  ;;  %v5607_v26 = vpop.f32.mrf.mxu0 }
 0x1db   : >>> { %v5608_v27 = vadd.f32 %v5607_v26, %v5606_v0  ;;  %v2382_v26 = vadd.f32 %v5663_v3, %v2285_v25  ;;  %v5669_v36 = vadd.f32 %v7749_v35, %v7747_v41 }
 0x1dc   : >>> { %v5670_v46 = vpop.f32.mrf.mxu1 }
 0x1dd   : >>> { %v2296_v37 = vadd.f32 %v5608_v27, %v9876_v19  ;;  %v2390_v41 = vadd.f32 %v5669_v36, %v2293_v58 }
 0x1de   : >>> { %v5671_v14 = vpop.f32.mrf.mxu1 }
 0x1df   : >>> { %v5672_v9 = vadd.f32 %v5671_v14, %v5670_v46 }
 0x1e0   : >>> { %v5609_v18 = vpop.f32.mrf.mxu0 }
 0x1e1   : >>> { %v2393_v35 = vadd.f32 %v5672_v9, %v2296_v37 }
 0x1e2   : >>> { %v5610_v38 = vpop.f32.mrf.mxu0 }
 0x1e4   : >>> { %v5612_v17 = vpop.f32.mrf.mxu0 }
 0x1e5   : >>> { %v5673_v55 = vpop.f32.mrf.mxu1 }
 0x1e6   : >>> { %v5613_v10 = vpop.f32.mrf.mxu0 }
 0x1e7   : >>> { %v5674_v31 = vpop.f32.mrf.mxu1  ;;  %v5614_v28 = vadd.f32 %v5613_v10, %v5612_v17 }
 0x1e8   : >>> { %v5675_v50 = vadd.f32 %v5674_v31, %v5673_v55 }
 0x1e9   : >>> { %v5676_v8 = vpop.f32.mrf.mxu1  ;;  %v2304_v55 = vadd.f32 %v5614_v28, %v9876_v19 }
 0x1eb   : >>> { %v5677_v45 = vpop.f32.mrf.mxu1 }
 0x1ec   : >>> { %v5678_v39 = vadd.f32 %v5677_v45, %v5676_v8 }
 0x1ee   : >>> { %v5615_v6 = vpop.f32.mrf.mxu0 }
 0x1f0   : >>> { %v5616_v47 = vpop.f32.mrf.mxu0 }
 0x1f1   : >>> { %v5617_v51 = vadd.f32 %v5616_v47, %v5615_v6 }
 0x1f2   : >>> { %v5618_v52 = vpop.f32.mrf.mxu0 }
 0x1f3   : >>> { %v2309_v46 = vadd.f32 %v5617_v51, %v9876_v19 }
 0x1f4   : >>> { %v5679_v59 = vpop.f32.mrf.mxu1  ;;  %v5619_v1 = vpop.f32.mrf.mxu0 }
 0x1f6   : >>> { %v5680_v62 = vpop.f32.mrf.mxu1 }
 0x1f7   : >>> { %v5681_v13 = vadd.f32 %v5680_v62, %v5679_v59 }
 0x1f8   : >>> { %v5682_v48 = vpop.f32.mrf.mxu1 }
 0x1fa   : >>> { %v5683_v2 = vpop.f32.mrf.mxu1 }
 0x1fb   : >>> { %v5684_v14 = vadd.f32 %v5683_v2, %v5682_v48 }
 0x1fd   : >>> { %v5621_v32 = vpop.f32.mrf.mxu0 }
 0x1ff   : >>> { %v5622_v61 = vpop.f32.mrf.mxu0 }
 0x200   : >>> { %v5623_v17 = vadd.f32 %v5622_v61, %v5621_v32  ;;  %v7786_v32 = vadd.f32 %v5678_v39, %v2304_v55 }
 0x201   : >>> { %v5624_v15 = vpop.f32.mrf.mxu0 }
 0x202   : >>> { %v5685_v44 = vpop.f32.mrf.mxu1 }
 0x203   : >>> { %v5625_v42 = vpop.f32.mrf.mxu0 }
 0x204   : >>> { %v5686_v43 = vpop.f32.mrf.mxu1  ;;  %v5626_v8 = vadd.f32 %v5625_v42, %v5624_v15 }
 0x205   : >>> { %v5687_v59 = vadd.f32 %v5686_v43, %v5685_v44 }
 0x206   : >>> { %v7751_v30 = vpop.f32.mrf.mxu1 }
 0x208   : >>> { %v7753_v40 = vpop.f32.mrf.mxu1 }
 0x209   : >>> { %9874 = vst [vmem:[#allocation76_spill] sm:$0xff] %v7753_v40  ;;  %v5611_v40 = vadd.f32 %v5610_v38, %v5609_v18  ;;  %v5620_v38 = vadd.f32 %v5619_v1, %v5618_v52 }
 0x20b   : >>> { %v5627_v11 = vpop.f32.mrf.mxu0  ;;  %v2312_v61 = vadd.f32 %v5620_v38, %v9876_v19 }
 0x20d   : >>> { %v5628_v57 = vpop.f32.mrf.mxu0  ;;  %v2409_v60 = vadd.f32 %v5684_v14, %v2312_v61 }
 0x20e   : >>> { %v5691_v29 = vpop.f32.mrf.mxu1  ;;  %v5629_v31 = vadd.f32 %v5628_v57, %v5627_v11  ;;  %v2317_v11 = vadd.f32 %v5623_v17, %v9876_v19 }
 0x20f   : >>> { %v5630_v34 = vpop.f32.mrf.mxu0 }
 0x210   : >>> { %v5692_v63 = vpop.f32.mrf.mxu1  ;;  %v9877_v48 = vld [vmem:[#allocation76_spill] sm:$0xff]  ;;  %v2325_v15 = vadd.f32 %v5629_v31, %v9876_v19 }
 0x211   : >>> { %v5631_v24 = vpop.f32.mrf.mxu0  ;;  %v5693_v62 = vadd.f32 %v5692_v63, %v5691_v29  ;;  %v5690_v2 = vadd.f32 %v9877_v48, %v7751_v30  ;;  %v2320_v29 = vadd.f32 %v5626_v8, %v9876_v19  ;;  %v2414_v30 = vadd.f32 %v5687_v59, %v2317_v11 }
 0x212   : >>> { %v5694_v5 = vpop.f32.mrf.mxu1  ;;  %v5632_v52 = vadd.f32 %v5631_v24, %v5630_v34 }
 0x213   : >>> { %v2422_v3 = vadd.f32 %v5693_v62, %v2325_v15 }
 0x214   : >>> { %v5695_v16 = vpop.f32.mrf.mxu1  ;;  %v2328_v27 = vadd.f32 %v5632_v52, %v9876_v19 }
 0x215   : >>> { %v5696_v42 = vadd.f32 %v5695_v16, %v5694_v5 }
 0x217   : >>> { %v2425_v51 = vadd.f32 %v5696_v42, %v2328_v27 }
 0x219   : >>> { %v5633_v21 = vpop.f32.mrf.mxu0 }
 0x21b   : >>> { %v5634_v22 = vpop.f32.mrf.mxu0 }
 0x21c   : >>> { %v5635_v44 = vadd.f32 %v5634_v22, %v5633_v21 }
 0x21d   : >>> { %v7757_v56 = vpop.f32.mrf.mxu0 }
 0x21e   : >>> { %v7755_v49 = vpop.f32.mrf.mxu1  ;;  %9875 = vst [vmem:[#allocation77_spill] sm:$0xff] %v7757_v56  ;;  %v5666_v56 = vadd.f32 %v5665_v7, %v5664_v4  ;;  %v2301_v7 = vadd.f32 %v5611_v40, %v9876_v19  ;;  %v2333_v22 = vadd.f32 %v5635_v44, %v9876_v19 }
 0x21f   : >>> { %v7761_v12 = vpop.f32.mrf.mxu0 }
 0x220   : >>> { %v7759_v53 = vpop.f32.mrf.mxu1  ;;  %v2385_v4 = vadd.f32 %v5666_v56, %v2288_v20  ;;  %v7784_v47 = vadd.f32 %v5675_v50, %v2301_v7  ;;  %v2406_v56 = vadd.f32 %v5681_v13, %v2309_v46 }
 0x221   : >>> { %v5699_v25 = vadd.f32 %v7759_v53, %v7755_v49 }
 0x222   : >>> { %v7764_v23 = vpop.f32.mrf.mxu1 }
 0x223   : >>> { %v2430_v17 = vadd.f32 %v5699_v25, %v2333_v22 }
 0x224   : >>> { %v7771_v0 = vpop.f32.mrf.mxu1 }
 0x225   : >>> { %v9878_v9 = vld [vmem:[#allocation77_spill] sm:$0xff] }
 0x226   : >>> { %v5638_v39 = vadd.f32 %v7761_v12, %v9878_v9 }
 0x227   : >>> { %v5639_v33 = vpop.f32.mrf.mxu0 }
 0x229   : >>> { %v5640_v54 = vpop.f32.mrf.mxu0 }
 0x22a   : >>> { %v5641_v58 = vadd.f32 %v5640_v54, %v5639_v33 }
 0x22b   : >>> { %v7775_v18 = vpop.f32.mrf.mxu0  ;;  %v5703_v10 = vpop.f32.mrf.mxu1 }
 0x22d   : >>> { %v5643_v6 = vpop.f32.mrf.mxu0  ;;  %v5704_v45 = vpop.f32.mrf.mxu1 }
 0x22e   : >>> { %v5705_v36 = vadd.f32 %v5704_v45, %v5703_v10  ;;  %v2341_v10 = vadd.f32 %v5641_v58, %v9876_v19 }
 0x22f   : >>> { %v5871_v1 = vpop.f32.mrf.mxu0  ;;  %v5706_v40 = vpop.f32.mrf.mxu1 }
 0x230   : >>> { %v2487_v57 = vadd.f32 %v5871_v1, %v2390_v41  ;;  %v2438_v1 = vadd.f32 %v5705_v36, %v2341_v10 }
 0x231   : >>> { %v2478_v43 = vpop.f32.mrf.mxu0  ;;  %v5707_v63 = vpop.f32.mrf.mxu1 }
 0x232   : >>> { %v2543_v34 = vmax.f32 %v2487_v57, 0.0  ;;  %v2479_v24 = vadd.f32 %v2478_v43, %v2382_v26  ;;  %v2417_v26 = vadd.f32 %v5690_v2, %v2320_v29  ;;  %v5708_v61 = vadd.f32 %v5707_v63, %v5706_v40 }
 0x233   : >>> { %v5872_v20 = vpop.f32.mrf.mxu0  ;;  %v5879_v16 = vpop.f32.mrf.mxu1 }
 0x234   : >>> { %v5560_v37 = vpack.c.bf16 %v2543_v34, %v2543_v34  ;;  %v2541_v5 = vmax.f32 %v2479_v24, 0.0  ;;  %v2490_v21 = vadd.f32 %v5872_v20, %v2393_v35  ;;  %v2519_v28 = vadd.f32 %v5879_v16, %v2422_v3 }
 0x235   : >>> { %v2481_v50 = vpop.f32.mrf.mxu0  ;;  %v2510_v54 = vpop.f32.mrf.mxu1  ;;  %v2336_v34 = vadd.f32 %v5638_v39, %v9876_v19 }
 0x236   : >>> { %5216 = vst.msk [vmem:[%s7801_s20 + $0x24] sm:$0xf] %vm172_vm0, %v5560_v37  ;;  %v5558_v49 = vpack.c.bf16 %v2541_v5, %v2541_v5  ;;  %v2544_v53 = vmax.f32 %v2490_v21, 0.0  ;;  %v2482_v33 = vadd.f32 %v2481_v50, %v2385_v4  ;;  %v2551_v7 = vmax.f32 %v2519_v28, 0.0 }
 0x237   : >>> { %v2511_v38 = vadd.f32 %v2510_v54, %v2414_v30  ;;  %v5875_v13 = vpop.f32.mrf.mxu0  ;;  %v5880_v35 = vpop.f32.mrf.mxu1  ;;  %v5644_v4 = vadd.f32 %v5643_v6, %v7775_v18 }
 0x238   : >>> { %5214 = vst.msk [vmem:[%s7801_s20 + $0x14] sm:$0xf] %vm172_vm0, %v5558_v49  ;;  %v5561_v55 = vpack.c.bf16 %v2544_v53, %v2544_v53  ;;  %v2542_v31 = vmax.f32 %v2482_v33, 0.0  ;;  %v2503_v41 = vadd.f32 %v5875_v13, %v2406_v56  ;;  %v5568_v46 = vpack.c.bf16 %v2551_v7, %v2551_v7 }
 0x239   : >>> { %v2549_v14 = vmax.f32 %v2511_v38, 0.0  ;;  %v2522_v12 = vadd.f32 %v5880_v35, %v2425_v51  ;;  %v2494_v8 = vpop.f32.mrf.mxu0  ;;  %v2513_v62 = vpop.f32.mrf.mxu1  ;;  %v5702_v56 = vadd.f32 %v7771_v0, %v7764_v23  ;;  %v2344_v42 = vadd.f32 %v5644_v4, %v9876_v19 }
 0x23a   : >>> { %5217 = vst.msk [vmem:[%s7801_s20 + $0x28] sm:$0xf] %vm172_vm0, %v5561_v55  ;;  %v5559_v45 = vpack.c.bf16 %v2542_v31, %v2542_v31  ;;  %v2547_v59 = vmax.f32 %v2503_v41, 0.0  ;;  %v2495_v52 = vadd.f32 %v2494_v8, %v7784_v47  ;;  %5224 = vst.msk [vmem:[%s7801_s20 + $0x64] sm:$0xf] %vm172_vm0, %v5568_v46  ;;  %v2514_v18 = vadd.f32 %v2513_v62, %v2417_v26 }
 0x23b   : >>> { %v5566_v11 = vpack.c.bf16 %v2549_v14, %v2549_v14  ;;  %v2552_v57 = vmax.f32 %v2522_v12, 0.0  ;;  %v5876_v6 = vpop.f32.mrf.mxu0  ;;  %v5883_v15 = vpop.f32.mrf.mxu1  ;;  %v2441_v20 = vadd.f32 %v5708_v61, %v2344_v42  ;;  %v2433_v21 = vadd.f32 %v5702_v56, %v2336_v34 }
 0x23c   : >>> { %5215 = vst.msk [vmem:[%s7801_s20 + $0x18] sm:$0xf] %vm172_vm0, %v5559_v45  ;;  %v5564_v48 = vpack.c.bf16 %v2547_v59, %v2547_v59  ;;  %v2545_v2 = vmax.f32 %v2495_v52, 0.0  ;;  %v2506_v47 = vadd.f32 %v5876_v6, %v2409_v60  ;;  %v2550_v44 = vmax.f32 %v2514_v18, 0.0 }
 0x23d   : >>> { %5222 = vst.msk [vmem:[%s7801_s20 + $0x54] sm:$0xf] %vm172_vm0, %v5566_v11  ;;  %v5569_v40 = vpack.c.bf16 %v2552_v57, %v2552_v57  ;;  %v2535_v43 = vadd.f32 %v5883_v15, %v2438_v1  ;;  %v2497_v29 = vpop.f32.mrf.mxu0  ;;  %v2526_v24 = vpop.f32.mrf.mxu1 }
 0x23e   : >>> { %5220 = vst.msk [vmem:[%s7801_s20 + $0x44] sm:$0xf] %vm172_vm0, %v5564_v48  ;;  %v5562_v23 = vpack.c.bf16 %v2545_v2, %v2545_v2  ;;  %v2548_v0 = vmax.f32 %v2506_v47, 0.0  ;;  %v2498_v63 = vadd.f32 %v2497_v29, %v7786_v32  ;;  %v5567_v60 = vpack.c.bf16 %v2550_v44, %v2550_v44 }
 0x23f   : >>> { %5225 = vst.msk [vmem:[%s7801_s20 + $0x68] sm:$0xf] %vm172_vm0, %v5569_v40  ;;  %v2555_v27 = vmax.f32 %v2535_v43, 0.0  ;;  %v2527_v25 = vadd.f32 %v2526_v24, %v2430_v17  ;;  %v5884_v58 = vpop.f32.mrf.mxu1 }
 0x240   : >>> { %5218 = vst.msk [vmem:[%s7801_s20 + $0x34] sm:$0xf] %vm172_vm0, %v5562_v23  ;;  %v5565_v3 = vpack.c.bf16 %v2548_v0, %v2548_v0  ;;  %v2546_v30 = vmax.f32 %v2498_v63, 0.0  ;;  %5223 = vst.msk [vmem:[%s7801_s20 + $0x58] sm:$0xf] %vm172_vm0, %v5567_v60  ;;  %v2538_v5 = vadd.f32 %v5884_v58, %v2441_v20 }
 0x241   : >>> { %v5572_v32 = vpack.c.bf16 %v2555_v27, %v2555_v27  ;;  %v2553_v37 = vmax.f32 %v2527_v25, 0.0  ;;  %v2529_v22 = vpop.f32.mrf.mxu1 }
 0x242   : >>> { %5221 = vst.msk [vmem:[%s7801_s20 + $0x48] sm:$0xf] %vm172_vm0, %v5565_v3  ;;  %v5563_v16 = vpack.c.bf16 %v2546_v30, %v2546_v30  ;;  %v2556_v50 = vmax.f32 %v2538_v5, 0.0  ;;  %v2530_v51 = vadd.f32 %v2529_v22, %v2433_v21 }
 0x243   : >>> { %5228 = vst.msk [vmem:[%s7801_s20 + $0x84] sm:$0xf] %vm172_vm0, %v5572_v32  ;;  %v5570_v28 = vpack.c.bf16 %v2553_v37, %v2553_v37 }
 0x244   : >>> { %5219 = vst.msk [vmem:[%s7801_s20 + $0x38] sm:$0xf] %vm172_vm0, %v5563_v16  ;;  %v5573_v26 = vpack.c.bf16 %v2556_v50, %v2556_v50  ;;  %v2554_v36 = vmax.f32 %v2530_v51, 0.0  ;;  %423 = sbr.rel (!%p421_p5) target bundleno = 114 (0x72), region = 99 }
 0x245   : >>> { %5226 = vst.msk [vmem:[%s7801_s20 + $0x74] sm:$0xf] %vm172_vm0, %v5570_v28 }
 0x246   : >>> { %5229 = vst.msk [vmem:[%s7801_s20 + $0x88] sm:$0xf] %vm172_vm0, %v5573_v26  ;;  %v5571_v49 = vpack.c.bf16 %v2554_v36, %v2554_v36 }
 0x248   : >>> { %5227 = vst.msk [vmem:[%s7801_s20 + $0x78] sm:$0xf] %vm172_vm0, %v5571_v49 }
 0x249   : > { %333 = sbr.rel (!%p331_p6) target bundleno = 72 (0x48), region = 110  ;;  %v7854_v53 = vld [vmem:[%s9385_s1 + $0xa20] sm:$0xf] (%p331_p6)  ;;  %v7859_v33 = vld [vmem:[%s9385_s1 + $0xa24] sm:$0xf] (%p331_p6)  ;;  %s8216_s17 = smov (%p331_p6), 0  }
 0x24a   : > { %9879 = vst [vmem:[#allocation131_spill] sm:$0xff] (%p331_p6), %v7854_v53  ;;  %9880 = vst [vmem:[#allocation132_spill] sm:$0xff] (%p331_p6), %v7859_v33  ;;  %v7864_v54 = vld [vmem:[%s9385_s1 + $0xa28] sm:$0xf] (%p331_p6)  ;;  %v7869_v19 = vld [vmem:[%s9385_s1 + $0xa2c] sm:$0xf] (%p331_p6) }
 0x24b   : > { %9881 = vst [vmem:[#allocation133_spill] sm:$0xff] (%p331_p6), %v7864_v54  ;;  %9882 = vst [vmem:[#allocation134_spill] sm:$0xff] (%p331_p6), %v7869_v19  ;;  %v7874_v9 = vld [vmem:[%s9385_s1 + $0xa30] sm:$0xf] (%p331_p6)  ;;  %v7879_v39 = vld [vmem:[%s9385_s1 + $0xa34] sm:$0xf] (%p331_p6) }
 0x24c   : > { %9883 = vst [vmem:[#allocation135_spill] sm:$0xff] (%p331_p6), %v7874_v9  ;;  %9884 = vst [vmem:[#allocation136_spill] sm:$0xff] (%p331_p6), %v7879_v39  ;;  %v7884_v7 = vld [vmem:[%s9385_s1 + $0xa38] sm:$0xf] (%p331_p6)  ;;  %v7889_v38 = vld [vmem:[%s9385_s1 + $0xa3c] sm:$0xf] (%p331_p6) }
 0x24d   : > { %9885 = vst [vmem:[#allocation137_spill] sm:$0xff] (%p331_p6), %v7884_v7  ;;  %9886 = vst [vmem:[#allocation138_spill] sm:$0xff] (%p331_p6), %v7889_v38  ;;  %v7894_v13 = vld [vmem:[%s9385_s1 + $0xa40] sm:$0xf] (%p331_p6)  ;;  %v7899_v17 = vld [vmem:[%s9385_s1 + $0xa44] sm:$0xf] (%p331_p6) }
 0x24e   : > { %9887 = vst [vmem:[#allocation139_spill] sm:$0xff] %v7894_v13  ;;  %9888 = vst [vmem:[#allocation140_spill] sm:$0xff] %v7899_v17  ;;  %v7904_v10 = vld [vmem:[%s9385_s1 + $0xa48] sm:$0xf]  ;;  %v7909_v55 = vld [vmem:[%s9385_s1 + $0xa4c] sm:$0xf] }
 0x24f   : > { %9889 = vst [vmem:[#allocation141_spill] sm:$0xff] %v7904_v10  ;;  %9890 = vst [vmem:[#allocation142_spill] sm:$0xff] %v7909_v55  ;;  %v7914_v31 = vld [vmem:[%s9385_s1 + $0xa50] sm:$0xf]  ;;  %v7919_v41 = vld [vmem:[%s9385_s1 + $0xa54] sm:$0xf] }
 0x250   : > { %9891 = vst [vmem:[#allocation143_spill] sm:$0xff] %v7914_v31  ;;  %9892 = vst [vmem:[#allocation144_spill] sm:$0xff] %v7919_v41  ;;  %v7924_v35 = vld [vmem:[%s9385_s1 + $0xa58] sm:$0xf]  ;;  %v7929_v4 = vld [vmem:[%s9385_s1 + $0xa5c] sm:$0xf] }
 0x251   : > { %9893 = vst [vmem:[#allocation145_spill] sm:$0xff] %v7924_v35  ;;  %9894 = vst [vmem:[#allocation146_spill] sm:$0xff] %v7929_v4  ;;  %v7934_v46 = vld [vmem:[%s9385_s1 + $0xa60] sm:$0xf]  ;;  %v7939_v14 = vld [vmem:[%s9385_s1 + $0xa64] sm:$0xf] }
 0x252   : > { %9895 = vst [vmem:[#allocation147_spill] sm:$0xff] %v7934_v46  ;;  %9896 = vst [vmem:[#allocation148_spill] sm:$0xff] %v7939_v14  ;;  %v7944_v12 = vld [vmem:[%s9385_s1 + $0xa68] sm:$0xf]  ;;  %v7949_v8 = vld [vmem:[%s9385_s1 + $0xa6c] sm:$0xf] }
 0x253   : > { %9897 = vst [vmem:[#allocation149_spill] sm:$0xff] %v7944_v12  ;;  %9898 = vst [vmem:[#allocation150_spill] sm:$0xff] %v7949_v8  ;;  %v7954_v45 = vld [vmem:[%s9385_s1 + $0xa70] sm:$0xf]  ;;  %v7959_v59 = vld [vmem:[%s9385_s1 + $0xa74] sm:$0xf] }
 0x254   : > { %9899 = vst [vmem:[#allocation151_spill] sm:$0xff] %v7954_v45  ;;  %9900 = vst [vmem:[#allocation152_spill] sm:$0xff] %v7959_v59  ;;  %v7964_v52 = vld [vmem:[%s9385_s1 + $0xa78] sm:$0xf]  ;;  %v7969_v62 = vld [vmem:[%s9385_s1 + $0xa7c] sm:$0xf] }
 0x255   : > { %9901 = vst [vmem:[#allocation153_spill] sm:$0xff] %v7964_v52  ;;  %9902 = vst [vmem:[#allocation154_spill] sm:$0xff] %v7969_v62  ;;  %v7974_v1 = vld [vmem:[%s9385_s1 + $0xa80] sm:$0xf]  ;;  %v7979_v61 = vld [vmem:[%s9385_s1 + $0xa84] sm:$0xf] }
 0x256   : > { %9903 = vst [vmem:[#allocation155_spill] sm:$0xff] %v7974_v1  ;;  %9904 = vst [vmem:[#allocation156_spill] sm:$0xff] %v7979_v61  ;;  %v7984_v11 = vld [vmem:[%s9385_s1 + $0xa88] sm:$0xf]  ;;  %v7989_v57 = vld [vmem:[%s9385_s1 + $0xa8c] sm:$0xf] }
 0x257   : > { %9905 = vst [vmem:[#allocation157_spill] sm:$0xff] %v7984_v11  ;;  %9906 = vst [vmem:[#allocation158_spill] sm:$0xff] %v7989_v57  ;;  %v7994_v18 = vld [vmem:[%s9385_s1 + $0xa90] sm:$0xf]  ;;  %v7999_v6 = vld [vmem:[%s9385_s1 + $0xa94] sm:$0xf] }
 0x258   : > { %9907 = vst [vmem:[#allocation159_spill] sm:$0xff] %v7994_v18  ;;  %9908 = vst [vmem:[#allocation160_spill] sm:$0xff] %v7999_v6  ;;  %v8004_v56 = vld [vmem:[%s9385_s1 + $0xa98] sm:$0xf]  ;;  %v8009_v48 = vld [vmem:[%s9385_s1 + $0xa9c] sm:$0xf] }
 0x259   : > { %9909 = vst [vmem:[#allocation161_spill] sm:$0xff] %v8004_v56  ;;  %9910 = vst [vmem:[#allocation162_spill] sm:$0xff] %v8009_v48  ;;  %v8014_v2 = vld [vmem:[%s9385_s1 + $0xaa0] sm:$0xf]  ;;  %v8019_v47 = vld [vmem:[%s9385_s1 + $0xaa4] sm:$0xf] }
 0x25a   : > { %9911 = vst [vmem:[#allocation163_spill] sm:$0xff] %v8014_v2  ;;  %9912 = vst [vmem:[#allocation164_spill] sm:$0xff] %v8019_v47  ;;  %v8024_v15 = vld [vmem:[%s9385_s1 + $0xaa8] sm:$0xf]  ;;  %v8029_v42 = vld [vmem:[%s9385_s1 + $0xaac] sm:$0xf] }
 0x25b   : > { %9913 = vst [vmem:[#allocation165_spill] sm:$0xff] %v8024_v15  ;;  %9914 = vst [vmem:[#allocation166_spill] sm:$0xff] %v8029_v42  ;;  %v8034_v40 = vld [vmem:[%s9385_s1 + $0xab0] sm:$0xf]  ;;  %v8039_v44 = vld [vmem:[%s9385_s1 + $0xab4] sm:$0xf] }
 0x25c   : > { %9915 = vst [vmem:[#allocation167_spill] sm:$0xff] %v8034_v40  ;;  %9916 = vst [vmem:[#allocation168_spill] sm:$0xff] %v8039_v44  ;;  %v8044_v43 = vld [vmem:[%s9385_s1 + $0xab8] sm:$0xf]  ;;  %v8049_v29 = vld [vmem:[%s9385_s1 + $0xabc] sm:$0xf] }
 0x25d   : > { %9917 = vst [vmem:[#allocation169_spill] sm:$0xff] %v8044_v43  ;;  %9918 = vst [vmem:[#allocation170_spill] sm:$0xff] %v8049_v29  ;;  %v8054_v34 = vld [vmem:[%s9385_s1 + $0xac0] sm:$0xf]  ;;  %v8059_v23 = vld [vmem:[%s9385_s1 + $0xac4] sm:$0xf] }
 0x25e   : > { %9919 = vst [vmem:[#allocation171_spill] sm:$0xff] %v8054_v34  ;;  %9920 = vst [vmem:[#allocation172_spill] sm:$0xff] %v8059_v23  ;;  %v8064_v0 = vld [vmem:[%s9385_s1 + $0xac8] sm:$0xf]  ;;  %v8069_v63 = vld [vmem:[%s9385_s1 + $0xacc] sm:$0xf] }
 0x25f   : > { %9921 = vst [vmem:[#allocation173_spill] sm:$0xff] %v8064_v0  ;;  %9922 = vst [vmem:[#allocation174_spill] sm:$0xff] %v8069_v63  ;;  %v8074_v24 = vld [vmem:[%s9385_s1 + $0xad0] sm:$0xf]  ;;  %v8079_v60 = vld [vmem:[%s9385_s1 + $0xad4] sm:$0xf] }
 0x260   : > { %9923 = vst [vmem:[#allocation175_spill] sm:$0xff] %v8074_v24  ;;  %9924 = vst [vmem:[#allocation176_spill] sm:$0xff] %v8079_v60  ;;  %v8084_v27 = vld [vmem:[%s9385_s1 + $0xad8] sm:$0xf]  ;;  %v8089_v25 = vld [vmem:[%s9385_s1 + $0xadc] sm:$0xf] }
 0x261   : > { %9925 = vst [vmem:[#allocation177_spill] sm:$0xff] %v8084_v27  ;;  %9926 = vst [vmem:[#allocation178_spill] sm:$0xff] %v8089_v25  ;;  %v8094_v20 = vld [vmem:[%s9385_s1 + $0xae0] sm:$0xf]  ;;  %v8099_v3 = vld [vmem:[%s9385_s1 + $0xae4] sm:$0xf] }
 0x262   : > { %9927 = vst [vmem:[#allocation179_spill] sm:$0xff] %v8094_v20  ;;  %9928 = vst [vmem:[#allocation180_spill] sm:$0xff] %v8099_v3  ;;  %v8104_v30 = vld [vmem:[%s9385_s1 + $0xae8] sm:$0xf]  ;;  %v8109_v58 = vld [vmem:[%s9385_s1 + $0xaec] sm:$0xf] }
 0x263   : > { %9929 = vst [vmem:[#allocation181_spill] sm:$0xff] %v8104_v30  ;;  %9930 = vst [vmem:[#allocation182_spill] sm:$0xff] %v8109_v58  ;;  %v8114_v32 = vld [vmem:[%s9385_s1 + $0xaf0] sm:$0xf]  ;;  %v8119_v37 = vld [vmem:[%s9385_s1 + $0xaf4] sm:$0xf] }
 0x264   : > { %9931 = vst [vmem:[#allocation183_spill] sm:$0xff] %v8114_v32  ;;  %9932 = vst [vmem:[#allocation184_spill] sm:$0xff] %v8119_v37  ;;  %v8124_v5 = vld [vmem:[%s9385_s1 + $0xaf8] sm:$0xf]  ;;  %v8129_v21 = vld [vmem:[%s9385_s1 + $0xafc] sm:$0xf] }
 0x265   : > { %9933 = vst [vmem:[#allocation185_spill] sm:$0xff] %v8124_v5  ;;  %9934 = vst [vmem:[#allocation186_spill] sm:$0xff] %v8129_v21  ;;  %v8134_v16 = vld [vmem:[%s9385_s1 + $0xb00] sm:$0xf]  ;;  %v8139_v22 = vld [vmem:[%s9385_s1 + $0xb04] sm:$0xf] }
 0x266   : > { %9935 = vst [vmem:[#allocation187_spill] sm:$0xff] %v8134_v16  ;;  %9936 = vst [vmem:[#allocation188_spill] sm:$0xff] %v8139_v22  ;;  %v8144_v28 = vld [vmem:[%s9385_s1 + $0xb08] sm:$0xf]  ;;  %v8149_v50 = vld [vmem:[%s9385_s1 + $0xb0c] sm:$0xf] }
 0x267   : > { %9937 = vst [vmem:[#allocation189_spill] sm:$0xff] %v8144_v28  ;;  %9938 = vst [vmem:[#allocation190_spill] sm:$0xff] %v8149_v50  ;;  %v8154_v51 = vld [vmem:[%s9385_s1 + $0xb10] sm:$0xf]  ;;  %v8159_v26 = vld [vmem:[%s9385_s1 + $0xb14] sm:$0xf] }
 0x268   : > { %9939 = vst [vmem:[#allocation191_spill] sm:$0xff] %v8154_v51  ;;  %9940 = vst [vmem:[#allocation192_spill] sm:$0xff] %v8159_v26  ;;  %v8164_v36 = vld [vmem:[%s9385_s1 + $0xb18] sm:$0xf]  ;;  %v8169_v49 = vld [vmem:[%s9385_s1 + $0xb1c] sm:$0xf] }
 0x269   : > { %9941 = vst [vmem:[#allocation193_spill] sm:$0xff] %v8164_v36  ;;  %9942 = vst [vmem:[#allocation194_spill] sm:$0xff] %v8169_v49  ;;  %v8174_v53 = vld [vmem:[%s9385_s1 + $0xb20] sm:$0xf]  ;;  %v8179_v33 = vld [vmem:[%s9385_s1 + $0xb24] sm:$0xf] }
 0x26a   : > { %9943 = vst [vmem:[#allocation195_spill] sm:$0xff] %v8174_v53  ;;  %9944 = vst [vmem:[#allocation196_spill] sm:$0xff] %v8179_v33  ;;  %v8184_v46 = vld [vmem:[%s9385_s1 + $0xb28] sm:$0xf]  ;;  %v8189_v14 = vld [vmem:[%s9385_s1 + $0xb2c] sm:$0xf] }
 0x26b   : > { %9945 = vst [vmem:[#allocation197_spill] sm:$0xff] %v8184_v46  ;;  %9946 = vst [vmem:[#allocation198_spill] sm:$0xff] %v8189_v14  ;;  %v8194_v2 = vld [vmem:[%s9385_s1 + $0xb30] sm:$0xf]  ;;  %v8199_v53 = vld [vmem:[%s9385_s1 + $0xb34] sm:$0xf] }
 0x26c   : > { %9947 = vst [vmem:[#allocation199_spill] sm:$0xff] %v8194_v2  ;;  %9948 = vst [vmem:[#allocation200_spill] sm:$0xff] %v8199_v53  ;;  %v8204_v33 = vld [vmem:[%s9385_s1 + $0xb38] sm:$0xf]  ;;  %v8209_v46 = vld [vmem:[%s9385_s1 + $0xb3c] sm:$0xf] }
 0x26d   : > { %9949 = vst [vmem:[#allocation201_spill] sm:$0xff] %v8204_v33  ;;  %9950 = vst [vmem:[#allocation202_spill] sm:$0xff] %v8209_v46  ;;  %v8214_v14 = vld [vmem:[%s9386_s2 + $0x9] ss:$0 sm:$0xff] }
 0x26e   : > { %9951 = vst [vmem:[#allocation203_spill] sm:$0xff] %v8214_v14 }
 0x26f LB: >> { %v9954_v25 = vld [vmem:[#allocation178_spill] sm:$0xff]  ;;  %v9955_v27 = vld [vmem:[#allocation177_spill] sm:$0xff]  ;;  %v9960_v26 = vld [vmem:[#allocation192_spill] sm:$0xff]  ;;  %s5575_s18 = sshll.u32 %s6182_s17, 7  ;;  %s6186_s20 = smov 64   ;;  %s6182_s17 = sphi %s8216_s17, %s2721_s17  }
 0x270   : >> { %v9952_v49 = vld [vmem:[#allocation194_spill] sm:$0xff]  ;;  %v9953_v36 = vld [vmem:[#allocation193_spill] sm:$0xff]  ;;  %v5528_v53 = vcombine.low %v9955_v27, %v9954_v25  ;;  %v9961_v51 = vld [vmem:[#allocation191_spill] sm:$0xff]  ;;  %s8238_s19 = scalar_lea.vmem [#allocation2], %s5575_s18  ;;  %s9311_s21 = scalar_lea.vmem %s6409_s22, %s5575_s18 }
 0x271   : >> { %v5536_v2 = vcombine.low %v9953_v36, %v9952_v49  ;;  %v9956_v48 = vld [vmem:[#allocation162_spill] sm:$0xff]  ;;  %v9957_v56 = vld [vmem:[#allocation161_spill] sm:$0xff]  ;;  %v5535_v46 = vcombine.low %v9961_v51, %v9960_v26  ;;  %v9962_v6 = vld [vmem:[#allocation160_spill] sm:$0xff]  ;;  %s2721_s17 = sadd.s32 1, %s6182_s17  }
 0x272   : >> { %v5520_v33 = vcombine.low %v9957_v56, %v9956_v48  ;;  %v9958_v4 = vld [vmem:[#allocation146_spill] sm:$0xff]  ;;  %v9959_v35 = vld [vmem:[#allocation145_spill] sm:$0xff]  ;;  %v9963_v18 = vld [vmem:[#allocation159_spill] sm:$0xff]  ;;  %p2718_p7 = scmp.ge.s32.totalorder %s2721_s17, 2  }
 0x273   : >> { %v5512_v14 = vcombine.low %v9959_v35, %v9958_v4  ;;  %v5519_v47 = vcombine.low %v9963_v18, %v9962_v6  ;;  %5785 = vmatprep.subr.bf16.mxu1 %v5536_v2  ;;  %v9964_v60 = vld [vmem:[#allocation176_spill] sm:$0xff]  ;;  %v9965_v24 = vld [vmem:[#allocation175_spill] sm:$0xff]  ;;  %v5341_v6 = vld [vmem:[%s8238_s19 + $0x130] sm:$0x8] }
 0x274   : >> { %5721 = vmatprep.subr.bf16.mxu0 %v5520_v33  ;;  %5786 = vmatpush3.bf16.msra.mxu1 %v5528_v53  ;;  %v5527_v25 = vcombine.low %v9965_v24, %v9964_v60  ;;  %v8241_v4 = vld [vmem:[%s8238_s19 + $0x148] sm:$0xf]  ;;  %v9967_v31 = vld [vmem:[#allocation143_spill] sm:$0xff]  ;;  %v5343_v2 = vld [vmem:[%s8238_s19 + $0x138] sm:$0xf] }
 0x275   : >> { %5722 = vmatpush3.bf16.msra.mxu0 %v5512_v14  ;;  %5787 = vmatprep.subr.bf16.mxu1 %v5535_v46  ;;  %v9966_v41 = vld [vmem:[#allocation144_spill] sm:$0xff]  ;;  %v5443_v33 = vcombine.low %v8241_v4, %v8241_v4  ;;  %v5342_v14 = vld [vmem:[%s8238_s19 + $0x134] sm:$0xf]  ;;  %v9968_v50 = vld [vmem:[#allocation190_spill] sm:$0xff]  ;;  %v5441_v36 = vcombine.low %v5343_v2, %v5343_v2 }
 0x276   : >> { %5723 = vmatprep.subr.bf16.mxu0 %v5519_v47  ;;  %v5511_v53 = vcombine.low %v9967_v31, %v9966_v41  ;;  %v9969_v28 = vld [vmem:[#allocation189_spill] sm:$0xff]  ;;  %v9970_v57 = vld [vmem:[#allocation158_spill] sm:$0xff]  ;;  %v5440_v26 = vcombine.low %v5341_v6, %v5342_v14  ;;  %v8254_v27 = vcombine.low %v5342_v14, %v5343_v2  ;;  %v8258_v47 = vld [vmem:[%s8238_s19 + $0x144] sm:$0xf] }
 0x277   : >> { %v5534_v18 = vcombine.low %v9969_v28, %v9968_v50  ;;  %v9971_v11 = vld [vmem:[#allocation157_spill] sm:$0xff]  ;;  %v6060_v46 = vld [vmem:[%s8238_s19 + $0x13c] ss:$0 sps:$4 sm:$0x11]   ;;  %3104 = vrot.lane.b32.xlu1 %v5443_v33, %s6186_s20  ;;  %v8262_v31 = vld [vmem:[%s8238_s19 + $0x148] sm:$0xf] }
 0x278   : >> { %v5518_v24 = vcombine.low %v9971_v11, %v9970_v57  ;;  %v8265_v35 = vld [vmem:[%s8238_s19 + $0x124] sm:$0xf]  ;;  %5788 = vmatpush3.bf16.msra.mxu1 %v5527_v25  ;;  %v9972_v63 = vld [vmem:[#allocation174_spill] sm:$0xff]  ;;  %v9973_v0 = vld [vmem:[#allocation173_spill] sm:$0xff]  ;;  %3098 = vrot.lane.b32.xlu0 %v5440_v26, %s6186_s20  ;;  %v3226_v33 = vrot.slane %v8254_v27, 5  ;;  %v3227_v28 = vrot.slane %v6060_v46, 5  ;;  %v8277_v41 = vcombine.low %v8258_v47, %v8262_v31 }
 0x279   : >> { %v5526_v6 = vcombine.low %v9973_v0, %v9972_v63  ;;  %v9974_v55 = vld [vmem:[#allocation142_spill] sm:$0xff]  ;;  %v9975_v10 = vld [vmem:[#allocation141_spill] sm:$0xff]  ;;  %v9976_v22 = vld [vmem:[#allocation188_spill] sm:$0xff]  ;;  %5724 = vmatpush3.bf16.msra.mxu0 %v5511_v53  ;;  %5789 = vmatprep.subr.bf16.mxu1 %v5534_v18 }
 0x27a   : >> { %v5510_v14 = vcombine.low %v9975_v10, %v9974_v55  ;;  %v9977_v16 = vld [vmem:[#allocation187_spill] sm:$0xff]  ;;  %9978 = vst [vmem:[#allocation204_spill] sm:$0xff] %v8277_v41  ;;  %v8280_v25 = vld [vmem:[%s8238_s19 + $0x128] sm:$0xf]  ;;  %v8283_v48 = vld [vmem:[%s8238_s19 + $0x154] sm:$0xf]  ;;  %5725 = vmatprep.subr.bf16.mxu0 %v5518_v24  ;;  %v3228_v53 = vsel %vm713_vm1, %v3226_v33, %v3227_v28 }
 0x27b   : >> { %v5533_v11 = vcombine.low %v9977_v16, %v9976_v22  ;;  %v8287_v0 = vcombine.low %v8265_v35, %v8280_v25  ;;  %v8290_v10 = vld [vmem:[%s8238_s19 + $0x158] sm:$0xf]  ;;  %v8293_v26 = vld [vmem:[%s8238_s19 + $0x134] sm:$0xf]  ;;  %v9979_v23 = vld [vmem:[#allocation172_spill] sm:$0xff]  ;;  %v3355_v22 = vshrl.u32 %v8277_v41, 16  ;;  %3252 = vrot.lane.b32.xlu1 %v3228_v53, %s6186_s20 }
 0x27c   : >> { %v8296_v46 = vld [vmem:[%s8238_s19 + $0x138] sm:$0xf]  ;;  %v9980_v34 = vld [vmem:[#allocation171_spill] sm:$0xff]  ;;  %v9981_v61 = vld [vmem:[#allocation156_spill] sm:$0xff]  ;;  %v3358_v49 = vshll.u32 %v8277_v41, 16  ;;  %v8307_v50 = vcombine.low %v8283_v48, %v8290_v10  ;;  %5790 = vmatpush3.bf16.msra.mxu1 %v5526_v6  ;;  %3100 = vrot.lane.b32.xlu0 %v5441_v36, %s6186_s20 }
 0x27d   : >> { %v5525_v2 = vcombine.low %v9980_v34, %v9979_v23  ;;  %v9982_v1 = vld [vmem:[#allocation155_spill] sm:$0xff]  ;;  %v2906_v18 = vshrl.u32 %v8287_v0, 16  ;;  %v2909_v24 = vshll.u32 %v8287_v0, 16  ;;  %v9984_v17 = vld [vmem:[#allocation140_spill] sm:$0xff]  ;;  %v3357_v34 = vrot.slane %v3355_v22, 4  ;;  %5726 = vmatpush3.bf16.msra.mxu0 %v5510_v14  ;;  %5791 = vmatprep.subr.bf16.mxu1 %v5533_v11  ;;  %v9986_v21 = vld [vmem:[#allocation186_spill] sm:$0xff] }
 0x27e   : >> { %v5517_v16 = vcombine.low %v9982_v1, %v9981_v61  ;;  %9983 = vst [vmem:[#allocation205_spill] sm:$0xff] %v8307_v50  ;;  %v8314_v1 = vcombine.low %v8293_v26, %v8296_v46  ;;  %v9985_v13 = vld [vmem:[#allocation139_spill] sm:$0xff]  ;;  %v3360_v51 = vrot.slane %v3358_v49, 5  ;;  %v3363_v53 = vshrl.u32 %v8307_v50, 16  ;;  %v9987_v5 = vld [vmem:[#allocation185_spill] sm:$0xff]  ;;  %v9988_v62 = vld [vmem:[#allocation154_spill] sm:$0xff] }
 0x27f   : >> { %v5509_v28 = vcombine.low %v9985_v13, %v9984_v17  ;;  %v5345_v23 = vld [vmem:[%s8238_s19 + $0x144] sm:$0xf]  ;;  %v3366_v55 = vshll.u32 %v8307_v50, 16  ;;  %v5344_v56 = vld [vmem:[%s8238_s19 + $0x140] sm:$0x8]  ;;  %v2908_v57 = vrot.slane %v2906_v18, 4  ;;  %v5532_v22 = vcombine.low %v9987_v5, %v9986_v21 }
 0x280   : >> { %v2911_v60 = vrot.slane %v2909_v24, 5  ;;  %v2914_v61 = vshrl.u32 %v8314_v1, 16  ;;  %v2917_v6 = vshll.u32 %v8314_v1, 16  ;;  %5727 = vmatprep.subr.bf16.mxu0 %v5517_v16  ;;  %v3361_v13 = vor.u32 %v3360_v51, %v3357_v34  ;;  %v9989_v52 = vld [vmem:[#allocation153_spill] sm:$0xff]  ;;  %5792 = vmatpush3.bf16.msra.mxu1 %v5525_v2  ;;  %v9990_v29 = vld [vmem:[#allocation170_spill] sm:$0xff]  ;;  %v9996_v37 = vld [vmem:[#allocation184_spill] sm:$0xff] }
 0x281   : >> { %v5516_v36 = vcombine.low %v9989_v52, %v9988_v62  ;;  %v3365_v49 = vrot.slane %v3363_v53, 4  ;;  %v3368_v14 = vrot.slane %v3366_v55, 5  ;;  %v6067_v18 = vld [vmem:[%s8238_s19 + $0x14c] ss:$0 sps:$4 sm:$0x11]   ;;  %v9991_v43 = vld [vmem:[#allocation169_spill] sm:$0xff]  ;;  %3250 = vrot.lane.b32.xlu0 %v3226_v33, %s6186_s20  ;;  %v5442_v11 = vcombine.low %v5344_v56, %v5345_v23  ;;  %5728 = vmatpush3.bf16.msra.mxu0 %v5509_v28 }
 0x282   : >> { %v5524_v24 = vcombine.low %v9991_v43, %v9990_v29  ;;  %3418 = vrot.lane.b32.xlu1 %v3361_v13, %s6186_s20  ;;  %v2912_v34 = vor.u32 %v2911_v60, %v2908_v57  ;;  %v2916_v16 = vrot.slane %v2914_v61, 4  ;;  %v2919_v51 = vrot.slane %v2917_v6, 5  ;;  %v8335_v5 = vld [vmem:[%s8238_s19 + $0x164] sm:$0xf]  ;;  %v8341_v53 = vld [vmem:[%s8238_s19 + $0x168] sm:$0xf]  ;;  %5793 = vmatprep.subr.bf16.mxu1 %v5532_v22 }
 0x283   : >> { %v8338_v17 = vcombine.low %v5345_v23, %v8241_v4  ;;  %9992 = vst [vmem:[#allocation206_spill] sm:$0xff] %v8341_v53  ;;  %v8344_v55 = vld [vmem:[%s8238_s19 + $0x144] sm:$0xf]  ;;  %v8347_v2 = vld [vmem:[%s8238_s19 + $0x148] sm:$0xf]  ;;  %v9994_v38 = vld [vmem:[#allocation138_spill] sm:$0xff]  ;;  %5729 = vmatprep.subr.bf16.mxu0 %v5516_v36  ;;  %v3369_v4 = vor.u32 %v3368_v14, %v3365_v49  ;;  %v8361_v60 = vcombine.low %v8335_v5, %v8341_v53 }
 0x284   : >> { %9993 = vst [vmem:[#allocation207_spill] sm:$0xff] %v8347_v2  ;;  %v9995_v7 = vld [vmem:[#allocation137_spill] sm:$0xff]  ;;  %v9997_v32 = vld [vmem:[#allocation183_spill] sm:$0xff]  ;;  %v9998_v59 = vld [vmem:[#allocation152_spill] sm:$0xff]  ;;  %5794 = vmatpush3.bf16.msra.mxu1 %v5524_v24  ;;  %v2920_v23 = vor.u32 %v2919_v51, %v2916_v16  ;;  %v8365_v33 = vcombine.low %v8344_v55, %v8347_v2  ;;  %v3230_v6 = vrot.slane %v6067_v18, 5 }
 0x285   : >> { %v5508_v13 = vcombine.low %v9995_v7, %v9994_v38  ;;  %v5531_v57 = vcombine.low %v9997_v32, %v9996_v37  ;;  %v9999_v45 = vld [vmem:[#allocation151_spill] sm:$0xff]  ;;  %v10000_v44 = vld [vmem:[#allocation168_spill] sm:$0xff]  ;;  %3102 = vrot.lane.b32.xlu0 %v5442_v11, %s6186_s20  ;;  %10002 = vst [vmem:[#allocation208_spill] sm:$0xff] %v8361_v60  ;;  %v3229_v28 = vrot.slane %v8338_v17, 5  ;;  %v10005_v58 = vld [vmem:[#allocation182_spill] sm:$0xff]  ;;  %v3374_v16 = vshll.u32 %v8361_v60, 16 }
 0x286   : >> { %v5515_v61 = vcombine.low %v9999_v45, %v9998_v59  ;;  %v10001_v40 = vld [vmem:[#allocation167_spill] sm:$0xff]  ;;  %2969 = vrot.lane.b32.xlu1 %v2912_v34, %s6186_s20  ;;  %v10003_v39 = vld [vmem:[#allocation136_spill] sm:$0xff]  ;;  %v10006_v30 = vld [vmem:[#allocation181_spill] sm:$0xff]  ;;  %v3371_v34 = vshrl.u32 %v8361_v60, 16  ;;  %v2922_v51 = vshrl.u32 %v8365_v33, 16 }
 0x287   : >> { %v5523_v56 = vcombine.low %v10001_v40, %v10000_v44  ;;  %5730 = vmatpush3.bf16.msra.mxu0 %v5508_v13  ;;  %5795 = vmatprep.subr.bf16.mxu1 %v5531_v57  ;;  %v10004_v9 = vld [vmem:[#allocation135_spill] sm:$0xff]  ;;  %v5530_v36 = vcombine.low %v10006_v30, %v10005_v58  ;;  %v5347_v49 = vld [vmem:[%s8238_s19 + $0x150] sm:$0x8]  ;;  %v5348_v14 = vld [vmem:[%s8238_s19 + $0x154] sm:$0xf]  ;;  %v2925_v13 = vshll.u32 %v8365_v33, 16  ;;  %v3231_v57 = vsel %vm713_vm1, %v3229_v28, %v3230_v6 }
 0x288   : >> { %v5507_v22 = vcombine.low %v10004_v9, %v10003_v39  ;;  %5731 = vmatprep.subr.bf16.mxu0 %v5515_v61  ;;  %v10007_v42 = vld [vmem:[#allocation166_spill] sm:$0xff]  ;;  %v10008_v15 = vld [vmem:[#allocation165_spill] sm:$0xff]  ;;  %v3373_v6 = vrot.slane %v3371_v34, 4  ;;  %v10018_v3 = vld [vmem:[#allocation180_spill] sm:$0xff] }
 0x289   : >> { %5796 = vmatpush3.bf16.msra.mxu1 %v5523_v56  ;;  %v5522_v24 = vcombine.low %v10008_v15, %v10007_v42  ;;  %v10009_v8 = vld [vmem:[#allocation150_spill] sm:$0xff]  ;;  %v10010_v12 = vld [vmem:[#allocation149_spill] sm:$0xff]  ;;  %3420 = vrot.lane.b32.xlu0 %v3369_v4, %s6186_s20  ;;  %v5444_v4 = vcombine.low %v5347_v49, %v5348_v14  ;;  %v10019_v20 = vld [vmem:[#allocation179_spill] sm:$0xff] }
 0x28a   : >> { %v5514_v11 = vcombine.low %v10010_v12, %v10009_v8  ;;  %2971 = vrot.lane.b32.xlu1 %v2920_v23, %s6186_s20  ;;  %v5349_v18 = vld [vmem:[%s8238_s19 + $0x158] sm:$0xf]  ;;  %5797 = vmatprep.subr.bf16.mxu1 %v5530_v36  ;;  %v10012_v54 = vld [vmem:[#allocation133_spill] sm:$0xff]  ;;  %v6073_v23 = vld [vmem:[%s8238_s19 + $0x15c] ss:$0 sps:$4 sm:$0x11]  }
 0x28b   : >> { %5732 = vmatpush3.bf16.msra.mxu0 %v5507_v22  ;;  %v10011_v19 = vld [vmem:[#allocation134_spill] sm:$0xff]  ;;  %v5445_v56 = vcombine.low %v5349_v18, %v5349_v18  ;;  %v8390_v7 = vld [vmem:[%s8238_s19 + $0x174] sm:$0xf]  ;;  %v3376_v8 = vrot.slane %v3374_v16, 5  ;;  %v2924_v22 = vrot.slane %v2922_v51, 4  ;;  %v2927_v36 = vrot.slane %v2925_v13, 5 }
 0x28c   : >> { %v5506_v61 = vcombine.low %v10012_v54, %v10011_v19  ;;  %5733 = vmatprep.subr.bf16.mxu0 %v5514_v11  ;;  %10013 = vst [vmem:[#allocation209_spill] sm:$0xff] %v8390_v7  ;;  %v8395_v9 = vld [vmem:[%s8238_s19 + $0x178] sm:$0xf]  ;;  %v8397_v11 = vcombine.low %v5348_v14, %v5349_v18  ;;  %v8400_v49 = vld [vmem:[%s8238_s19 + $0x154] sm:$0xf]  ;;  %v3233_v18 = vrot.slane %v6073_v23, 5  ;;  %v5529_v51 = vcombine.low %v10019_v20, %v10018_v3 }
 0x28d   : >> { %5798 = vmatpush3.bf16.msra.mxu1 %v5522_v24  ;;  %3254 = vrot.lane.b32.xlu0 %v3229_v28, %s6186_s20  ;;  %10014 = vst [vmem:[#allocation210_spill] sm:$0xff] %v8395_v9  ;;  %10015 = vst [vmem:[#allocation211_spill] sm:$0xff] %v8400_v49  ;;  %v8403_v12 = vld [vmem:[%s8238_s19 + $0x158] sm:$0xf]  ;;  %v8407_v28 = vcombine.low %v8390_v7, %v8395_v9  ;;  %v3377_v24 = vor.u32 %v3376_v8, %v3373_v6  ;;  %v5350_v13 = vld [vmem:[%s8238_s19 + $0x160] sm:$0x8] }
 0x28e   : >> { %3256 = vrot.lane.b32.xlu1 %v3231_v57, %s6186_s20  ;;  %10016 = vst [vmem:[#allocation212_spill] sm:$0xff] %v8403_v12  ;;  %v2928_v34 = vor.u32 %v2927_v36, %v2924_v22  ;;  %v8413_v16 = vcombine.low %v8400_v49, %v8403_v12  ;;  %v3232_v14 = vrot.slane %v8397_v11, 5  ;;  %v5351_v57 = vld [vmem:[%s8238_s19 + $0x164] sm:$0xf]  ;;  %5799 = vmatprep.subr.bf16.mxu1 %v5529_v51  ;;  %v10020_v22 = vld [vmem:[#allocation164_spill] sm:$0xff]  ;;  %v10096_v49 = vld [vmem:[#allocation208_spill] sm:$0xff] }
 0x28f   : >> { %5734 = vmatpush3.bf16.msra.mxu0 %v5506_v61  ;;  %10017 = vst [vmem:[#allocation213_spill] sm:$0xff] %v8407_v28  ;;  %v5352_v61 = vld [vmem:[%s8238_s19 + $0x168] sm:$0xf]  ;;  %v3379_v8 = vshrl.u32 %v8407_v28, 16  ;;  %v10021_v36 = vld [vmem:[#allocation163_spill] sm:$0xff]  ;;  %v5446_v3 = vcombine.low %v5350_v13, %v5351_v57 }
 0x290   : >> { %v2933_v23 = vshll.u32 %v8413_v16, 16  ;;  %v3234_v6 = vsel %vm713_vm1, %v3232_v14, %v3233_v18  ;;  %v5521_v51 = vcombine.low %v10021_v36, %v10020_v22  ;;  %v6079_v15 = vld [vmem:[%s8238_s19 + $0x16c] ss:$0 sps:$4 sm:$0x11]   ;;  %v8437_v30 = vld [vmem:[%s8238_s19 + $0x188] sm:$0xf]  ;;  %v8439_v18 = vcombine.low %v5351_v57, %v5352_v61 }
 0x291   : >> { %3106 = vrot.lane.b32.xlu0 %v5444_v4, %s6186_s20  ;;  %v3382_v4 = vshll.u32 %v8407_v28, 16  ;;  %v3381_v19 = vrot.slane %v3379_v8, 4  ;;  %10023 = vst [vmem:[#allocation215_spill] sm:$0xff] %v8437_v30  ;;  %v8442_v22 = vld [vmem:[%s8238_s19 + $0x164] sm:$0xf]  ;;  %v10030_v37 = vld [vmem:[#allocation132_spill] sm:$0xff] }
 0x292   : >> { %3108 = vrot.lane.b32.xlu1 %v5445_v56, %s6186_s20  ;;  %v2930_v56 = vshrl.u32 %v8413_v16, 16  ;;  %v2935_v29 = vrot.slane %v2933_v23, 5  ;;  %10024 = vst [vmem:[#allocation216_spill] sm:$0xff] %v8442_v22  ;;  %v8445_v13 = vld [vmem:[%s8238_s19 + $0x168] sm:$0xf]  ;;  %5800 = vmatpush3.bf16.msra.mxu1 %v5521_v51 }
 0x293   : >> { %v3384_v20 = vrot.slane %v3382_v4, 5  ;;  %10025 = vst [vmem:[#allocation217_spill] sm:$0xff] %v8445_v13  ;;  %v8455_v57 = vcombine.low %v8442_v22, %v8445_v13  ;;  %v10028_v23 = vld [vmem:[#allocation148_spill] sm:$0xff]  ;;  %v5353_v51 = vld [vmem:[%s8238_s19 + $0x170] sm:$0x8] }
 0x294   : >> { %v2932_v21 = vrot.slane %v2930_v56, 4  ;;  %v3236_v56 = vrot.slane %v6079_v15, 5  ;;  %v5354_v32 = vld [vmem:[%s8238_s19 + $0x174] sm:$0xf]  ;;  %v8479_v42 = vld [vmem:[%s8238_s19 + $0x198] sm:$0xf] }
 0x295   : >> { %3422 = vrot.lane.b32.xlu0 %v3377_v24, %s6186_s20  ;;  %v5447_v24 = vcombine.low %v5352_v61, %v5352_v61  ;;  %v3385_v8 = vor.u32 %v3384_v20, %v3381_v19  ;;  %10027 = vst [vmem:[#allocation219_spill] sm:$0xff] %v8455_v57  ;;  %v3235_v61 = vrot.slane %v8439_v18, 5  ;;  %v5355_v19 = vld [vmem:[%s8238_s19 + $0x178] sm:$0xf]  ;;  %v2938_v15 = vshrl.u32 %v8455_v57, 16  ;;  %10033 = vst [vmem:[#allocation221_spill] sm:$0xff] %v8479_v42 }
 0x296   : >> { %2973 = vrot.lane.b32.xlu1 %v2928_v34, %s6186_s20  ;;  %v8432_v34 = vld [vmem:[%s8238_s19 + $0x184] sm:$0xf]  ;;  %v2936_v4 = vor.u32 %v2935_v29, %v2932_v21  ;;  %v2941_v21 = vshll.u32 %v8455_v57, 16  ;;  %v6091_v44 = vld [vmem:[%s8238_s19 + $0x18c] ss:$0 sps:$4 sm:$0x11]  }
 0x297   : >> { %10022 = vst [vmem:[#allocation214_spill] sm:$0xff] %v8432_v34  ;;  %v2940_v39 = vrot.slane %v2938_v15, 4  ;;  %v8518_v45 = vld [vmem:[%s8238_s19 + $0x1a4] sm:$0xf]  ;;  %v8523_v58 = vld [vmem:[%s8238_s19 + $0x1a8] sm:$0xf] }
 0x298   : >> { %v2943_v40 = vrot.slane %v2941_v21, 5  ;;  %10041 = vst [vmem:[#allocation227_spill] sm:$0xff] %v8518_v45  ;;  %10042 = vst [vmem:[#allocation228_spill] sm:$0xff] %v8523_v58  ;;  %v5361_v62 = vld [vmem:[%s8238_s19 + $0x198] sm:$0xf] }
 0x299   : >> { %3258 = vrot.lane.b32.xlu0 %v3232_v14, %s6186_s20  ;;  %v8449_v14 = vcombine.low %v8432_v34, %v8437_v30  ;;  %v5362_v41 = vld [vmem:[%s8238_s19 + $0x1a0] sm:$0x8]  ;;  %v8746_v9 = vld [vmem:[%s8238_s19 + $0x190] sm:$0x8] }
 0x29a   : >> { %3260 = vrot.lane.b32.xlu1 %v3234_v6, %s6186_s20  ;;  %v10029_v6 = vld [vmem:[#allocation147_spill] sm:$0xff]  ;;  %10060 = vst [vmem:[#allocation243_spill] sm:$0xff] %v8746_v9 }
 0x29b   : >> { %10026 = vst [vmem:[#allocation218_spill] sm:$0xff] %v8449_v14  ;;  %v5513_v36 = vcombine.low %v10029_v6, %v10028_v23  ;;  %v3387_v29 = vshrl.u32 %v8449_v14, 16  ;;  %v3390_v20 = vshll.u32 %v8449_v14, 16  ;;  %v6085_v23 = vld [vmem:[%s8238_s19 + $0x17c] ss:$0 sps:$4 sm:$0x11]  }
 0x29d   : >> { %3110 = vrot.lane.b32.xlu0 %v5446_v3, %s6186_s20  ;;  %v10031_v3 = vld [vmem:[#allocation131_spill] sm:$0xff]  ;;  %5735 = vmatprep.subr.bf16.mxu0 %v5513_v36  ;;  %v3389_v6 = vrot.slane %v3387_v29, 4  ;;  %v8487_v36 = vld [vmem:[%s8238_s19 + $0x178] sm:$0xf]  ;;  %v10038_v29 = vld [vmem:[#allocation201_spill] sm:$0xff] }
 0x29e   : >> { %3112 = vrot.lane.b32.xlu1 %v5447_v24, %s6186_s20  ;;  %v5505_v38 = vcombine.low %v10031_v3, %v10030_v37  ;;  %v3237_v24 = vsel %vm713_vm1, %v3235_v61, %v3236_v56  ;;  %v5448_v37 = vcombine.low %v5353_v51, %v5354_v32  ;;  %v3392_v3 = vrot.slane %v3390_v20, 5  ;;  %10035 = vst [vmem:[#allocation223_spill] sm:$0xff] %v8487_v36  ;;  %v10037_v51 = vld [vmem:[#allocation202_spill] sm:$0xff] }
 0x29f   : >> { %v8481_v56 = vcombine.low %v5354_v32, %v5355_v19  ;;  %v8495_v20 = vcombine.low %v10038_v29, %v10037_v51  ;;  %v2944_v32 = vor.u32 %v2943_v40, %v2940_v39  ;;  %v5356_v51 = vld [vmem:[%s8238_s19 + $0x180] sm:$0x8]  ;;  %v5357_v29 = vld [vmem:[%s8238_s19 + $0x184] sm:$0xf] }
 0x2a0   : >> { %5736 = vmatpush3.bf16.msra.mxu0 %v5505_v38  ;;  %v8484_v38 = vld [vmem:[%s8238_s19 + $0x174] sm:$0xf]  ;;  %v3393_v15 = vor.u32 %v3392_v3, %v3389_v6  ;;  %v5450_v3 = vcombine.low %v5356_v51, %v5357_v29  ;;  %v8531_v51 = vld [vmem:[%s8238_s19 + $0x188] sm:$0xf] }
 0x2a1   : >> { %3424 = vrot.lane.b32.xlu0 %v3385_v8, %s6186_s20  ;;  %v5449_v8 = vcombine.low %v5355_v19, %v5355_v19  ;;  %10034 = vst [vmem:[#allocation222_spill] sm:$0xff] %v8484_v38  ;;  %10039 = vst [vmem:[#allocation225_spill] sm:$0xff] %v8495_v20  ;;  %v8501_v19 = vcombine.low %v8484_v38, %v8487_v36  ;;  %v3238_v21 = vrot.slane %v8481_v56, 5  ;;  %5885 = vmatprep.subr.bf16.mxu0 %v8495_v20 }
 0x2a2   : >> { %2975 = vrot.lane.b32.xlu1 %v2936_v4, %s6186_s20  ;;  %v8474_v4 = vld [vmem:[%s8238_s19 + $0x194] sm:$0xf]  ;;  %5917 = vmatprep.subr.bf16.mxu1 %v8495_v20  ;;  %10044 = vst [vmem:[#allocation230_spill] sm:$0xff] %v8531_v51  ;;  %v3174_v2 = vshll.u32 %v8481_v56, 16 }
 0x2a3   : >> { %10032 = vst [vmem:[#allocation220_spill] sm:$0xff] %v8474_v4  ;;  %10040 = vst [vmem:[#allocation226_spill] sm:$0xff] %v8501_v19  ;;  %v2946_v40 = vshrl.u32 %v8501_v19, 16  ;;  %v10069_v13 = vrot.slane %v8501_v19, 5 }
 0x2a5   : >> { %3262 = vrot.lane.b32.xlu0 %v3235_v61, %s6186_s20  ;;  %v8491_v61 = vcombine.low %v8474_v4, %v8479_v42  ;;  %v2948_v52 = vrot.slane %v2946_v40, 4  ;;  %v3242_v40 = vrot.slane %v6091_v44, 5  ;;  %v8804_v42 = vld [vmem:[%s8238_s19 + $0x1a0] sm:$0x8] }
 0x2a6   : >> { %3264 = vrot.lane.b32.xlu1 %v3237_v24, %s6186_s20  ;;  %v3239_v24 = vrot.slane %v6085_v23, 5  ;;  %v2949_v23 = vshll.u32 %v8501_v19, 16  ;;  %10078 = vst [vmem:[#allocation251_spill] sm:$0xff] %v8804_v42 }
 0x2a7   : >> { %10036 = vst [vmem:[#allocation224_spill] sm:$0xff] %v8491_v61  ;;  %v3398_v39 = vshll.u32 %v8491_v61, 16 }
 0x2a8   : >> { %v3240_v6 = vsel %vm713_vm1, %v3238_v21, %v3239_v24  ;;  %v2951_v54 = vrot.slane %v2949_v23, 5  ;;  %v8528_v24 = vld [vmem:[%s8238_s19 + $0x184] sm:$0xf]  ;;  %v5359_v23 = vld [vmem:[%s8238_s19 + $0x190] sm:$0x8] }
 0x2a9   : >> { %3114 = vrot.lane.b32.xlu0 %v5448_v37, %s6186_s20  ;;  %v5358_v37 = vld [vmem:[%s8238_s19 + $0x188] sm:$0xf]  ;;  %10043 = vst [vmem:[#allocation229_spill] sm:$0xff] %v8528_v24 }
 0x2aa   : >> { %3116 = vrot.lane.b32.xlu1 %v5449_v8, %s6186_s20  ;;  %v3395_v8 = vshrl.u32 %v8491_v61, 16  ;;  %v5451_v43 = vcombine.low %v5358_v37, %v5358_v37  ;;  %v8525_v59 = vcombine.low %v5357_v29, %v5358_v37  ;;  %v8541_v29 = vcombine.low %v8528_v24, %v8531_v51  ;;  %v8574_v61 = vld [vmem:[%s8238_s19 + $0x1a4] sm:$0xf] }
 0x2ac   : >> { %10046 = vst [vmem:[#allocation232_spill] sm:$0xff] %v8541_v29  ;;  %v3241_v37 = vrot.slane %v8525_v59, 5  ;;  %v2957_v44 = vshll.u32 %v8541_v29, 16  ;;  %v10074_v19 = vrot.slane %v8541_v29, 5 }
 0x2ad   : >> { %3426 = vrot.lane.b32.xlu0 %v3393_v15, %s6186_s20  ;;  %v3397_v15 = vrot.slane %v3395_v8, 4 }
 0x2ae   : >> { %2977 = vrot.lane.b32.xlu1 %v2944_v32, %s6186_s20  ;;  %v3400_v32 = vrot.slane %v3398_v39, 5  ;;  %v2952_v39 = vor.u32 %v2951_v54, %v2948_v52  ;;  %v8553_v54 = vld [vmem:[%s8238_s19 + $0x1b8] sm:$0xf]  ;;  %v2954_v52 = vshrl.u32 %v8541_v29, 16  ;;  %v3243_v20 = vsel %vm713_vm1, %v3241_v37, %v3242_v40 }
 0x2af   : >> { %10048 = vst [vmem:[#allocation234_spill] sm:$0xff] %v8553_v54 }
 0x2b0   : >> { %v3401_v8 = vor.u32 %v3400_v32, %v3397_v15  ;;  %v8560_v15 = vld [vmem:[%s8238_s19 + $0x194] sm:$0xf]  ;;  %v8563_v32 = vld [vmem:[%s8238_s19 + $0x198] sm:$0xf] }
 0x2b1   : >> { %3266 = vrot.lane.b32.xlu0 %v3238_v21, %s6186_s20  ;;  %v8535_v21 = vcombine.low %v8518_v45, %v8523_v58  ;;  %10049 = vst [vmem:[#allocation235_spill] sm:$0xff] %v8560_v15  ;;  %10050 = vst [vmem:[#allocation236_spill] sm:$0xff] %v8563_v32  ;;  %v8578_v24 = vcombine.low %v8560_v15, %v8563_v32  ;;  %v3139_v32 = vshrl.u32 %v8254_v27, 16  ;;  %v3142_v15 = vshll.u32 %v8254_v27, 16  ;;  %v8617_v58 = vld [vmem:[%s8238_s19 + $0x140] sm:$0x8] }
 0x2b2   : >> { %3268 = vrot.lane.b32.xlu1 %v3240_v6, %s6186_s20  ;;  %v5360_v6 = vld [vmem:[%s8238_s19 + $0x194] sm:$0xf] }
 0x2b3   : >> { %10045 = vst [vmem:[#allocation231_spill] sm:$0xff] %v8535_v21  ;;  %v3403_v63 = vshrl.u32 %v8535_v21, 16  ;;  %v5452_v28 = vcombine.low %v5359_v23, %v5360_v6  ;;  %v8570_v60 = vcombine.low %v5360_v6, %v5361_v62  ;;  %10052 = vst [vmem:[#allocation238_spill] sm:$0xff] %v8578_v24  ;;  %v8583_v23 = vld [vmem:[%s8238_s19 + $0x1a8] sm:$0xf]  ;;  %v3141_v36 = vrot.slane %v3139_v32, 4 }
 0x2b4   : >> { %v6103_v6 = vld [vmem:[%s8238_s19 + $0x1ac] ss:$0 sps:$4 sm:$0x11]   ;;  %v3144_v51 = vrot.slane %v3142_v15, 5  ;;  %v8622_v32 = vld [vmem:[%s8238_s19 + $0x120] sm:$0x8] }
 0x2b5   : >> { %3118 = vrot.lane.b32.xlu0 %v5450_v3, %s6186_s20  ;;  %v8550_v3 = vld [vmem:[%s8238_s19 + $0x1b4] sm:$0xf]  ;;  %v3405_v40 = vrot.slane %v3403_v63, 4  ;;  %v6119_v15 = vld [vmem:[%s8238_s19 + $0x15c] ss:$0 sps:$4 sm:$0x11]  }
 0x2b6   : >> { %3120 = vrot.lane.b32.xlu1 %v5451_v43, %s6186_s20  ;;  %v3406_v43 = vshll.u32 %v8535_v21, 16  ;;  %10047 = vst [vmem:[#allocation233_spill] sm:$0xff] %v8550_v3  ;;  %v8568_v21 = vcombine.low %v8550_v3, %v8553_v54  ;;  %v2956_v3 = vrot.slane %v2954_v52, 4  ;;  %v2959_v54 = vrot.slane %v2957_v44, 5 }
 0x2b7   : >> { %v2962_v52 = vshrl.u32 %v8578_v24, 16  ;;  %v2965_v44 = vshll.u32 %v8578_v24, 16  ;;  %v9495_v24 = vrot.slane %v8287_v0, 5 }
 0x2b8   : >> { %10051 = vst [vmem:[#allocation237_spill] sm:$0xff] %v8568_v21  ;;  %v3408_v14 = vrot.slane %v3406_v43, 5  ;;  %v3414_v63 = vshll.u32 %v8568_v21, 16  ;;  %v3244_v43 = vrot.slane %v8570_v60, 5  ;;  %v2960_v50 = vor.u32 %v2959_v54, %v2956_v3 }
 0x2b9   : >> { %3428 = vrot.lane.b32.xlu0 %v3401_v8, %s6186_s20  ;;  %v5453_v8 = vcombine.low %v5361_v62, %v5361_v62  ;;  %v8587_v62 = vcombine.low %v8574_v61, %v8583_v23  ;;  %v5454_v54 = vcombine.low %v5362_v41, %v8574_v61  ;;  %v5455_v41 = vcombine.low %v8583_v23, %v8583_v23 }
 0x2ba   : >> { %2979 = vrot.lane.b32.xlu1 %v2952_v39, %s6186_s20  ;;  %v6097_v39 = vld [vmem:[%s8238_s19 + $0x19c] ss:$0 sps:$4 sm:$0x11]   ;;  %v3409_v45 = vor.u32 %v3408_v14, %v3405_v40  ;;  %v3248_v14 = vrot.slane %v6103_v6, 5  ;;  %v8614_v40 = vrot.slane %v2965_v44, 5  ;;  %v3150_v44 = vshll.u32 %v8338_v17, 16 }
 0x2bb   : >> { %v3245_v27 = vrot.slane %v6097_v39, 5  ;;  %v9496_v38 = vrot.slane %v8587_v62, 5  ;;  %v8612_v39 = vrot.slane %v2962_v52, 4  ;;  %v8637_v52 = vor.u32 %v3144_v51, %v3141_v36  ;;  %v10081_v29 = vld [vmem:[#allocation238_spill] sm:$0xff] }
 0x2bc   : >> { %v10053_v36 = vrot.slane %v8314_v1, 5 }
 0x2bd   : >> { %3270 = vrot.lane.b32.xlu0 %v3241_v37, %s6186_s20  ;;  %v3411_v37 = vshrl.u32 %v8568_v21, 16  ;;  %v6105_v21 = vld [vmem:[%s8238_s19 + $0x12c] ss:$0 sps:$4 sm:$0x11]   ;;  %v3246_v6 = vsel %vm713_vm1, %v3244_v43, %v3245_v27  ;;  %v8649_v23 = vsel %vm713_vm1, %v9496_v38, %v3248_v14  ;;  %v3158_v14 = vshll.u32 %v8397_v11, 16 }
 0x2be   : >> { %3272 = vrot.lane.b32.xlu1 %v3243_v20, %s6186_s20  ;;  %v6104_v20 = vld [vmem:[%s8238_s19 + $0x13c] ss:$0 sps:$4 sm:$0x11]   ;;  %v3011_v61 = vrot.slane %v6105_v21, 5  ;;  %v8694_v38 = vld [vmem:[%s8238_s19 + $0x150] sm:$0x8] }
 0x2bf   : >> { %v3014_v3 = vrot.slane %v6104_v20, 5  ;;  %v8635_v20 = vld [vmem:[%s8238_s19 + $0x130] sm:$0x8]  ;;  %v6114_v27 = vld [vmem:[%s8238_s19 + $0x14c] ss:$0 sps:$4 sm:$0x11]  }
 0x2c0   : >> { %10055 = vst [vmem:[#allocation240_spill] sm:$0xff] %v8694_v38  ;;  %v3464_v38 = vrot.slane %v10096_v49, 5 }
 0x2c1   : >> { %3122 = vrot.lane.b32.xlu0 %v5452_v28, %s6186_s20  ;;  %v8607_v28 = vrot.slane %v3411_v37, 4  ;;  %v8630_v37 = vld [vmem:[%s8238_s19 + $0x150] sm:$0x8]  ;;  %v8654_v51 = vsel %vm713_vm1, %v10053_v36, %v3014_v3  ;;  %v8673_v3 = vsel %vm713_vm1, %v9495_v24, %v3011_v61  ;;  %v3166_v61 = vshll.u32 %v8439_v18, 16 }
 0x2c2   : >> { %3124 = vrot.lane.b32.xlu1 %v5453_v8, %s6186_s20  ;;  %v8609_v8 = vrot.slane %v3414_v63, 5  ;;  %v8659_v63 = vld [vmem:[%s8238_s19 + $0x160] sm:$0x8]  ;;  %v3171_v24 = vshrl.u32 %v8481_v56, 16 }
 0x2c3   : >> { %v3168_v56 = vrot.slane %v3166_v61, 5 }
 0x2c4   : >> { %v3417_v21 = vor.u32 %v8609_v8, %v8607_v28  ;;  %v3155_v8 = vshrl.u32 %v8397_v11, 16  ;;  %v8680_v11 = vld [vmem:[%s8238_s19 + $0x140] sm:$0x8]  ;;  %v3152_v28 = vrot.slane %v3150_v44, 5  ;;  %v3173_v12 = vrot.slane %v3171_v24, 4 }
 0x2c5   : >> { %3430 = vrot.lane.b32.xlu0 %v3409_v45, %s6186_s20  ;;  %v3017_v45 = vrot.slane %v6114_v27, 5  ;;  %v3160_v27 = vrot.slane %v3158_v14, 5  ;;  %v8717_v14 = vld [vmem:[%s8238_s19 + $0x180] sm:$0x8]  ;;  %v10061_v24 = vrot.slane %v8455_v57, 5 }
 0x2c6   : >> { %2981 = vrot.lane.b32.xlu1 %v2960_v50, %s6186_s20  ;;  %v3147_v50 = vshrl.u32 %v8338_v17, 16  ;;  %v2968_v17 = vor.u32 %v8614_v40, %v8612_v39  ;;  %v8691_v40 = vld [vmem:[%s8238_s19 + $0x170] sm:$0x8]  ;;  %v3157_v44 = vrot.slane %v3155_v8, 4  ;;  %v3163_v39 = vshrl.u32 %v8439_v18, 16  ;;  %10057 = vst [vmem:[#allocation241_spill] sm:$0xff] %v8717_v14 }
 0x2c7   : >> { %10054 = vst [vmem:[#allocation239_spill] sm:$0xff] %v8691_v40  ;;  %v10056_v8 = vrot.slane %v8365_v33, 5  ;;  %v6129_v18 = vld [vmem:[%s8238_s19 + $0x17c] ss:$0 sps:$4 sm:$0x11]  }
 0x2c8   : >> { %v3149_v36 = vrot.slane %v3147_v50, 4  ;;  %v6147_v14 = vld [vmem:[%s8238_s19 + $0x19c] ss:$0 sps:$4 sm:$0x11]  }
 0x2c9   : >> { %3274 = vrot.lane.b32.xlu0 %v3244_v43, %s6186_s20  ;;  %v6124_v43 = vld [vmem:[%s8238_s19 + $0x16c] ss:$0 sps:$4 sm:$0x11]  }
 0x2ca   : >> { %3276 = vrot.lane.b32.xlu1 %v3246_v6, %s6186_s20  ;;  %v3020_v6 = vrot.slane %v6119_v15, 5  ;;  %v8705_v53 = vor.u32 %v3152_v28, %v3149_v36  ;;  %v8710_v15 = vsel %vm713_vm1, %v10056_v8, %v3017_v45  ;;  %v3179_v36 = vshrl.u32 %v8525_v59, 16  ;;  %v6134_v8 = vld [vmem:[%s8238_s19 + $0x18c] ss:$0 sps:$4 sm:$0x11]  }
 0x2cb   : >> { %v3182_v45 = vshll.u32 %v8525_v59, 16  ;;  %v3023_v7 = vrot.slane %v6124_v43, 5  ;;  %v3165_v28 = vrot.slane %v3163_v39, 4  ;;  %v8738_v59 = vld [vmem:[%s8238_s19 + $0x160] sm:$0x8]  ;;  %v3026_v43 = vrot.slane %v6129_v18, 5 }
 0x2cc   : >> { %10059 = vst [vmem:[#allocation242_spill] sm:$0xff] %v8738_v59  ;;  %v3029_v61 = vrot.slane %v6134_v8, 5  ;;  %v3190_v39 = vshll.u32 %v8570_v60, 16  ;;  %v10086_v59 = vld [vmem:[#allocation218_spill] sm:$0xff] }
 0x2cd   : >> { %3126 = vrot.lane.b32.xlu0 %v5454_v54, %s6186_s20  ;;  %v8727_v54 = vor.u32 %v3160_v27, %v3157_v44  ;;  %v3176_v44 = vrot.slane %v3174_v2, 5  ;;  %v8752_v2 = vsel %vm713_vm1, %v10061_v24, %v3023_v7  ;;  %v8759_v27 = vld [vmem:[%s8238_s19 + $0x170] sm:$0x8]  ;;  %v8767_v7 = vor.u32 %v3168_v56, %v3165_v28  ;;  %v10067_v24 = vld [vmem:[#allocation200_spill] sm:$0xff] }
 0x2ce   : >> { %3128 = vrot.lane.b32.xlu1 %v5455_v41, %s6186_s20  ;;  %v10058_v41 = vrot.slane %v8413_v16, 5  ;;  %10062 = vst [vmem:[#allocation244_spill] sm:$0xff] %v8752_v2  ;;  %10063 = vst [vmem:[#allocation245_spill] sm:$0xff] %v8759_v27  ;;  %v6145_v56 = vld [vmem:[%s8238_s19 + $0x15c] ss:$0 sps:$4 sm:$0x11]  }
 0x2cf   : >> { %10065 = vst [vmem:[#allocation246_spill] sm:$0xff] %v8767_v7  ;;  %v8769_v8 = vor.u32 %v3176_v44, %v3173_v12  ;;  %v6144_v44 = vld [vmem:[%s8238_s19 + $0x14c] ss:$0 sps:$4 sm:$0x11]   ;;  %v3462_v12 = vrot.slane %v6145_v56, 5  ;;  %v3470_v30 = vrot.slane %v10086_v59, 5 }
 0x2d0   : >> { %v8732_v50 = vsel %vm713_vm1, %v10058_v41, %v3020_v6  ;;  %v10068_v6 = vld [vmem:[#allocation199_spill] sm:$0xff]  ;;  %v6139_v41 = vld [vmem:[%s8238_s19 + $0x19c] ss:$0 sps:$4 sm:$0x11]   ;;  %v10089_v28 = vrot.slane %v10081_v29, 5 }
 0x2d1   : >> { %3432 = vrot.lane.b32.xlu0 %v3417_v21, %s6186_s20  ;;  %v3181_v21 = vrot.slane %v3179_v36, 4  ;;  %v3187_v36 = vshrl.u32 %v8570_v60, 16  ;;  %10066 = vst [vmem:[#allocation247_spill] sm:$0xff] %v8769_v8  ;;  %v8773_v18 = vcombine.low %v10068_v6, %v10067_v24  ;;  %v3192_v60 = vrot.slane %v3190_v39, 5  ;;  %v8812_v6 = vld [vmem:[%s8238_s19 + $0x180] sm:$0x8] }
 0x2d2   : >> { %2983 = vrot.lane.b32.xlu1 %v2968_v17, %s6186_s20  ;;  %v3184_v17 = vrot.slane %v3182_v45, 5  ;;  %v10064_v45 = vrot.slane %v8587_v62, 5  ;;  %v8837_v59 = vld [vmem:[%s8238_s19 + $0x1b0] sm:$0x8] }
 0x2d3   : >> { %v3189_v9 = vrot.slane %v3187_v36, 4 }
 0x2d4   : >> { %v8791_v24 = vor.u32 %v3184_v17, %v3181_v21  ;;  %v3459_v17 = vrot.slane %v6144_v44, 5 }
 0x2d5   : >> { %3278 = vrot.lane.b32.xlu0 %v10064_v45, %s6186_s20  ;;  %v8780_v45 = vsel %vm713_vm1, %v10069_v13, %v3026_v43  ;;  %v8796_v13 = vsel %vm713_vm1, %v10074_v19, %v3029_v61  ;;  %v10076_v43 = vld [vmem:[#allocation198_spill] sm:$0xff]  ;;  %v3032_v19 = vrot.slane %v6139_v41, 5  ;;  %v8825_v56 = vor.u32 %v3192_v60, %v3189_v9 }
 0x2d6   : >> { %3280 = vrot.lane.b32.xlu1 %v8649_v23, %s6186_s20  ;;  %10070 = vst [vmem:[#allocation248_spill] sm:$0xff] %v8780_v45  ;;  %10073 = vst [vmem:[#allocation249_spill] sm:$0xff] %v8791_v24  ;;  %v10077_v23 = vld [vmem:[#allocation197_spill] sm:$0xff]  ;;  %v10082_v61 = vld [vmem:[#allocation205_spill] sm:$0xff] }
 0x2d7   : >> { %10075 = vst [vmem:[#allocation250_spill] sm:$0xff] %v8796_v13  ;;  %v8800_v4 = vcombine.low %v10077_v23, %v10076_v43  ;;  %v10080_v45 = vld [vmem:[#allocation204_spill] sm:$0xff]  ;;  %v3461_v13 = vrot.slane %v10082_v61, 5  ;;  %v3195_v23 = vshrl.u32 %v8587_v62, 16  ;;  %v3198_v43 = vshll.u32 %v8587_v62, 16  ;;  %10088 = vst [vmem:[#allocation205_spill] sm:$0xff] %v8825_v56 }
 0x2d8   : >> { %v3458_v21 = vrot.slane %v10080_v45, 5  ;;  %10083 = vst [vmem:[#allocation204_spill] sm:$0xff] %v8812_v6  ;;  %v6146_v61 = vld [vmem:[%s8238_s19 + $0x18c] ss:$0 sps:$4 sm:$0x11]   ;;  %v8830_v36 = vsel %vm713_vm1, %v10089_v28, %v3032_v19  ;;  %v4024_v19 = vshll.u32 %v3470_v30, 16 }
 0x2d9   : >> { %v3790_v22 = vshrl.u32 %v3461_v13, 16  ;;  %10090 = vst [vmem:[#allocation218_spill] sm:$0xff] %v8830_v36  ;;  %v3200_v42 = vrot.slane %v3198_v43, 5  ;;  %v3793_v34 = vshll.u32 %v3461_v13, 16  ;;  %v3471_v60 = vrot.slane %v6146_v61, 5  ;;  %v10101_v43 = vld [vmem:[#allocation235_spill] sm:$0xff] }
 0x2da   : >> { %v3460_v27 = vsel %vm713_vm1, %v3458_v21, %v3459_v17  ;;  %v3713_v44 = vshrl.u32 %v3458_v21, 16  ;;  %v3716_v41 = vshll.u32 %v3458_v21, 16  ;;  %v3197_v21 = vrot.slane %v3195_v23, 4  ;;  %v6148_v61 = vld [vmem:[%s8238_s19 + $0x16c] ss:$0 sps:$4 sm:$0x11]  }
 0x2db   : >> { %v3721_v24 = vshrl.u32 %v3460_v27, 16  ;;  %v3724_v8 = vshll.u32 %v3460_v27, 16  ;;  %v3463_v27 = vsel %vm713_vm1, %v3461_v13, %v3462_v12  ;;  %v4021_v17 = vshrl.u32 %v3470_v30, 16  ;;  %v10093_v12 = vld [vmem:[#allocation224_spill] sm:$0xff] }
 0x2dc   : >> { %v3715_v2 = vrot.slane %v3713_v44, 3  ;;  %v3718_v9 = vrot.slane %v3716_v41, 4  ;;  %v8839_v28 = vrot.slane %v3790_v22, 3  ;;  %v3798_v36 = vshrl.u32 %v3463_v27, 16 }
 0x2dd   : >> { %v3723_v29 = vrot.slane %v3721_v24, 3  ;;  %v3726_v56 = vrot.slane %v3724_v8, 4  ;;  %v3801_v45 = vshll.u32 %v3463_v27, 16  ;;  %v3472_v23 = vsel %vm713_vm1, %v3470_v30, %v3471_v60  ;;  %v8850_v30 = vld [vmem:[%s8238_s19 + $0x190] sm:$0x8] }
 0x2de   : >> { %10092 = vst [vmem:[#allocation252_spill] sm:$0xff] %v8839_v28  ;;  %v3473_v13 = vrot.slane %v10093_v12, 5  ;;  %v4023_v44 = vrot.slane %v4021_v17, 3  ;;  %v4029_v62 = vshrl.u32 %v3472_v23, 16  ;;  %v4032_v41 = vshll.u32 %v3472_v23, 16 }
 0x2df   : >> { %v4026_v6 = vrot.slane %v4024_v19, 4  ;;  %v3474_v24 = vrot.slane %v6147_v14, 5  ;;  %v8846_v57 = vrot.slane %v3793_v34, 4  ;;  %v3719_v60 = vor.u32 %v3718_v9, %v3715_v2  ;;  %v10104_v9 = vld [vmem:[#allocation195_spill] sm:$0xff] }
 0x2e0   : >> { %v4098_v8 = vshrl.u32 %v3473_v13, 16  ;;  %v4101_v22 = vshll.u32 %v3473_v13, 16  ;;  %v4031_v7 = vrot.slane %v4029_v62, 3  ;;  %v4034_v27 = vrot.slane %v4032_v41, 4 }
 0x2e1   : >> { %10095 = vst [vmem:[#allocation224_spill] sm:$0xff] %v8846_v57  ;;  %v3727_v12 = vor.u32 %v3726_v56, %v3723_v29  ;;  %v8852_v40 = vrot.slane %v3798_v36, 3  ;;  %v3475_v17 = vsel %vm713_vm1, %v3473_v13, %v3474_v24  ;;  %v8855_v23 = vrot.slane %v3801_v45, 4  ;;  %v10102_v29 = vld [vmem:[#allocation236_spill] sm:$0xff]  ;;  %v10103_v56 = vld [vmem:[#allocation196_spill] sm:$0xff] }
 0x2e2   : >> { %v8857_v19 = vrot.slane %v4098_v8, 3  ;;  %v8859_v14 = vrot.slane %v4101_v22, 4  ;;  %v3465_v34 = vrot.slane %v6148_v61, 5  ;;  %v4027_v39 = vor.u32 %v4026_v6, %v4023_v44 }
 0x2e3   : >> { %10097 = vst [vmem:[#allocation208_spill] sm:$0xff] %v8852_v40  ;;  %10098 = vst [vmem:[#allocation253_spill] sm:$0xff] %v8855_v23  ;;  %v4035_v62 = vor.u32 %v4034_v27, %v4031_v7  ;;  %v4106_v41 = vshrl.u32 %v3475_v17, 16  ;;  %v4109_v49 = vshll.u32 %v3475_v17, 16  ;;  %v8867_v45 = vcombine.low %v10104_v9, %v10103_v56  ;;  %v10105_v56 = vld [vmem:[#allocation213_spill] sm:$0xff] }
 0x2e4   : >> { %10099 = vst [vmem:[#allocation254_spill] sm:$0xff] %v8857_v19  ;;  %10100 = vst [vmem:[#allocation255_spill] sm:$0xff] %v8859_v14  ;;  %v3867_v13 = vshrl.u32 %v3464_v38, 16  ;;  %v8869_v24 = vor.u32 %v3200_v42, %v3197_v21  ;;  %v8872_v61 = vsel %vm1355_vm3, %v3719_v60, %v3727_v12  ;;  %v3870_v6 = vshll.u32 %v3464_v38, 16 }
 0x2e5   : >> { %v3466_v27 = vsel %vm713_vm1, %v3464_v38, %v3465_v34  ;;  %v6149_v17 = vld [vmem:[%s8238_s19 + $0x17c] ss:$0 sps:$4 sm:$0x11]   ;;  %v8883_v42 = vrot.slane %v10105_v56, 5  ;;  %v8888_v12 = vsel %vm1355_vm3, %v4027_v39, %v4035_v62  ;;  %v8890_v9 = vrot.slane %v4106_v41, 3 }
 0x2e6   : >> { %10107 = vst [vmem:[#allocation236_spill] sm:$0xff] %v8888_v12  ;;  %v8892_v7 = vrot.slane %v4109_v49, 4  ;;  %v10109_v22 = vrot.slane %v8287_v0, 5  ;;  %v8897_v34 = vrot.slane %v3867_v13, 3  ;;  %v8899_v19 = vrot.slane %v3870_v6, 4 }
 0x2e7   : >> { %10106 = vst [vmem:[#allocation235_spill] sm:$0xff] %v8883_v42  ;;  %v3878_v41 = vshll.u32 %v3466_v27, 16  ;;  %v3468_v49 = vrot.slane %v6149_v17, 5  ;;  %v10112_v17 = vld [vmem:[#allocation231_spill] sm:$0xff] }
 0x2e8   : >> { %10108 = vst [vmem:[#allocation213_spill] sm:$0xff] %v8892_v7  ;;  %10110 = vst [vmem:[#allocation256_spill] sm:$0xff] %v8897_v34 }
 0x2e9   : >> { %v3105_v44 = vpop.permute.xlu1 %3104  ;;  %10111 = vst [vmem:[#allocation257_spill] sm:$0xff] %v8899_v19 }
 0x2ea   : >> { %v3534_v21 = vsel %vm1186_vm2, %v8654_v51, %v3105_v44  ;;  %v3099_v60 = vpop.permute.xlu0 %3098  ;;  %v3875_v51 = vshrl.u32 %v3466_v27, 16 }
 0x2eb   : >> { %v3751_v8 = vshrl.u32 %v3534_v21, 16  ;;  %v3754_v36 = vshll.u32 %v3534_v21, 16  ;;  %v3525_v38 = vsel %vm1186_vm2, %v10109_v22, %v3099_v60  ;;  %v8920_v21 = vrot.slane %v3878_v41, 4 }
 0x2ec   : >> { %v3667_v56 = vshrl.u32 %v3525_v38, 16  ;;  %v3670_v2 = vshll.u32 %v3525_v38, 16  ;;  %v8918_v13 = vrot.slane %v3875_v51, 3  ;;  %v10113_v51 = vcombine.low %v8617_v58, %v8258_v47 }
 0x2ed   : >> { %v8901_v44 = vrot.slane %v3751_v8, 3  ;;  %v8903_v39 = vrot.slane %v3754_v36, 4  ;;  %v3253_v62 = vpop.permute.xlu1 %3252 }
 0x2ee   : >> { %v3669_v14 = vrot.slane %v3667_v56, 3  ;;  %v3575_v0 = vsel %vm1186_vm2, %v8637_v52, %v3253_v62  ;;  %v3101_v22 = vpop.permute.xlu0 %3100  ;;  %v3672_v6 = vrot.slane %v3670_v2, 4  ;;  %v8914_v56 = vrot.slane %v10112_v17, 5 }
 0x2ef   : >> { %v3689_v60 = vshrl.u32 %v3575_v0, 16  ;;  %v3692_v38 = vshll.u32 %v3575_v0, 16  ;;  %v3528_v36 = vsel %vm1186_vm2, %v8673_v3, %v3101_v22  ;;  %v8924_v2 = vsel %vm713_vm1, %v8883_v42, %v3468_v49  ;;  %v8927_v3 = vld [vmem:[%s8238_s19 + $0x1ac] ss:$0 sps:$4 sm:$0x11]  }
 0x2f0   : >> { %v3674_v8 = vshrl.u32 %v3528_v36, 16  ;;  %v3677_v12 = vshll.u32 %v3528_v36, 16  ;;  %v10114_v62 = vcombine.low %v8262_v31, %v8262_v31  ;;  %v3673_v19 = vor.u32 %v3672_v6, %v3669_v14 }
 0x2f1   : >> { %v8929_v0 = vrot.slane %v3689_v60, 3  ;;  %v8931_v22 = vrot.slane %v3692_v38, 4  ;;  %v3477_v58 = vrot.slane %v8927_v3, 5  ;;  %v10115_v14 = vrot.slane %v8314_v1, 5 }
 0x2f2   : >> { %v3676_v36 = vrot.slane %v3674_v8, 3  ;;  %v3679_v17 = vrot.slane %v3677_v12, 4  ;;  %v10116_v6 = vcombine.low %v8622_v32, %v8265_v35 }
 0x2f3   : >> { %v3251_v34 = vpop.permute.xlu0 %3250 }
 0x2f4   : >> { %v3419_v27 = vpop.permute.xlu1 %3418  ;;  %v3573_v60 = vsel %vm1186_vm2, %v8637_v52, %v3251_v34  ;;  %v3680_v23 = vor.u32 %v3679_v17, %v3676_v36 }
 0x2f5   : >> { %v3613_v41 = vsel %vm1186_vm2, %v10113_v51, %v3419_v27  ;;  %v3615_v49 = vsel %vm1186_vm2, %v10114_v62, %v3419_v27  ;;  %v3682_v57 = vshrl.u32 %v3573_v60, 16  ;;  %v3685_v40 = vshll.u32 %v3573_v60, 16 }
 0x2f6   : >> { %v3697_v38 = vshrl.u32 %v3613_v41, 16  ;;  %v3700_v28 = vshll.u32 %v3613_v41, 16  ;;  %v3704_v8 = vshrl.u32 %v3615_v49, 16  ;;  %v3707_v12 = vshll.u32 %v3615_v49, 16 }
 0x2f7   : >> { %v3103_v7 = vpop.permute.xlu0 %3102  ;;  %v3695_v27 = vor.u32 %v8931_v22, %v8929_v0  ;;  %v3684_v52 = vrot.slane %v3682_v57, 3  ;;  %v3687_v0 = vrot.slane %v3685_v40, 4  ;;  %v3681_v1 = vsel %vm1355_vm3, %v3673_v19, %v3680_v23 }
 0x2f8   : >> { %v3699_v47 = vrot.slane %v3697_v38, 3  ;;  %v3702_v51 = vrot.slane %v3700_v28, 4  ;;  %v3706_v42 = vrot.slane %v3704_v8, 3  ;;  %v2970_v31 = vpop.permute.xlu1 %2969  ;;  %v3709_v62 = vrot.slane %v3707_v12, 4  ;;  %4578 = vmatprep.mubr.bf16.mxu0 %v3681_v1 }
 0x2f9   : >> { %v3531_v34 = vsel %vm1186_vm2, %v10115_v14, %v3103_v7  ;;  %v3485_v36 = vsel %vm1186_vm2, %v10116_v6, %v2970_v31  ;;  %v10117_v28 = vcombine.low %v8280_v25, %v8280_v25  ;;  %v10118_v25 = vcombine.low %v8630_v37, %v8283_v48 }
 0x2fa   : >> { %v3744_v17 = vshrl.u32 %v3531_v34, 16  ;;  %v3747_v41 = vshll.u32 %v3531_v34, 16  ;;  %v3652_v60 = vshrl.u32 %v3485_v36, 16  ;;  %v3655_v22 = vshll.u32 %v3485_v36, 16 }
 0x2fb   : >> { %v3487_v49 = vsel %vm1186_vm2, %v10117_v28, %v2970_v31  ;;  %v3421_v35 = vpop.permute.xlu0 %3420  ;;  %v3703_v6 = vor.u32 %v3702_v51, %v3699_v47  ;;  %v10119_v40 = vcombine.low %v8290_v10, %v8290_v10  ;;  %v10121_v48 = vcombine.low %v8296_v46, %v8296_v46 }
 0x2fc   : >> { %v3659_v57 = vshrl.u32 %v3487_v49, 16  ;;  %v3746_v38 = vrot.slane %v3744_v17, 3  ;;  %v3749_v7 = vrot.slane %v3747_v41, 4  ;;  %v3654_v8 = vrot.slane %v3652_v60, 3  ;;  %v2972_v32 = vpop.permute.xlu1 %2971 }
 0x2fd   : >> { %v3662_v12 = vshll.u32 %v3487_v49, 16  ;;  %v3657_v14 = vrot.slane %v3655_v22, 4  ;;  %v3618_v31 = vsel %vm1186_vm2, %v10118_v25, %v3421_v35  ;;  %v3620_v23 = vsel %vm1186_vm2, %v10119_v40, %v3421_v35 }
 0x2fe   : >> { %v3661_v34 = vrot.slane %v3659_v57, 3  ;;  %v3774_v19 = vshrl.u32 %v3618_v31, 16  ;;  %v3777_v36 = vshll.u32 %v3618_v31, 16  ;;  %v10120_v17 = vcombine.low %v8635_v20, %v8293_v26 }
 0x2ff   : >> { %v3781_v28 = vshrl.u32 %v3620_v23, 16  ;;  %v3784_v49 = vshll.u32 %v3620_v23, 16  ;;  %v3492_v37 = vsel %vm1186_vm2, %v10121_v48, %v2972_v32  ;;  %v3664_v51 = vrot.slane %v3662_v12, 4  ;;  %v3255_v57 = vpop.permute.xlu0 %3254 }
 0x300   : >> { %v3490_v41 = vsel %vm1186_vm2, %v10120_v17, %v2972_v32  ;;  %v3776_v60 = vrot.slane %v3774_v19, 3  ;;  %v3736_v22 = vshrl.u32 %v3492_v37, 16  ;;  %v3257_v1 = vpop.permute.xlu1 %3256  ;;  %v3779_v35 = vrot.slane %v3777_v36, 4 }
 0x301   : >> { %v3729_v47 = vshrl.u32 %v3490_v41, 16  ;;  %v3732_v10 = vshll.u32 %v3490_v41, 16  ;;  %v3783_v25 = vrot.slane %v3781_v28, 3  ;;  %v3786_v31 = vrot.slane %v3784_v49, 4 }
 0x302   : >> { %v3739_v26 = vshll.u32 %v3492_v37, 16  ;;  %v3710_v23 = vor.u32 %v3709_v62, %v3706_v42  ;;  %v3688_v17 = vor.u32 %v3687_v0, %v3684_v52  ;;  %v8978_v46 = vrot.slane %v3736_v22, 3 }
 0x303   : >> { %v8974_v20 = vrot.slane %v3729_v47, 3  ;;  %v8976_v40 = vrot.slane %v3732_v10, 4  ;;  %v3578_v12 = vsel %vm1186_vm2, %v8705_v53, %v3255_v57  ;;  %v3580_v32 = vsel %vm1186_vm2, %v8705_v53, %v3257_v1  ;;  %v3107_v48 = vpop.permute.xlu0 %3106 }
 0x304   : >> { %v3658_v19 = vor.u32 %v3657_v14, %v3654_v8  ;;  %v3711_v36 = vsel %vm1355_vm3, %v3703_v6, %v3710_v23  ;;  %v3696_v41 = vsel %vm1355_vm3, %v3688_v17, %v3695_v27  ;;  %v3759_v28 = vshrl.u32 %v3578_v12, 16  ;;  %v3109_v37 = vpop.permute.xlu1 %3108 }
 0x305   : >> { %v3762_v49 = vshll.u32 %v3578_v12, 16  ;;  %v8986_v47 = vrot.slane %v3739_v26, 4  ;;  %4675 = vmatprep.mubr.bf16.mxu1 %v3711_v36  ;;  %v3766_v42 = vshrl.u32 %v3580_v32, 16  ;;  %v3665_v62 = vor.u32 %v3664_v51, %v3661_v34 }
 0x306   : >> { %v3750_v52 = vor.u32 %v3749_v7, %v3746_v38  ;;  %4676 = vmatmul.mubr.bf16.vlgmr.msra.gmra.mxu1 %v3696_v41  ;;  %v8988_v0 = vrot.slane %v3759_v28, 3  ;;  %v3769_v10 = vshll.u32 %v3580_v32, 16  ;;  %v10122_v53 = vrot.slane %v8365_v33, 5  ;;  %v10124_v7 = vld [vmem:[#allocation225_spill] sm:$0xff] }
 0x307   : >> { %v3540_v27 = vsel %vm1186_vm2, %v8710_v15, %v3109_v37  ;;  %v3764_v14 = vrot.slane %v3762_v49, 4  ;;  %v3768_v6 = vrot.slane %v3766_v42, 3  ;;  %v3666_v22 = vsel %vm1355_vm3, %v3658_v19, %v3665_v62  ;;  %5921 = vmatpush3.bf16.msra.mxu1 %v10124_v7  ;;  %v3423_v26 = vpop.permute.xlu0 %3422  ;;  %v10129_v42 = vld [vmem:[#allocation207_spill] sm:$0xff] }
 0x308   : >> { %v3537_v8 = vsel %vm1186_vm2, %v10122_v53, %v3107_v48  ;;  %v10123_v57 = vor.u32 %v8903_v39, %v8901_v44  ;;  %4579 = vmatmul.mubr.bf16.vlgmr.msra.gmra.mxu0 %v3666_v22  ;;  %v3828_v33 = vshrl.u32 %v3540_v27, 16  ;;  %v3831_v1 = vshll.u32 %v3540_v27, 16  ;;  %v2974_v23 = vpop.permute.xlu1 %2973  ;;  %5918 = vmatprep.subr.bf16.mxu1 %v8773_v18  ;;  %v10126_v39 = vld [vmem:[#allocation206_spill] sm:$0xff] }
 0x309   : >> { %v3821_v34 = vshrl.u32 %v3537_v8, 16  ;;  %v3824_v51 = vshll.u32 %v3537_v8, 16  ;;  %v3780_v15 = vor.u32 %v3779_v35, %v3776_v60  ;;  %v3787_v17 = vor.u32 %v3786_v31, %v3783_v25  ;;  %5886 = vmatpush3.bf16.msra.mxu0 %v10124_v7 }
 0x30a   : >> { %v3758_v38 = vsel %vm1355_vm3, %v3750_v52, %v10123_v57  ;;  %v10125_v12 = vcombine.low %v8659_v63, %v8335_v5  ;;  %v10127_v32 = vcombine.low %v10126_v39, %v10126_v39  ;;  %v3771_v36 = vrot.slane %v3769_v10, 4  ;;  %5887 = vmatprep.subr.bf16.mxu0 %v8773_v18 }
 0x30b   : >> { %4586 = vmatprep.mubr.bf16.mxu0 %v3758_v38  ;;  %v3823_v41 = vrot.slane %v3821_v34, 3  ;;  %v3826_v28 = vrot.slane %v3824_v51, 4  ;;  %v3830_v49 = vrot.slane %v3828_v33, 3  ;;  %v3788_v48 = vsel %vm1355_vm3, %v3780_v15, %v3787_v17  ;;  %5922 = vmatpush3.bf16.msra.mxu1 %v8773_v18  ;;  %v3259_v10 = vpop.permute.xlu0 %3258 }
 0x30c   : >> { %v3623_v44 = vsel %vm1186_vm2, %v10125_v12, %v3423_v26  ;;  %v3625_v19 = vsel %vm1186_vm2, %v10127_v32, %v3423_v26  ;;  %v3833_v5 = vrot.slane %v3831_v1, 4  ;;  %4683 = vmatprep.mubr.bf16.mxu1 %v3788_v48  ;;  %v10128_v31 = vcombine.low %v8680_v11, %v8344_v55  ;;  %v3261_v53 = vpop.permute.xlu1 %3260  ;;  %5919 = vmatprep.subr.bf16.mxu1 %v8800_v4 }
 0x30d   : >> { %v3851_v60 = vshrl.u32 %v3623_v44, 16  ;;  %v3854_v35 = vshll.u32 %v3623_v44, 16  ;;  %v3858_v25 = vshrl.u32 %v3625_v19, 16  ;;  %v3861_v63 = vshll.u32 %v3625_v19, 16  ;;  %5888 = vmatpush3.bf16.msra.mxu0 %v8773_v18 }
 0x30e   : >> { %v3495_v37 = vsel %vm1186_vm2, %v10128_v31, %v2974_v23  ;;  %v10130_v62 = vcombine.low %v10129_v42, %v10129_v42  ;;  %v3735_v57 = vor.u32 %v8976_v40, %v8974_v20  ;;  %v3742_v51 = vor.u32 %v8986_v47, %v8978_v46  ;;  %5889 = vmatprep.subr.bf16.mxu0 %v8800_v4 }
 0x30f   : >> { %v9023_v8 = vrot.slane %v3851_v60, 3  ;;  %v9025_v27 = vrot.slane %v3854_v35, 4  ;;  %v3806_v22 = vshrl.u32 %v3495_v37, 16  ;;  %v9029_v55 = vrot.slane %v3858_v25, 3  ;;  %5923 = vmatpush3.bf16.msra.mxu1 %v8800_v4  ;;  %v3111_v15 = vpop.permute.xlu0 %3110 }
 0x310   : >> { %v3497_v52 = vsel %vm1186_vm2, %v10130_v62, %v2974_v23  ;;  %v3809_v11 = vshll.u32 %v3495_v37, 16  ;;  %v3863_v34 = vrot.slane %v3861_v63, 4  ;;  %v3765_v33 = vor.u32 %v3764_v14, %v8988_v0  ;;  %v3113_v17 = vpop.permute.xlu1 %3112  ;;  %5920 = vmatprep.subr.bf16.mxu1 %v8867_v45 }
 0x311   : >> { %v3813_v38 = vshrl.u32 %v3497_v52, 16  ;;  %v3816_v7 = vshll.u32 %v3497_v52, 16  ;;  %v3772_v1 = vor.u32 %v3771_v36, %v3768_v6  ;;  %v3808_v26 = vrot.slane %v3806_v22, 3  ;;  %5890 = vmatpush3.bf16.msra.mxu0 %v8800_v4 }
 0x312   : >> { %v3811_v20 = vrot.slane %v3809_v11, 4  ;;  %v3583_v23 = vsel %vm1186_vm2, %v8727_v54, %v3259_v10  ;;  %v3743_v18 = vsel %vm1355_vm3, %v3735_v57, %v3742_v51  ;;  %v3585_v6 = vsel %vm1186_vm2, %v8727_v54, %v3261_v53  ;;  %5891 = vmatprep.subr.bf16.mxu0 %v8867_v45  ;;  %v10132_v10 = vld [vmem:[#allocation239_spill] sm:$0xff]  ;;  %v10133_v53 = vld [vmem:[#allocation209_spill] sm:$0xff]  ;;  %v10135_v51 = vld [vmem:[#allocation210_spill] sm:$0xff] }
 0x313   : >> { %v3815_v40 = vrot.slane %v3813_v38, 3  ;;  %v3773_v46 = vsel %vm1355_vm3, %v3765_v33, %v3772_v1  ;;  %v3836_v47 = vshrl.u32 %v3583_v23, 16  ;;  %v3839_v0 = vshll.u32 %v3583_v23, 16  ;;  %4587 = vmatmul.mubr.bf16.gmra.mxu0 %v3743_v18  ;;  %5924 = vmatpush3.bf16.msra.mxu1 %v8867_v45  ;;  %v10138_v23 = vld [vmem:[#allocation211_spill] sm:$0xff]  ;;  %v10140_v18 = vld [vmem:[#allocation212_spill] sm:$0xff] }
 0x314   : >> { %v3818_v14 = vrot.slane %v3816_v7, 4  ;;  %4684 = vmatmul.mubr.bf16.gmra.mxu1 %v3773_v46  ;;  %v3827_v12 = vor.u32 %v3826_v28, %v3823_v41  ;;  %v3834_v44 = vor.u32 %v3833_v5, %v3830_v49  ;;  %v3843_v19 = vshrl.u32 %v3585_v6, 16  ;;  %v3425_v28 = vpop.permute.xlu0 %3424  ;;  %v2976_v49 = vpop.permute.xlu1 %2975 }
 0x315   : >> { %v9044_v39 = vrot.slane %v3836_v47, 3  ;;  %v3841_v32 = vrot.slane %v3839_v0, 4  ;;  %v3846_v36 = vshll.u32 %v3585_v6, 16  ;;  %v10131_v60 = vrot.slane %v8413_v16, 5  ;;  %5892 = vmatpush3.bf16.msra.mxu0 %v8867_v45  ;;  %v10137_v45 = vld [vmem:[#allocation240_spill] sm:$0xff] }
 0x316   : >> { %v3835_v48 = vsel %vm1355_vm3, %v3827_v12, %v3834_v44  ;;  %v3546_v54 = vsel %vm1186_vm2, %v8732_v50, %v3113_v17  ;;  %v3812_v41 = vor.u32 %v3811_v20, %v3808_v26  ;;  %v3845_v25 = vrot.slane %v3843_v19, 3 }
 0x317   : >> { %v3543_v35 = vsel %vm1186_vm2, %v10131_v60, %v3111_v15  ;;  %v3848_v5 = vrot.slane %v3846_v36, 4  ;;  %4594 = vmatprep.mubr.bf16.mxu0 %v3835_v48  ;;  %v3905_v31 = vshrl.u32 %v3546_v54, 16  ;;  %v3908_v37 = vshll.u32 %v3546_v54, 16 }
 0x318   : >> { %v3898_v4 = vshrl.u32 %v3543_v35, 16  ;;  %v3901_v63 = vshll.u32 %v3543_v35, 16  ;;  %v3819_v42 = vor.u32 %v3818_v14, %v3815_v40  ;;  %v3857_v16 = vor.u32 %v9025_v27, %v9023_v8  ;;  %v3263_v27 = vpop.permute.xlu0 %3262  ;;  %v3265_v1 = vpop.permute.xlu1 %3264 }
 0x319   : >> { %v3864_v50 = vor.u32 %v3863_v34, %v9029_v55  ;;  %v10134_v22 = vcombine.low %v10132_v10, %v10133_v53  ;;  %v3907_v11 = vrot.slane %v3905_v31, 3  ;;  %v3910_v38 = vrot.slane %v3908_v37, 4 }
 0x31a   : >> { %v3900_v62 = vrot.slane %v3898_v4, 3  ;;  %v3903_v52 = vrot.slane %v3901_v63, 4  ;;  %v3820_v7 = vsel %vm1355_vm3, %v3812_v41, %v3819_v42  ;;  %v10136_v33 = vcombine.low %v10135_v51, %v10135_v51  ;;  %v10142_v4 = vld [vmem:[#allocation246_spill] sm:$0xff] }
 0x31b   : >> { %v3628_v57 = vsel %vm1186_vm2, %v10134_v22, %v3425_v28  ;;  %v3865_v55 = vsel %vm1355_vm3, %v3857_v16, %v3864_v50  ;;  %4595 = vmatmul.mubr.bf16.gmra.mxu0 %v3820_v7  ;;  %v10139_v15 = vcombine.low %v10137_v45, %v10138_v23  ;;  %v10141_v46 = vcombine.low %v10140_v18, %v10140_v18  ;;  %v10146_v18 = vld [vmem:[#allocation241_spill] sm:$0xff] }
 0x31c   : >> { %v3630_v8 = vsel %vm1186_vm2, %v10136_v33, %v3425_v28  ;;  %v3928_v34 = vshrl.u32 %v3628_v57, 16  ;;  %v3931_v26 = vshll.u32 %v3628_v57, 16  ;;  %4691 = vmatprep.mubr.bf16.mxu1 %v3865_v55  ;;  %v3842_v0 = vor.u32 %v3841_v32, %v9044_v39  ;;  %v3115_v35 = vpop.permute.xlu0 %3114  ;;  %v3117_v54 = vpop.permute.xlu1 %3116 }
 0x31d   : >> { %v3935_v20 = vshrl.u32 %v3630_v8, 16  ;;  %v3938_v40 = vshll.u32 %v3630_v8, 16  ;;  %v3500_v17 = vsel %vm1186_vm2, %v10139_v15, %v2976_v49  ;;  %v3502_v47 = vsel %vm1186_vm2, %v10141_v46, %v2976_v49  ;;  %v10147_v46 = vld [vmem:[#allocation214_spill] sm:$0xff] }
 0x31e   : >> { %v3930_v14 = vrot.slane %v3928_v34, 3  ;;  %v3933_v6 = vrot.slane %v3931_v26, 4  ;;  %v3883_v44 = vshrl.u32 %v3500_v17, 16  ;;  %v3886_v36 = vshll.u32 %v3500_v17, 16 }
 0x31f   : >> { %v3937_v12 = vrot.slane %v3935_v20, 3  ;;  %v3940_v19 = vrot.slane %v3938_v40, 4  ;;  %v3890_v48 = vshrl.u32 %v3502_v47, 16  ;;  %v3893_v60 = vshll.u32 %v3502_v47, 16  ;;  %v10145_v20 = vld [vmem:[#allocation244_spill] sm:$0xff] }
 0x320   : >> { %v3885_v41 = vrot.slane %v3883_v44, 3  ;;  %v3849_v28 = vor.u32 %v3848_v5, %v3845_v25  ;;  %v3588_v63 = vsel %vm1186_vm2, %v10142_v4, %v3263_v27  ;;  %v3590_v49 = vsel %vm1186_vm2, %v10142_v4, %v3265_v1  ;;  %v10143_v25 = vld [vmem:[#allocation219_spill] sm:$0xff]  ;;  %v3427_v51 = vpop.permute.xlu0 %3426  ;;  %v2978_v33 = vpop.permute.xlu1 %2977 }
 0x321   : >> { %v3888_v31 = vrot.slane %v3886_v36, 4  ;;  %v3892_v39 = vrot.slane %v3890_v48, 3  ;;  %v3895_v32 = vrot.slane %v3893_v60, 4  ;;  %v3913_v37 = vshrl.u32 %v3588_v63, 16 }
 0x322   : >> { %v3850_v42 = vsel %vm1355_vm3, %v3842_v0, %v3849_v28  ;;  %v3916_v16 = vshll.u32 %v3588_v63, 16  ;;  %v3920_v50 = vshrl.u32 %v3590_v49, 16  ;;  %v3923_v10 = vshll.u32 %v3590_v49, 16  ;;  %v10151_v63 = vld [vmem:[#allocation242_spill] sm:$0xff]  ;;  %v10152_v49 = vld [vmem:[#allocation216_spill] sm:$0xff] }
 0x323   : >> { %4692 = vmatmul.mubr.bf16.gmra.mxu1 %v3850_v42  ;;  %v3915_v53 = vrot.slane %v3913_v37, 3  ;;  %v3904_v22 = vor.u32 %v3903_v52, %v3900_v62  ;;  %v3911_v57 = vor.u32 %v3910_v38, %v3907_v11  ;;  %v10144_v5 = vrot.slane %v10143_v25, 5 }
 0x324   : >> { %v3918_v8 = vrot.slane %v3916_v16, 4  ;;  %v3922_v27 = vrot.slane %v3920_v50, 3  ;;  %v3925_v1 = vrot.slane %v3923_v10, 4  ;;  %v3552_v40 = vsel %vm1186_vm2, %v10145_v20, %v3117_v54  ;;  %v3267_v44 = vpop.permute.xlu0 %3266  ;;  %v3269_v36 = vpop.permute.xlu1 %3268  ;;  %v10149_v54 = vld [vmem:[#allocation215_spill] sm:$0xff] }
 0x325   : >> { %v3549_v7 = vsel %vm1186_vm2, %v10144_v5, %v3115_v35  ;;  %v3912_v34 = vsel %vm1355_vm3, %v3904_v22, %v3911_v57  ;;  %v3889_v45 = vor.u32 %v3888_v31, %v3885_v41  ;;  %v3982_v52 = vshrl.u32 %v3552_v40, 16 }
 0x326   : >> { %v3975_v55 = vshrl.u32 %v3549_v7, 16  ;;  %v3978_v26 = vshll.u32 %v3549_v7, 16  ;;  %4602 = vmatprep.mubr.bf16.mxu0 %v3912_v34  ;;  %v3985_v11 = vshll.u32 %v3552_v40, 16  ;;  %v3896_v38 = vor.u32 %v3895_v32, %v3892_v39  ;;  %v10154_v32 = vld [vmem:[#allocation217_spill] sm:$0xff]  ;;  %v10156_v40 = vld [vmem:[#allocation247_spill] sm:$0xff] }
 0x327   : >> { %v3934_v15 = vor.u32 %v3933_v6, %v3930_v14  ;;  %v3941_v17 = vor.u32 %v3940_v19, %v3937_v12  ;;  %v10148_v47 = vcombine.low %v10146_v18, %v10147_v46  ;;  %v3984_v48 = vrot.slane %v3982_v52, 3 }
 0x328   : >> { %v3977_v62 = vrot.slane %v3975_v55, 3  ;;  %v3980_v23 = vrot.slane %v3978_v26, 4  ;;  %v3987_v60 = vrot.slane %v3985_v11, 4  ;;  %v3897_v35 = vsel %vm1355_vm3, %v3889_v45, %v3896_v38  ;;  %v3119_v25 = vpop.permute.xlu0 %3118  ;;  %v3121_v5 = vpop.permute.xlu1 %3120 }
 0x329   : >> { %v3633_v0 = vsel %vm1186_vm2, %v10148_v47, %v3427_v51  ;;  %v10150_v41 = vcombine.low %v10149_v54, %v10149_v54  ;;  %4603 = vmatmul.mubr.bf16.gmra.mxu0 %v3897_v35  ;;  %v3942_v14 = vsel %vm1355_vm3, %v3934_v15, %v3941_v17  ;;  %v10153_v31 = vcombine.low %v10151_v63, %v10152_v49  ;;  %v10157_v35 = vld [vmem:[#allocation226_spill] sm:$0xff] }
 0x32a   : >> { %v4005_v6 = vshrl.u32 %v3633_v0, 16  ;;  %v4008_v12 = vshll.u32 %v3633_v0, 16  ;;  %4699 = vmatprep.mubr.bf16.mxu1 %v3942_v14  ;;  %v10155_v37 = vcombine.low %v10154_v32, %v10154_v32  ;;  %v3919_v16 = vor.u32 %v3918_v8, %v3915_v53 }
 0x32b   : >> { %v3635_v28 = vsel %vm1186_vm2, %v10150_v41, %v3427_v51  ;;  %v3505_v39 = vsel %vm1186_vm2, %v10153_v31, %v2978_v33  ;;  %v3926_v20 = vor.u32 %v3925_v1, %v3922_v27  ;;  %v3593_v45 = vsel %vm1186_vm2, %v10156_v40, %v3267_v44 }
 0x32c   : >> { %v4012_v19 = vshrl.u32 %v3635_v28, 16  ;;  %v4015_v4 = vshll.u32 %v3635_v28, 16  ;;  %v3507_v42 = vsel %vm1186_vm2, %v10155_v37, %v2978_v33  ;;  %v4007_v50 = vrot.slane %v4005_v6, 3  ;;  %v3429_v46 = vpop.permute.xlu0 %3428  ;;  %v2980_v47 = vpop.permute.xlu1 %2979 }
 0x32d   : >> { %v4010_v10 = vrot.slane %v4008_v12, 4  ;;  %v3960_v57 = vshrl.u32 %v3505_v39, 16  ;;  %v3963_v51 = vshll.u32 %v3505_v39, 16  ;;  %v3967_v55 = vshrl.u32 %v3507_v42, 16 }
 0x32e   : >> { %v4014_v22 = vrot.slane %v4012_v19, 3  ;;  %v4017_v7 = vrot.slane %v4015_v4, 4  ;;  %v3970_v34 = vshll.u32 %v3507_v42, 16  ;;  %v3595_v52 = vsel %vm1186_vm2, %v10156_v40, %v3269_v36  ;;  %v10159_v19 = vld [vmem:[#allocation248_spill] sm:$0xff]  ;;  %v10160_v42 = vld [vmem:[#allocation243_spill] sm:$0xff] }
 0x32f   : >> { %v3962_v26 = vrot.slane %v3960_v57, 3  ;;  %v3965_v33 = vrot.slane %v3963_v51, 4  ;;  %v3969_v53 = vrot.slane %v3967_v55, 3  ;;  %v3990_v11 = vshrl.u32 %v3593_v45, 16 }
 0x330   : >> { %v3972_v8 = vrot.slane %v3970_v34, 4  ;;  %v3927_v38 = vsel %vm1355_vm3, %v3919_v16, %v3926_v20  ;;  %v3993_v15 = vshll.u32 %v3593_v45, 16  ;;  %v3997_v17 = vshrl.u32 %v3595_v52, 16  ;;  %v10161_v16 = vld [vmem:[#allocation220_spill] sm:$0xff]  ;;  %v10163_v34 = vld [vmem:[#allocation221_spill] sm:$0xff] }
 0x331   : >> { %v4000_v18 = vshll.u32 %v3595_v52, 16  ;;  %4700 = vmatmul.mubr.bf16.gmra.mxu1 %v3927_v38  ;;  %v3992_v0 = vrot.slane %v3990_v11, 3  ;;  %v3981_v27 = vor.u32 %v3980_v23, %v3977_v62  ;;  %v3988_v1 = vor.u32 %v3987_v60, %v3984_v48  ;;  %v3271_v48 = vpop.permute.xlu0 %3270  ;;  %v3273_v60 = vpop.permute.xlu1 %3272  ;;  %v10166_v52 = vld [vmem:[#allocation222_spill] sm:$0xff] }
 0x332   : >> { %v10158_v44 = vrot.slane %v10157_v35, 5  ;;  %v3995_v36 = vrot.slane %v3993_v15, 4  ;;  %v3999_v41 = vrot.slane %v3997_v17, 3  ;;  %v3558_v4 = vsel %vm1186_vm2, %v10159_v19, %v3121_v5 }
 0x333   : >> { %v4002_v28 = vrot.slane %v4000_v18, 4  ;;  %v3989_v6 = vsel %vm1355_vm3, %v3981_v27, %v3988_v1  ;;  %v3966_v63 = vor.u32 %v3965_v33, %v3962_v26  ;;  %v4059_v31 = vshrl.u32 %v3558_v4, 16 }
 0x334   : >> { %v3555_v54 = vsel %vm1186_vm2, %v10158_v44, %v3119_v25  ;;  %4610 = vmatprep.mubr.bf16.mxu0 %v3989_v6  ;;  %v4062_v62 = vshll.u32 %v3558_v4, 16  ;;  %v3973_v23 = vor.u32 %v3972_v8, %v3969_v53  ;;  %v4011_v32 = vor.u32 %v4010_v10, %v4007_v50  ;;  %v10168_v8 = vld [vmem:[#allocation223_spill] sm:$0xff]  ;;  %v10170_v4 = vld [vmem:[#allocation249_spill] sm:$0xff] }
 0x335   : >> { %v4052_v14 = vshrl.u32 %v3555_v54, 16  ;;  %v4055_v12 = vshll.u32 %v3555_v54, 16  ;;  %v4018_v37 = vor.u32 %v4017_v7, %v4014_v22  ;;  %v10162_v57 = vcombine.low %v10160_v42, %v10161_v16  ;;  %v10165_v7 = vld [vmem:[#allocation245_spill] sm:$0xff]  ;;  %v3123_v17 = vpop.permute.xlu0 %3122  ;;  %v3125_v18 = vpop.permute.xlu1 %3124 }
 0x336   : >> { %v4061_v51 = vrot.slane %v4059_v31, 3  ;;  %v4064_v55 = vrot.slane %v4062_v62, 4  ;;  %v3974_v5 = vsel %vm1355_vm3, %v3966_v63, %v3973_v23  ;;  %v10164_v26 = vcombine.low %v10163_v34, %v10163_v34 }
 0x337   : >> { %v4054_v49 = vrot.slane %v4052_v14, 3  ;;  %v4057_v39 = vrot.slane %v4055_v12, 4  ;;  %v3638_v25 = vsel %vm1186_vm2, %v10162_v57, %v3429_v46  ;;  %4611 = vmatmul.mubr.bf16.gmra.mxu0 %v3974_v5  ;;  %v4019_v40 = vsel %vm1355_vm3, %v4011_v32, %v4018_v37  ;;  %v10171_v5 = vld [vmem:[#allocation232_spill] sm:$0xff] }
 0x338   : >> { %v3640_v20 = vsel %vm1186_vm2, %v10164_v26, %v3429_v46  ;;  %v4082_v45 = vshrl.u32 %v3638_v25, 16  ;;  %v4085_v50 = vshll.u32 %v3638_v25, 16  ;;  %4707 = vmatprep.mubr.bf16.mxu1 %v4019_v40  ;;  %v10167_v33 = vcombine.low %v10165_v7, %v10166_v52 }
 0x339   : >> { %v4089_v10 = vshrl.u32 %v3640_v20, 16  ;;  %v4092_v22 = vshll.u32 %v3640_v20, 16  ;;  %v10169_v11 = vcombine.low %v10168_v8, %v10168_v8  ;;  %v3996_v15 = vor.u32 %v3995_v36, %v3992_v0  ;;  %v3431_v23 = vpop.permute.xlu0 %3430  ;;  %v2982_v32 = vpop.permute.xlu1 %2981 }
 0x33a   : >> { %v3510_v53 = vsel %vm1186_vm2, %v10167_v33, %v2980_v47  ;;  %v4084_v46 = vrot.slane %v4082_v45, 3  ;;  %v4087_v27 = vrot.slane %v4085_v50, 4  ;;  %v4003_v19 = vor.u32 %v4002_v28, %v3999_v41 }
 0x33b   : >> { %v3512_v38 = vsel %vm1186_vm2, %v10169_v11, %v2980_v47  ;;  %v4091_v1 = vrot.slane %v4089_v10, 3  ;;  %v4037_v35 = vshrl.u32 %v3510_v53, 16  ;;  %v4094_v44 = vrot.slane %v4092_v22, 4  ;;  %v10173_v10 = vld [vmem:[#allocation250_spill] sm:$0xff] }
 0x33c   : >> { %v4040_v54 = vshll.u32 %v3510_v53, 16  ;;  %v4044_v14 = vshrl.u32 %v3512_v38, 16  ;;  %v4047_v6 = vshll.u32 %v3512_v38, 16  ;;  %v3598_v63 = vsel %vm1186_vm2, %v10170_v4, %v3271_v48  ;;  %v10174_v38 = vld [vmem:[#allocation251_spill] sm:$0xff] }
 0x33d   : >> { %v4039_v12 = vrot.slane %v4037_v35, 3  ;;  %v3600_v31 = vsel %vm1186_vm2, %v10170_v4, %v3273_v60  ;;  %v4067_v62 = vshrl.u32 %v3598_v63, 16  ;;  %v4004_v37 = vsel %vm1355_vm3, %v3996_v15, %v4003_v19  ;;  %v3275_v52 = vpop.permute.xlu0 %3274  ;;  %v3277_v33 = vpop.permute.xlu1 %3276  ;;  %v10175_v15 = vld [vmem:[#allocation227_spill] sm:$0xff] }
 0x33e   : >> { %v4042_v47 = vrot.slane %v4040_v54, 4  ;;  %v4046_v0 = vrot.slane %v4044_v14, 3  ;;  %v4049_v36 = vrot.slane %v4047_v6, 4  ;;  %v4070_v42 = vshll.u32 %v3598_v63, 16  ;;  %4708 = vmatmul.mubr.bf16.gmra.mxu1 %v4004_v37  ;;  %v10177_v6 = vld [vmem:[#allocation228_spill] sm:$0xff] }
 0x33f   : >> { %v4074_v16 = vshrl.u32 %v3600_v31, 16  ;;  %v4077_v57 = vshll.u32 %v3600_v31, 16  ;;  %v4069_v25 = vrot.slane %v4067_v62, 3  ;;  %v4058_v41 = vor.u32 %v4057_v39, %v4054_v49  ;;  %v10180_v31 = vld [vmem:[#allocation229_spill] sm:$0xff] }
 0x340   : >> { %v4065_v28 = vor.u32 %v4064_v55, %v4061_v51  ;;  %v10172_v48 = vrot.slane %v10171_v5, 5  ;;  %v4072_v60 = vrot.slane %v4070_v42, 4  ;;  %v3564_v22 = vsel %vm1186_vm2, %v10173_v10, %v3125_v18 }
 0x341   : >> { %v4076_v26 = vrot.slane %v4074_v16, 3  ;;  %v4079_v20 = vrot.slane %v4077_v57, 4  ;;  %v4043_v7 = vor.u32 %v4042_v47, %v4039_v12  ;;  %v4136_v39 = vshrl.u32 %v3564_v22, 16  ;;  %v3129_v5 = vpop.permute.xlu1 %3128 }
 0x342   : >> { %v3561_v34 = vsel %vm1186_vm2, %v10172_v48, %v3123_v17  ;;  %v4066_v45 = vsel %vm1355_vm3, %v4058_v41, %v4065_v28  ;;  %v4139_v51 = vshll.u32 %v3564_v22, 16  ;;  %v4050_v55 = vor.u32 %v4049_v36, %v4046_v0  ;;  %v10182_v36 = vld [vmem:[#allocation230_spill] sm:$0xff]  ;;  %v3127_v28 = vpop.permute.xlu0 %3126  ;;  %v10184_v22 = vld [vmem:[#allocation205_spill] sm:$0xff] }
 0x343   : >> { %v4129_v40 = vshrl.u32 %v3561_v34, 16  ;;  %v4132_v50 = vshll.u32 %v3561_v34, 16  ;;  %4618 = vmatprep.mubr.bf16.mxu0 %v4066_v45  ;;  %v4088_v8 = vor.u32 %v4087_v27, %v4084_v46  ;;  %v4095_v11 = vor.u32 %v4094_v44, %v4091_v1  ;;  %v10179_v44 = vld [vmem:[#allocation204_spill] sm:$0xff] }
 0x344   : >> { %v10176_v17 = vcombine.low %v10174_v38, %v10175_v15  ;;  %v4138_v54 = vrot.slane %v4136_v39, 3  ;;  %v4141_v14 = vrot.slane %v4139_v51, 4  ;;  %v4051_v18 = vsel %vm1355_vm3, %v4043_v7, %v4050_v55 }
 0x345   : >> { %v4131_v49 = vrot.slane %v4129_v40, 3  ;;  %v4134_v53 = vrot.slane %v4132_v50, 4  ;;  %v10178_v12 = vcombine.low %v10177_v6, %v10177_v6  ;;  %4619 = vmatmul.mubr.bf16.gmra.mxu0 %v4051_v18  ;;  %v4096_v4 = vsel %vm1355_vm3, %v4088_v8, %v4095_v11 }
 0x346   : >> { %v3643_v35 = vsel %vm1186_vm2, %v10176_v17, %v3431_v23  ;;  %4715 = vmatprep.mubr.bf16.mxu1 %v4096_v4  ;;  %v10181_v47 = vcombine.low %v10179_v44, %v10180_v31  ;;  %v10183_v62 = vcombine.low %v10182_v36, %v10182_v36  ;;  %v4073_v42 = vor.u32 %v4072_v60, %v4069_v25  ;;  %v2984_v4 = vpop.permute.xlu1 %2983  ;;  %v10188_v36 = vld [vmem:[#allocation233_spill] sm:$0xff] }
 0x347   : >> { %v3645_v19 = vsel %vm1186_vm2, %v10178_v12, %v3431_v23  ;;  %v4159_v63 = vshrl.u32 %v3643_v35, 16  ;;  %v4162_v46 = vshll.u32 %v3643_v35, 16  ;;  %v4080_v10 = vor.u32 %v4079_v20, %v4076_v26  ;;  %v10185_v26 = vld [vmem:[#allocation238_spill] sm:$0xff] }
 0x348   : >> { %v4166_v27 = vshrl.u32 %v3645_v19, 16  ;;  %v4169_v1 = vshll.u32 %v3645_v19, 16  ;;  %v3515_v0 = vsel %vm1186_vm2, %v10181_v47, %v2982_v32  ;;  %v3517_v37 = vsel %vm1186_vm2, %v10183_v62, %v2982_v32  ;;  %v3433_v19 = vpop.permute.xlu0 %3432 }
 0x349   : >> { %v4161_v23 = vrot.slane %v4159_v63, 3  ;;  %v4164_v16 = vrot.slane %v4162_v46, 4  ;;  %v4114_v41 = vshrl.u32 %v3515_v0, 16  ;;  %v4117_v34 = vshll.u32 %v3515_v0, 16 }
 0x34a   : >> { %v4168_v57 = vrot.slane %v4166_v27, 3  ;;  %v4171_v48 = vrot.slane %v4169_v1, 4  ;;  %v4121_v40 = vshrl.u32 %v3517_v37, 16  ;;  %v4124_v45 = vshll.u32 %v3517_v37, 16  ;;  %v10187_v27 = vld [vmem:[#allocation218_spill] sm:$0xff] }
 0x34b   : >> { %v4116_v50 = vrot.slane %v4114_v41, 3  ;;  %v3603_v7 = vsel %vm1186_vm2, %v10184_v22, %v3275_v52  ;;  %v3605_v39 = vsel %vm1186_vm2, %v10184_v22, %v3277_v33  ;;  %v4119_v32 = vrot.slane %v4117_v34, 4  ;;  %v10190_v34 = vld [vmem:[#allocation234_spill] sm:$0xff] }
 0x34c   : >> { %v4123_v25 = vrot.slane %v4121_v40, 3  ;;  %v4126_v60 = vrot.slane %v4124_v45, 4  ;;  %v4144_v51 = vshrl.u32 %v3603_v7, 16  ;;  %v4081_v55 = vsel %vm1355_vm3, %v4073_v42, %v4080_v10 }
 0x34d   : >> { %v4147_v8 = vshll.u32 %v3603_v7, 16  ;;  %v4151_v11 = vshrl.u32 %v3605_v39, 16  ;;  %v4154_v38 = vshll.u32 %v3605_v39, 16  ;;  %4716 = vmatmul.mubr.bf16.gmra.mxu1 %v4081_v55  ;;  %v4135_v17 = vor.u32 %v4134_v53, %v4131_v49  ;;  %v3279_v39 = vpop.permute.xlu0 %3278 }
 0x34e   : >> { %v4146_v15 = vrot.slane %v4144_v51, 3  ;;  %v4142_v35 = vor.u32 %v4141_v14, %v4138_v54  ;;  %v10186_v20 = vrot.slane %v10185_v26, 5  ;;  %v3570_v1 = vsel %vm1186_vm2, %v10187_v27, %v3129_v5 }
 0x34f   : >> { %v4149_v18 = vrot.slane %v4147_v8, 4  ;;  %v4153_v6 = vrot.slane %v4151_v11, 3  ;;  %v4156_v33 = vrot.slane %v4154_v38, 4  ;;  %v4120_v44 = vor.u32 %v4119_v32, %v4116_v50  ;;  %v3281_v32 = vpop.permute.xlu1 %3280 }
 0x350   : >> { %v3567_v52 = vsel %vm1186_vm2, %v10186_v20, %v3127_v28  ;;  %v4143_v63 = vsel %vm1355_vm3, %v4135_v17, %v4142_v35  ;;  %v4213_v53 = vshrl.u32 %v3570_v1, 16  ;;  %v4216_v54 = vshll.u32 %v3570_v1, 16 }
 0x351   : >> { %v4206_v12 = vshrl.u32 %v3567_v52, 16  ;;  %v4209_v46 = vshll.u32 %v3567_v52, 16  ;;  %4626 = vmatprep.mubr.bf16.mxu0 %v4143_v63  ;;  %v4127_v14 = vor.u32 %v4126_v60, %v4123_v25  ;;  %v4165_v47 = vor.u32 %v4164_v16, %v4161_v23 }
 0x352   : >> { %v4172_v0 = vor.u32 %v4171_v48, %v4168_v57  ;;  %v10189_v62 = vcombine.low %v8837_v59, %v10188_v36  ;;  %v4215_v42 = vrot.slane %v4213_v53, 3  ;;  %v4218_v41 = vrot.slane %v4216_v54, 4 }
 0x353   : >> { %v4208_v49 = vrot.slane %v4206_v12, 3  ;;  %v4211_v31 = vrot.slane %v4209_v46, 4  ;;  %v4128_v28 = vsel %vm1355_vm3, %v4120_v44, %v4127_v14  ;;  %v10191_v5 = vcombine.low %v10190_v34, %v10190_v34 }
 0x354   : >> { %v3648_v37 = vsel %vm1186_vm2, %v10189_v62, %v3433_v19  ;;  %4627 = vmatmul.mubr.bf16.gmra.mxu0 %v4128_v28  ;;  %v4173_v45 = vsel %vm1355_vm3, %v4165_v47, %v4172_v0  ;;  %v10192_v59 = vcombine.low %v8850_v30, %v10101_v43  ;;  %v10193_v10 = vcombine.low %v10102_v29, %v10102_v29  ;;  %v6151_v0 = vld [vmem:[%s8238_s19 + $0x1bc] ss:$0 sps:$4 sm:$0x11]  }
 0x355   : >> { %v3650_v40 = vsel %vm1186_vm2, %v10191_v5, %v3433_v19  ;;  %v4236_v50 = vshrl.u32 %v3648_v37, 16  ;;  %v4239_v23 = vshll.u32 %v3648_v37, 16  ;;  %4723 = vmatprep.mubr.bf16.mxu1 %v4173_v45  ;;  %v4150_v7 = vor.u32 %v4149_v18, %v4146_v15 }
 0x356   : >> { %v4243_v16 = vshrl.u32 %v3650_v40, 16  ;;  %v4246_v57 = vshll.u32 %v3650_v40, 16  ;;  %v3520_v48 = vsel %vm1186_vm2, %v10192_v59, %v2984_v4  ;;  %v3522_v22 = vsel %vm1186_vm2, %v10193_v10, %v2984_v4  ;;  %v10194_v40 = vld [vmem:[#allocation237_spill] sm:$0xff] }
 0x357   : >> { %v4238_v25 = vrot.slane %v4236_v50, 3  ;;  %v4241_v60 = vrot.slane %v4239_v23, 4  ;;  %v4191_v55 = vshrl.u32 %v3520_v48, 16  ;;  %v4194_v11 = vshll.u32 %v3520_v48, 16 }
 0x358   : >> { %v4245_v51 = vrot.slane %v4243_v16, 3  ;;  %v4248_v8 = vrot.slane %v4246_v57, 4  ;;  %v4198_v38 = vshrl.u32 %v3522_v22, 16  ;;  %v4201_v17 = vshll.u32 %v3522_v22, 16 }
 0x359   : >> { %v4193_v35 = vrot.slane %v4191_v55, 3  ;;  %v4157_v43 = vor.u32 %v4156_v33, %v4153_v6  ;;  %v3608_v30 = vsel %vm1186_vm2, %v8869_v24, %v3279_v39  ;;  %v3610_v29 = vsel %vm1186_vm2, %v8869_v24, %v3281_v32  ;;  %v10203_v55 = vld [vmem:[#allocation252_spill] sm:$0xff] }
 0x35a   : >> { %v4196_v26 = vrot.slane %v4194_v11, 4  ;;  %v4200_v15 = vrot.slane %v4198_v38, 3  ;;  %v4203_v20 = vrot.slane %v4201_v17, 4  ;;  %v4221_v52 = vshrl.u32 %v3608_v30, 16  ;;  %v10205_v11 = vld [vmem:[#allocation236_spill] sm:$0xff] }
 0x35b   : >> { %v4158_v18 = vsel %vm1355_vm3, %v4150_v7, %v4157_v43  ;;  %v4224_v12 = vshll.u32 %v3608_v30, 16  ;;  %v4228_v19 = vshrl.u32 %v3610_v29, 16  ;;  %v4231_v4 = vshll.u32 %v3610_v29, 16  ;;  %v10206_v43 = vld [vmem:[#allocation257_spill] sm:$0xff]  ;;  %v10207_v30 = vld [vmem:[#allocation256_spill] sm:$0xff] }
 0x35c   : >> { %4724 = vmatmul.mubr.bf16.gmra.mxu1 %v4158_v18  ;;  %v4223_v63 = vrot.slane %v4221_v52, 3  ;;  %v4212_v46 = vor.u32 %v4211_v31, %v4208_v49  ;;  %v4219_v6 = vor.u32 %v4218_v41, %v4215_v42  ;;  %v4197_v33 = vor.u32 %v4196_v26, %v4193_v35  ;;  %v10209_v18 = vld [vmem:[#allocation255_spill] sm:$0xff] }
 0x35d   : >> { %v4226_v27 = vrot.slane %v4224_v12, 4  ;;  %v4230_v1 = vrot.slane %v4228_v19, 3  ;;  %v4233_v44 = vrot.slane %v4231_v4, 4  ;;  %v4204_v53 = vor.u32 %v4203_v20, %v4200_v15  ;;  %v10210_v12 = vld [vmem:[#allocation254_spill] sm:$0xff] }
 0x35e   : >> { %v4220_v24 = vsel %vm1355_vm3, %v4212_v46, %v4219_v6  ;;  %v4242_v54 = vor.u32 %v4241_v60, %v4238_v25  ;;  %v4249_v14 = vor.u32 %v4248_v8, %v4245_v51  ;;  %v4175_v47 = vshrl.u32 %v8914_v56, 16  ;;  %v10202_v51 = vld [vmem:[#allocation224_spill] sm:$0xff] }
 0x35f   : >> { %4634 = vmatprep.mubr.bf16.mxu0 %v4220_v24  ;;  %v4205_v36 = vsel %vm1355_vm3, %v4197_v33, %v4204_v53  ;;  %v4227_v62 = vor.u32 %v4226_v27, %v4223_v63  ;;  %v4234_v37 = vor.u32 %v4233_v44, %v4230_v1  ;;  %v3478_v49 = vsel %vm713_vm1, %v8914_v56, %v3477_v58 }
 0x360   : >> { %4635 = vmatmul.mubr.bf16.gmra.mxu0 %v4205_v36  ;;  %v4250_v31 = vsel %vm1355_vm3, %v4242_v54, %v4249_v14  ;;  %v3952_v42 = vshrl.u32 %v8924_v2, 16  ;;  %v3955_v41 = vshll.u32 %v8924_v2, 16  ;;  %v4178_v28 = vshll.u32 %v8914_v56, 16  ;;  %v10195_v2 = vld [vmem:[#allocation213_spill] sm:$0xff]  ;;  %v10196_v56 = vld [vmem:[#allocation235_spill] sm:$0xff] }
 0x361   : >> { %4731 = vmatprep.mubr.bf16.mxu1 %v4250_v31  ;;  %v4235_v34 = vsel %vm1355_vm3, %v4227_v62, %v4234_v37  ;;  %5893 = vmatprep.mubr.msk.bf16.mxu0 %vm1186_vm2, %v8872_v61  ;;  %v4183_v5 = vshrl.u32 %v3478_v49, 16  ;;  %v4186_v3 = vshll.u32 %v3478_v49, 16  ;;  %v3479_v45 = vrot.slane %v10194_v40, 5 }
 0x362   : >> { %v3881_v58 = vor.u32 %v8920_v21, %v8918_v13  ;;  %v4177_v50 = vrot.slane %v4175_v47, 3  ;;  %v4180_v23 = vrot.slane %v4178_v28, 4  ;;  %v3480_v16 = vrot.slane %v6151_v0, 5  ;;  %v10199_v13 = vld [vmem:[#allocation253_spill] sm:$0xff]  ;;  %v10200_v21 = vld [vmem:[#allocation208_spill] sm:$0xff] }
 0x363   : >> { %v4112_v57 = vor.u32 %v10195_v2, %v8890_v9  ;;  %v10197_v59 = vshrl.u32 %v10196_v56, 16  ;;  %v4185_v10 = vrot.slane %v4183_v5, 3  ;;  %v4188_v22 = vrot.slane %v4186_v3, 4 }
 0x364   : >> { %4732 = vmatmul.mubr.bf16.gmra.mxu1 %v4235_v34  ;;  %v10198_v61 = vshll.u32 %v10196_v56, 16  ;;  %v3954_v39 = vrot.slane %v3952_v42, 3  ;;  %v3957_v32 = vrot.slane %v3955_v41, 4  ;;  %v3481_v25 = vsel %vm713_vm1, %v3479_v45, %v3480_v16 }
 0x365   : >> { %v3946_v48 = vrot.slane %v10197_v59, 3  ;;  %v10201_v60 = vor.u32 %v10199_v13, %v10200_v21  ;;  %v10204_v8 = vor.u32 %v10202_v51, %v10203_v55  ;;  %5901 = vmatprep.mubr.msk.bf16.mxu1 %vm1186_vm2, %v10205_v11  ;;  %v4252_v38 = vshrl.u32 %v3479_v45, 16 }
 0x366   : >> { %v3949_v7 = vrot.slane %v10198_v61, 4  ;;  %v4255_v17 = vshll.u32 %v3479_v45, 16  ;;  %v4260_v35 = vshrl.u32 %v3481_v25, 16  ;;  %v10208_v29 = vor.u32 %v10206_v43, %v10207_v30 }
 0x367   : >> { %v3805_v9 = vsel %vm1355_vm3, %v10204_v8, %v10201_v60  ;;  %v4181_v15 = vor.u32 %v4180_v23, %v4177_v50  ;;  %v4189_v20 = vor.u32 %v4188_v22, %v4185_v10  ;;  %v4263_v52 = vshll.u32 %v3481_v25, 16 }
 0x368   : >> { %v3882_v26 = vsel %vm1355_vm3, %v10208_v29, %v3881_v58  ;;  %5894 = vmatmul.mubr.msk.bf16.vlgmr.msra.gmra.mxu0 %vm1186_vm2, %v3805_v9  ;;  %v10211_v19 = vor.u32 %v10209_v18, %v10210_v12  ;;  %v3950_v63 = vor.u32 %v3949_v7, %v3946_v48  ;;  %v3958_v46 = vor.u32 %v3957_v32, %v3954_v39 }
 0x369   : >> { %5897 = vmatprep.mubr.msk.bf16.mxu0 %vm1186_vm2, %v3882_v26  ;;  %v4254_v6 = vrot.slane %v4252_v38, 3  ;;  %v4257_v33 = vrot.slane %v4255_v17, 4  ;;  %v4262_v27 = vrot.slane %v4260_v35, 3  ;;  %v4265_v1 = vrot.slane %v4263_v52, 4 }
 0x36a   : >> { %v4113_v4 = vsel %vm1355_vm3, %v10211_v19, %v4112_v57  ;;  %v4190_v44 = vsel %vm1355_vm3, %v4181_v15, %v4189_v20  ;;  %v3959_v53 = vsel %vm1355_vm3, %v3950_v63, %v3958_v46 }
 0x36b   : >> { %v4258_v24 = vor.u32 %v4257_v33, %v4254_v6  ;;  %v4266_v54 = vor.u32 %v4265_v1, %v4262_v27 }
 0x36c   : >> { %5902 = vmatmul.mubr.msk.bf16.vlgmr.msra.gmra.mxu1 %vm1186_vm2, %v4113_v4 }
 0x36d   : >> { %5905 = vmatprep.mubr.msk.bf16.mxu1 %vm1186_vm2, %v4190_v44  ;;  %v4267_v14 = vsel %vm1355_vm3, %v4258_v24, %v4266_v54  ;;  %v10220_v54 = vld [vmem:[#allocation203_spill] sm:$0xff] }
 0x370   : >> { %5898 = vmatmul.mubr.msk.bf16.gmra.mxu0 %vm1186_vm2, %v3959_v53 }
 0x374   : >> { %5906 = vmatmul.mubr.msk.bf16.gmra.mxu1 %vm1186_vm2, %v4267_v14 }
 0x3c6   : >> { %v9250_v47 = vpop.f32.mrf.mxu1 }
 0x3c8   : >> { %v9252_v0 = vpop.f32.mrf.mxu1  ;;  %v5737_v36 = vpop.f32.mrf.mxu0 }
 0x3ca   : >> { %v5738_v62 = vpop.f32.mrf.mxu0  ;;  %v9254_v37 = vpop.f32.mrf.mxu1 }
 0x3cb   : >> { %v5739_v46 = vadd.f32 %v5738_v62, %v5737_v36  ;;  %v5803_v62 = vadd.f32 %v9252_v0, %v9250_v47 }
 0x3cc   : >> { %v5740_v49 = vpop.f32.mrf.mxu0  ;;  %v9256_v42 = vpop.f32.mrf.mxu1 }
 0x3cd   : >> { %v4581_v14 = vadd.f32 %v5739_v46, %v10220_v54 }
 0x3ce   : >> { %v5741_v31 = vpop.f32.mrf.mxu0 }
 0x3cf   : >> { %v5742_v33 = vadd.f32 %v5741_v31, %v5740_v49 }
 0x3d3   : >> { %v5743_v41 = vpop.f32.mrf.mxu0 }
 0x3d4   : >> { %v5807_v28 = vpop.f32.mrf.mxu1 }
 0x3d5   : >> { %v5744_v34 = vpop.f32.mrf.mxu0 }
 0x3d6   : >> { %v5808_v5 = vpop.f32.mrf.mxu1  ;;  %v5745_v6 = vadd.f32 %v5744_v34, %v5743_v41  ;;  %v5806_v34 = vadd.f32 %v9256_v42, %v9254_v37 }
 0x3d7   : >> { %v5746_v3 = vpop.f32.mrf.mxu0  ;;  %v5809_v49 = vadd.f32 %v5808_v5, %v5807_v28 }
 0x3d8   : >> { %v5810_v45 = vpop.f32.mrf.mxu1 }
 0x3d9   : >> { %v5747_v40 = vpop.f32.mrf.mxu0 }
 0x3da   : >> { %v5811_v23 = vpop.f32.mrf.mxu1  ;;  %v5748_v27 = vadd.f32 %v5747_v40, %v5746_v3 }
 0x3db   : >> { %v5749_v58 = vpop.f32.mrf.mxu0  ;;  %v5812_v3 = vadd.f32 %v5811_v23, %v5810_v45 }
 0x3dd   : >> { %v5750_v50 = vpop.f32.mrf.mxu0 }
 0x3de   : >> { %v5751_v31 = vadd.f32 %v5750_v50, %v5749_v58 }
 0x3df   : >> { %v9258_v16 = vpop.f32.mrf.mxu0 }
 0x3e0   : >> { %v4597_v37 = vadd.f32 %v5751_v31, %v10220_v54 }
 0x3e1   : >> { %v9260_v56 = vpop.f32.mrf.mxu0 }
 0x3e2   : >> { %v5754_v58 = vadd.f32 %v9260_v56, %v9258_v16 }
 0x3e3   : >> { %v5813_v2 = vpop.f32.mrf.mxu1 }
 0x3e5   : >> { %v5814_v57 = vpop.f32.mrf.mxu1 }
 0x3e7   : >> { %v9262_v48 = vpop.f32.mrf.mxu1 }
 0x3e8   : >> { %10212 = vst [vmem:[#allocation231_spill] sm:$0xff] %v9262_v48 }
 0x3e9   : >> { %v5755_v59 = vpop.f32.mrf.mxu0  ;;  %v9264_v22 = vpop.f32.mrf.mxu1 }
 0x3ea   : >> { %10213 = vst [vmem:[#allocation225_spill] sm:$0xff] %v9264_v22 }
 0x3eb   : >> { %v5756_v10 = vpop.f32.mrf.mxu0 }
 0x3ed   : >> { %v9266_v61 = vpop.f32.mrf.mxu0 }
 0x3ef   : >> { %v9272_v32 = vpop.f32.mrf.mxu0 }
 0x3f0   : >> { %v5760_v16 = vadd.f32 %v9272_v32, %v9266_v61 }
 0x3f1   : >> { %v9268_v7 = vpop.f32.mrf.mxu1 }
 0x3f3   : >> { %v9270_v39 = vpop.f32.mrf.mxu1 }
 0x3f4   : >> { %v5821_v50 = vadd.f32 %v9270_v39, %v9268_v7 }
 0x3f5   : >> { %v9274_v13 = vpop.f32.mrf.mxu1 }
 0x3f7   : >> { %v5761_v25 = vpop.f32.mrf.mxu0  ;;  %v9276_v60 = vpop.f32.mrf.mxu1 }
 0x3f9   : >> { %v5762_v21 = vpop.f32.mrf.mxu0 }
 0x3fa   : >> { %v5763_v40 = vadd.f32 %v5762_v21, %v5761_v25 }
 0x3fb   : >> { %v5764_v51 = vpop.f32.mrf.mxu0 }
 0x3fc   : >> { %v4613_v23 = vadd.f32 %v5763_v40, %v10220_v54 }
 0x3fd   : >> { %v5765_v9 = vpop.f32.mrf.mxu0 }
 0x3fe   : >> { %v5825_v55 = vpop.f32.mrf.mxu1 }
 0x400   : >> { %v5826_v8 = vpop.f32.mrf.mxu1 }
 0x402   : >> { %v9278_v38 = vpop.f32.mrf.mxu1 }
 0x404   : >> { %v9280_v35 = vpop.f32.mrf.mxu1 }
 0x405   : >> { %v5767_v11 = vpop.f32.mrf.mxu0  ;;  %v5830_v56 = vadd.f32 %v9280_v35, %v9278_v38 }
 0x407   : >> { %v5768_v17 = vpop.f32.mrf.mxu0 }
 0x408   : >> { %v5769_v41 = vadd.f32 %v5768_v17, %v5767_v11 }
 0x409   : >> { %v5770_v43 = vpop.f32.mrf.mxu0 }
 0x40a   : >> { %v4621_v42 = vadd.f32 %v5769_v41, %v10220_v54 }
 0x40b   : >> { %v5771_v26 = vpop.f32.mrf.mxu0 }
 0x40c   : >> { %v5772_v5 = vadd.f32 %v5771_v26, %v5770_v43 }
 0x40d   : >> { %v5831_v30 = vpop.f32.mrf.mxu1 }
 0x40f   : >> { %v5832_v29 = vpop.f32.mrf.mxu1 }
 0x411   : >> { %v5834_v20 = vpop.f32.mrf.mxu1 }
 0x413   : >> { %v5835_v18 = vpop.f32.mrf.mxu1 }
 0x414   : >> { %v9282_v15 = vpop.f32.mrf.mxu0 }
 0x416   : >> { %v9284_v52 = vpop.f32.mrf.mxu0 }
 0x417   : >> { %v5775_v32 = vadd.f32 %v9284_v52, %v9282_v15 }
 0x418   : >> { %v9286_v12 = vpop.f32.mrf.mxu0 }
 0x419   : >> { %10214 = vst [vmem:[#allocation206_spill] sm:$0xff] %v9286_v12  ;;  %v4589_v12 = vadd.f32 %v5745_v6, %v10220_v54  ;;  %v4629_v31 = vadd.f32 %v5775_v32, %v10220_v54 }
 0x41a   : >> { %v9290_v4 = vpop.f32.mrf.mxu0 }
 0x41b   : >> { %10216 = vst [vmem:[#allocation239_spill] sm:$0xff] %v9290_v4  ;;  %v4592_v4 = vadd.f32 %v5748_v27, %v10220_v54  ;;  %v5833_v27 = vadd.f32 %v5832_v29, %v5831_v30 }
 0x41c   : >> { %v9288_v19 = vpop.f32.mrf.mxu1 }
 0x41d   : >> { %10215 = vst [vmem:[#allocation207_spill] sm:$0xff] %v9288_v19  ;;  %v4584_v19 = vadd.f32 %v5742_v33, %v10220_v54  ;;  %v5815_v33 = vadd.f32 %v5814_v57, %v5813_v2  ;;  %v4689_v0 = vadd.f32 %v5812_v3, %v4592_v4  ;;  %v5766_v2 = vadd.f32 %v5765_v9, %v5764_v51 }
 0x41e   : >> { %v9292_v63 = vpop.f32.mrf.mxu1  ;;  %v4718_v21 = vadd.f32 %v5833_v27, %v4621_v42  ;;  %v4624_v9 = vadd.f32 %v5772_v5, %v10220_v54 }
 0x41f   : >> { %10217 = vst [vmem:[#allocation209_spill] sm:$0xff] %v9292_v63  ;;  %v5827_v63 = vadd.f32 %v5826_v8, %v5825_v55  ;;  %v4681_v28 = vadd.f32 %v5806_v34, %v4584_v19  ;;  %v4694_v55 = vadd.f32 %v5815_v33, %v4597_v37  ;;  %v4616_v61 = vadd.f32 %v5766_v2, %v10220_v54 }
 0x420   : >> { %v9294_v1 = vpop.f32.mrf.mxu1  ;;  %v5779_v44 = vpop.f32.mrf.mxu0  ;;  %v4608_v19 = vadd.f32 %v5760_v16, %v10220_v54  ;;  %v10227_v41 = vld [vmem:[#allocation206_spill] sm:$0xff] }
 0x421   : >> { %10218 = vst [vmem:[#allocation210_spill] sm:$0xff] %v9294_v1  ;;  %v4678_v1 = vadd.f32 %v5803_v62, %v4581_v14  ;;  %v4710_v51 = vadd.f32 %v5827_v63, %v4613_v23 }
 0x422   : >> { %v9296_v53 = vpop.f32.mrf.mxu1  ;;  %v5780_v24 = vpop.f32.mrf.mxu0  ;;  %v10228_v34 = vld [vmem:[#allocation239_spill] sm:$0xff] }
 0x423   : >> { %10219 = vst [vmem:[#allocation240_spill] sm:$0xff] %v9296_v53  ;;  %v4686_v53 = vadd.f32 %v5809_v49, %v4589_v12  ;;  %v5781_v11 = vadd.f32 %v5780_v24, %v5779_v44  ;;  %v10222_v12 = vld [vmem:[#allocation231_spill] sm:$0xff]  ;;  %v4713_v44 = vadd.f32 %v5830_v56, %v4616_v61  ;;  %v4600_v49 = vadd.f32 %v5754_v58, %v10220_v54 }
 0x424   : >> { %v9302_v22 = vpop.f32.mrf.mxu0  ;;  %v5843_v36 = vpop.f32.mrf.mxu1  ;;  %v10224_v4 = vld [vmem:[#allocation207_spill] sm:$0xff]  ;;  %v5778_v3 = vadd.f32 %v10228_v34, %v10227_v41 }
 0x425   : >> { %10221 = vst [vmem:[#allocation211_spill] sm:$0xff] %v9302_v22  ;;  %v5757_v22 = vadd.f32 %v5756_v10, %v5755_v59  ;;  %v5836_v10 = vadd.f32 %v5835_v18, %v5834_v20 }
 0x426   : >> { %v5783_v46 = vpop.f32.mrf.mxu0  ;;  %v5844_v6 = vpop.f32.mrf.mxu1  ;;  %v10225_v15 = vld [vmem:[#allocation209_spill] sm:$0xff] }
 0x427   : >> { %v4605_v8 = vadd.f32 %v5757_v22, %v10220_v54  ;;  %v5824_v22 = vadd.f32 %v9276_v60, %v9274_v13  ;;  %v5845_v29 = vadd.f32 %v5844_v6, %v5843_v36  ;;  %v4721_v18 = vadd.f32 %v5836_v10, %v4624_v9  ;;  %v10223_v13 = vld [vmem:[#allocation225_spill] sm:$0xff] }
 0x428   : >> { %v5846_v48 = vpop.f32.mrf.mxu1  ;;  %v5895_v47 = vpop.f32.mrf.mxu0  ;;  %v5818_v60 = vadd.f32 %v10223_v13, %v10222_v12  ;;  %v5839_v52 = vadd.f32 %v10225_v15, %v10224_v4  ;;  %v4632_v10 = vadd.f32 %v5778_v3, %v10220_v54 }
 0x429   : >> { %v4783_v45 = vadd.f32 %v5895_v47, %v4686_v53  ;;  %v4702_v30 = vadd.f32 %v5821_v50, %v4605_v8  ;;  %v4637_v53 = vadd.f32 %v5781_v11, %v10220_v54  ;;  %v4705_v33 = vadd.f32 %v5824_v22, %v4608_v19 }
 0x42a   : >> { %v5847_v57 = vpop.f32.mrf.mxu1  ;;  %v4774_v59 = vpop.f32.mrf.mxu0  ;;  %v4697_v42 = vadd.f32 %v5818_v60, %v4600_v49  ;;  %v4726_v5 = vadd.f32 %v5839_v52, %v4629_v31  ;;  %v10230_v58 = vld [vmem:[#allocation240_spill] sm:$0xff] }
 0x42b   : >> { %4841 = vst.msk [vmem:[%s9311_s21 + $0x10] sm:$0xff] %vm1186_vm2, %v4783_v45  ;;  %v4775_v25 = vadd.f32 %v4774_v59, %v4678_v1  ;;  %v5848_v27 = vadd.f32 %v5847_v57, %v5846_v48  ;;  %v10229_v45 = vld [vmem:[#allocation210_spill] sm:$0xff] }
 0x42c   : >> { %v5896_v7 = vpop.f32.mrf.mxu0  ;;  %v5903_v39 = vpop.f32.mrf.mxu1  ;;  %v10226_v24 = vld [vmem:[#allocation211_spill] sm:$0xff]  ;;  %v5842_v50 = vadd.f32 %v10230_v58, %v10229_v45 }
 0x42d   : >> { %4839 = vst.msk [vmem:[%s9311_s21] sm:$0xff] %vm1186_vm2, %v4775_v25  ;;  %v4786_v17 = vadd.f32 %v5896_v7, %v4689_v0  ;;  %v4815_v43 = vadd.f32 %v5903_v39, %v4718_v21  ;;  %v5784_v14 = vadd.f32 %v5783_v46, %v10226_v24  ;;  %v4734_v0 = vadd.f32 %v5845_v29, %v4637_v53 }
 0x42e   : >> { %v4777_v38 = vpop.f32.mrf.mxu0  ;;  %v4806_v35 = vpop.f32.mrf.mxu1  ;;  %v4729_v56 = vadd.f32 %v5842_v50, %v4632_v10 }
 0x42f   : >> { %4842 = vst.msk [vmem:[%s9311_s21 + $0x18] sm:$0xff] %vm1186_vm2, %v4786_v17  ;;  %4849 = vst.msk [vmem:[%s9311_s21 + $0x50] sm:$0xff] %vm1186_vm2, %v4815_v43  ;;  %v4778_v26 = vadd.f32 %v4777_v38, %v4681_v28  ;;  %v4807_v20 = vadd.f32 %v4806_v35, %v4710_v51  ;;  %v4640_v48 = vadd.f32 %v5784_v14, %v10220_v54 }
 0x430   : >> { %v5899_v63 = vpop.f32.mrf.mxu0  ;;  %v5904_v1 = vpop.f32.mrf.mxu1 }
 0x431   : >> { %4840 = vst.msk [vmem:[%s9311_s21 + $0x8] sm:$0xff] %vm1186_vm2, %v4778_v26  ;;  %4847 = vst.msk [vmem:[%s9311_s21 + $0x40] sm:$0xff] %vm1186_vm2, %v4807_v20  ;;  %v4799_v36 = vadd.f32 %v5899_v63, %v4702_v30  ;;  %v4818_v62 = vadd.f32 %v5904_v1, %v4721_v18 }
 0x432   : >> { %v4790_v40 = vpop.f32.mrf.mxu0  ;;  %v4809_v6 = vpop.f32.mrf.mxu1 }
 0x433   : >> { %4845 = vst.msk [vmem:[%s9311_s21 + $0x30] sm:$0xff] %vm1186_vm2, %v4799_v36  ;;  %4850 = vst.msk [vmem:[%s9311_s21 + $0x58] sm:$0xff] %vm1186_vm2, %v4818_v62  ;;  %v4791_v46 = vadd.f32 %v4790_v40, %v4694_v55  ;;  %v4810_v47 = vadd.f32 %v4809_v6, %v4713_v44  ;;  %v4737_v55 = vadd.f32 %v5848_v27, %v4640_v48 }
 0x434   : >> { %v5900_v28 = vpop.f32.mrf.mxu0  ;;  %v5907_v37 = vpop.f32.mrf.mxu1 }
 0x435   : >> { %4843 = vst.msk [vmem:[%s9311_s21 + $0x20] sm:$0xff] %vm1186_vm2, %v4791_v46  ;;  %4848 = vst.msk [vmem:[%s9311_s21 + $0x48] sm:$0xff] %vm1186_vm2, %v4810_v47  ;;  %v4802_v23 = vadd.f32 %v5900_v28, %v4705_v33  ;;  %v4831_v2 = vadd.f32 %v5907_v37, %v4734_v0 }
 0x436   : >> { %v4793_v57 = vpop.f32.mrf.mxu0  ;;  %v4822_v59 = vpop.f32.mrf.mxu1 }
 0x437   : >> { %4846 = vst.msk [vmem:[%s9311_s21 + $0x38] sm:$0xff] %vm1186_vm2, %v4802_v23  ;;  %4853 = vst.msk [vmem:[%s9311_s21 + $0x70] sm:$0xff] %vm1186_vm2, %v4831_v2  ;;  %v4794_v25 = vadd.f32 %v4793_v57, %v4697_v42  ;;  %v4823_v21 = vadd.f32 %v4822_v59, %v4726_v5 }
 0x438   : >> { %v5908_v8 = vpop.f32.mrf.mxu1 }
 0x439   : >> { %4844 = vst.msk [vmem:[%s9311_s21 + $0x28] sm:$0xff] %vm1186_vm2, %v4794_v25  ;;  %4851 = vst.msk [vmem:[%s9311_s21 + $0x60] sm:$0xff] %vm1186_vm2, %v4823_v21  ;;  %v4834_v16 = vadd.f32 %v5908_v8, %v4737_v55  ;;  %2720 = sbr.rel (!%p2718_p7) target bundleno = 623 (0x26f), region = 121 }
 0x43a   : >> { %v4825_v7 = vpop.f32.mrf.mxu1 }
 0x43b   : >> { %4854 = vst.msk [vmem:[%s9311_s21 + $0x78] sm:$0xff] %vm1186_vm2, %v4834_v16  ;;  %v4826_v39 = vadd.f32 %v4825_v7, %v4729_v56 }
 0x43d   : >> { %4852 = vst.msk [vmem:[%s9311_s21 + $0x68] sm:$0xff] %vm1186_vm2, %v4826_v39 }
 0x43e PF: > { %s13_s12 = sadd.s32 1, %s6170_s12  }
 0x43f   : > { %p10_p8 = scmp.ge.s32.totalorder %s13_s12, 4  }
 0x441   :  { %12 = sbr.rel (!%p10_p8) target bundleno = 1 (0x1), region = 132 }

</bundles_post_ra>
